<compile_context>
chip_gen: v7x
topology: tpu7x:2x2x1
jax: 0.10.0
libtpu: 0.0.40
codegen_flags: <defaults>
</compile_context>

<pallas_src>
import functools
import math

import jax
import jax.numpy as jnp
from jax.experimental import pallas as pl
from jax.experimental.pallas import tpu as pltpu


_EPS = 1e-5
_MAX_FOLDED_WIDTH = 512   # cap on g*C; keeps the mask matmul well under the HBM bound


def _ln_folded_kernel(x_ref, m_ref, o_ref, *, seg_len, scale_in_io_dtype):
    """Bias-free LayerNorm on a lane-folded tile.

    x_ref/o_ref: (TILE_ROWS, L) with L = g*seg_len; each kernel row holds g
    independent logical rows side by side.  m_ref: (L, L) block-diagonal 0/1 mask,
    so `x @ m` broadcasts each segment's sum to every lane of that segment (MXU).
    """
    xf = x_ref[...].astype(jnp.float32)
    m = m_ref[...]
    inv_n = jnp.float32(1.0 / seg_len)

    # Two-pass moments (parity with torch.var(unbiased=False)).
    mean = jnp.dot(xf, m, precision=jax.lax.Precision.HIGHEST,
                   preferred_element_type=jnp.float32) * inv_n
    d = xf - mean
    var = jnp.dot(d * d, m, precision=jax.lax.Precision.HIGHEST,
                  preferred_element_type=jnp.float32) * inv_n
    inv = jax.lax.rsqrt(var + jnp.float32(_EPS))   # EUP slot; free under the DMA bound

    # BiasFree_LayerNorm divides x (NOT x - mean) by sqrt(var + eps).
    if scale_in_io_dtype:
        o_ref[...] = x_ref[...] * inv.astype(o_ref.dtype)
    else:
        o_ref[...] = (xf * inv).astype(o_ref.dtype)


def _ln_plain_kernel(x_ref, o_ref, *, scale_in_io_dtype):
    """Fallback: one logical row per kernel row (C already lane-dense or unfoldable)."""
    xf = x_ref[...].astype(jnp.float32)
    mean = jnp.mean(xf, axis=-1, keepdims=True)
    d = xf - mean
    var = jnp.mean(d * d, axis=-1, keepdims=True)
    inv = jax.lax.rsqrt(var + jnp.float32(_EPS))
    if scale_in_io_dtype:
        o_ref[...] = x_ref[...] * inv.astype(o_ref.dtype)
    else:
        o_ref[...] = (xf * inv).astype(o_ref.dtype)


def _fold_factor(n_rows, c):
    """Smallest g with (g*c) % 128 == 0, g*c <= cap and g | n_rows; else 1 (no fold)."""
    if c % 128 == 0:
        return 1
    g = 128 // math.gcd(c, 128)
    if g > 1 and g * c <= _MAX_FOLDED_WIDTH and n_rows % g == 0:
        return g
    return 1


def _vmem_limit_bytes():
    """Scoped-VMEM limit per generation (v5e/v6e: 128 MiB physical, v7x: 64 MiB)."""
    try:
        cap = getattr(pltpu.get_tpu_info(), "vmem_capacity_bytes", None)
    except Exception:
        cap = None
    if not cap:
        cap = 64 * 1024 * 1024          # conservative default: v7x physical VMEM
    return min(cap // 2, 64 * 1024 * 1024)


def _pick_tile_rows(n_rows, width, dtype, vmem_limit):
    """Largest row tile (sized in bytes) that keeps the double-buffered pipeline in VMEM."""
    itemsize = jnp.dtype(dtype).itemsize
    pack = max(8, 32 // itemsize)                 # sublane packing granule (8/16/32)
    lanes = pl.cdiv(width, 128) * 128             # lane-padded row width
    # Per tile row: double-buffered input + output, plus ~4 f32 working copies.
    per_row = lanes * (4 * itemsize + 4 * 4)
    budget = max(int(vmem_limit * 0.75) - 4 * 1024 * 1024, per_row * pack)
    tr = max(pack, (budget // per_row) // pack * pack)
    # Prefer >= ~8 grid steps (v7x megacore + per-core double-buffering), but keep
    # tiles >= ~1 MiB of input so the ~0.35 us per-grid-step overhead stays amortized.
    min_rows = max(pack, ((1 << 20) // (lanes * itemsize)) // pack * pack)
    step_rows = pl.cdiv(pl.cdiv(n_rows, 8), pack) * pack
    tr = min(tr, max(step_rows, min_rows))
    if tr >= n_rows:
        return n_rows                             # single block == full array: always legal
    return tr


def biasfree_layernorm(x):
    """Bias-free LayerNorm over the last dimension of x (matches BiasFree_LayerNorm)."""
    orig_shape = x.shape
    c = orig_shape[-1]
    rows = 1
    for s in orig_shape[:-1]:
        rows *= s
    x2d = x.reshape(rows, c)

    g = _fold_factor(rows, c)
    width = g * c
    n_rows = rows // g
    x_folded = x2d.reshape(n_rows, width)         # contiguous reshape: free (no copy)

    vmem_limit = _vmem_limit_bytes()
    tile_rows = _pick_tile_rows(n_rows, width, x.dtype, vmem_limit)
    grid = (pl.cdiv(n_rows, tile_rows),)          # ragged last block masked by Pallas

    itemsize = jnp.dtype(x.dtype).itemsize
    mm_flops = 0 if g == 1 else 2 * (2 * n_rows * width * width)
    cost = pl.CostEstimate(
        flops=6 * rows * c + mm_flops,
        transcendentals=rows,
        bytes_accessed=2 * rows * c * itemsize,
    )
    compiler_params = pltpu.CompilerParams(
        dimension_semantics=("parallel",),
        vmem_limit_bytes=vmem_limit,
    )
    scale_in_io_dtype = x.dtype in (jnp.dtype(jnp.bfloat16), jnp.dtype(jnp.float16))
    row_spec = pl.BlockSpec((tile_rows, width), lambda i: (i, 0))

    if g == 1:
        out = pl.pallas_call(
            functools.partial(_ln_plain_kernel, scale_in_io_dtype=scale_in_io_dtype),
            out_shape=jax.ShapeDtypeStruct((n_rows, width), x.dtype),
            grid_spec=pltpu.PrefetchScalarGridSpec(
                num_scalar_prefetch=0, grid=grid,
                in_specs=[row_spec], out_specs=row_spec),
            compiler_params=compiler_params,
            cost_estimate=cost,
        )(x_folded)
    else:
        # Block-diagonal 0/1 mask: m[i, j] = 1 iff lanes i and j belong to the same
        # logical row (segment of length c).  Constant index_map -> DMA'd only once.
        seg = jnp.arange(width, dtype=jnp.int32) // c
        mask = (seg[:, None] == seg[None, :]).astype(jnp.float32)
        out = pl.pallas_call(
            functools.partial(_ln_folded_kernel, seg_len=c,
                              scale_in_io_dtype=scale_in_io_dtype),
            out_shape=jax.ShapeDtypeStruct((n_rows, width), x.dtype),
            grid_spec=pltpu.PrefetchScalarGridSpec(
                num_scalar_prefetch=0, grid=grid,
                in_specs=[row_spec,
                          pl.BlockSpec((width, width), lambda i: (0, 0))],
                out_specs=row_spec),
            compiler_params=compiler_params,
            cost_estimate=cost,
        )(x_folded, mask)

    return out.reshape(orig_shape)


def _reference(x):
    xf = x.astype(jnp.float32)
    mean = jnp.mean(xf, axis=-1, keepdims=True)
    var = jnp.mean((xf - mean) ** 2, axis=-1, keepdims=True)
    return (xf / jnp.sqrt(var + _EPS)).astype(x.dtype)


if __name__ == "__main__":
    key = jax.random.PRNGKey(0)
    k1, k2, k3, k4 = jax.random.split(key, 4)

    # Typical HTB/Restormer usage: (B, H*W, C) normalized over C.
    # C=48 exercises the lane-folded path (g=8, folded width 384), with a DC offset.
    x = jax.random.normal(k1, (2, 64, 48), dtype=jnp.float32) * 1.5 + 0.3
    out = jax.block_until_ready(biasfree_layernorm(x))
    assert out.shape == x.shape
    assert jnp.allclose(out, _reference(x), atol=1e-4, rtol=1e-4)

    # C=32 -> g=4, folded width 128.
    x2 = jax.random.normal(k2, (2, 8, 32), dtype=jnp.float32)
    out2 = jax.block_until_ready(biasfree_layernorm(x2))
    assert jnp.allclose(out2, _reference(x2), atol=1e-4, rtol=1e-4)

    # Unfoldable C + ragged rows -> plain fallback path (full-extent single block).
    x3 = jax.random.normal(k3, (3, 5, 33), dtype=jnp.float32)
    out3 = jax.block_until_ready(biasfree_layernorm(x3))
    assert jnp.allclose(out3, _reference(x3), atol=1e-5, rtol=1e-5)

    # bf16 I/O: stats in f32, final scale multiply in bf16.
    x4 = jax.random.normal(k4, (2, 64, 48), dtype=jnp.bfloat16)
    out4 = jax.block_until_ready(biasfree_layernorm(x4))
    assert jnp.allclose(out4.astype(jnp.float32), _reference(x4).astype(jnp.float32),
                        atol=5e-2, rtol=5e-2)

    print("KERNEL_OK")
</pallas_src>

<mosaic_0001>
module attributes {stable_mosaic.version = 11 : i64} {
  func.func @_ln_folded_kernel(%arg0: i32, %arg1: memref<16x384xf32, #tpu.memory_space<vmem>>, %arg2: memref<384x384xf32, #tpu.memory_space<vmem>>, %arg3: memref<16x384xf32, #tpu.memory_space<vmem>>) attributes {dimension_semantics = [#tpu.dimension_semantics<parallel>], iteration_bounds = array<i64: 1>, scalar_prefetch = 0 : i64, scratch_operands = 0 : i64, tpu.core_type = #tpu.core_type<tc>, window_params = [{transform_indices = @transform_0, window_bounds = array<i64: 16, 384>}, {pipeline_mode = #tpu.pipeline_mode<synchronous>, transform_indices = @transform_1, window_bounds = array<i64: 384, 384>}, {transform_indices = @transform_2, window_bounds = array<i64: 16, 384>}]} {
    %c0 = arith.constant 0 : index
    %c0_0 = arith.constant 0 : index
    %0 = vector.load %arg1[%c0, %c0_0] : memref<16x384xf32, #tpu.memory_space<vmem>>, vector<16x384xf32>
    %c0_1 = arith.constant 0 : index
    %c0_2 = arith.constant 0 : index
    %1 = vector.load %arg2[%c0_1, %c0_2] : memref<384x384xf32, #tpu.memory_space<vmem>>, vector<384x384xf32>
    %cst = arith.constant dense<0.000000e+00> : vector<16x384xf32>
    %2 = tpu.matmul %0, %1, %cst {dimension_numbers = #tpu.dot_dimension_numbers<[1], [0], [0], [1], [0, 0, 1, 1], [], []>, precision = #tpu.contract_precision<fp32>} : vector<16x384xf32>, vector<384x384xf32>, vector<16x384xf32> -> vector<16x384xf32>
    %cst_3 = arith.constant 0.020833334 : f32
    %3 = vector.broadcast %cst_3 : f32 to vector<16x384xf32>
    %4 = arith.mulf %2, %3 : vector<16x384xf32>
    %5 = arith.subf %0, %4 : vector<16x384xf32>
    %6 = arith.mulf %5, %5 : vector<16x384xf32>
    %cst_4 = arith.constant dense<0.000000e+00> : vector<16x384xf32>
    %7 = tpu.matmul %6, %1, %cst_4 {dimension_numbers = #tpu.dot_dimension_numbers<[1], [0], [0], [1], [0, 0, 1, 1], [], []>, precision = #tpu.contract_precision<fp32>} : vector<16x384xf32>, vector<384x384xf32>, vector<16x384xf32> -> vector<16x384xf32>
    %cst_5 = arith.constant 0.020833334 : f32
    %8 = vector.broadcast %cst_5 : f32 to vector<16x384xf32>
    %9 = arith.mulf %7, %8 : vector<16x384xf32>
    %cst_6 = arith.constant 9.99999974E-6 : f32
    %10 = vector.broadcast %cst_6 : f32 to vector<16x384xf32>
    %11 = arith.addf %9, %10 : vector<16x384xf32>
    %12 = math.rsqrt %11 : vector<16x384xf32>
    %13 = arith.mulf %0, %12 : vector<16x384xf32>
    %c0_7 = arith.constant 0 : index
    %c0_8 = arith.constant 0 : index
    %14 = vector.load %arg3[%c0_7, %c0_8] : memref<16x384xf32, #tpu.memory_space<vmem>>, vector<16x384xf32>
    tpu.vector_store %arg3[%c0_7, %c0_8], %13 {strides = array<i32>} : memref<16x384xf32, #tpu.memory_space<vmem>>, vector<16x384xf32>,
    return
  }
  func.func @transform_0(%arg0: i32) -> (i32, i32) {
    %c0_i32 = arith.constant 0 : i32
    %c0_i32_0 = arith.constant 0 : i32
    return %arg0, %c0_i32 : i32, i32
  }
  func.func @transform_1(%arg0: i32) -> (i32, i32) {
    %c0_i32 = arith.constant 0 : i32
    %c0_i32_0 = arith.constant 0 : i32
    %c0_i32_1 = arith.constant 0 : i32
    return %c0_i32, %c0_i32_0 : i32, i32
  }
  func.func @transform_2(%arg0: i32) -> (i32, i32) {
    %c0_i32 = arith.constant 0 : i32
    %c0_i32_0 = arith.constant 0 : i32
    return %arg0, %c0_i32 : i32, i32
  }
}

</mosaic_0001>

<bundles_post_ra>
// kernel: tpu_custom_call.1
= control target key start
LH: loop header
LB: loop body
LE: loop exit
PB: predicated region body
PF: predicated region fallthrough
CT: control target
= control target key end

     0   :  { %7 = vsyncpa [#allocation3], 0  ;;  %s15508_s0 = inlined_call_operand.hbm [shape: f32[16,384], index: 0, kind: input, shape index: {}]   ;;  %s15509_s1 = inlined_call_operand.hbm [shape: f32[384,384], index: 1, kind: input, shape index: {}]   ;;  %s15510_s2 = inlined_call_operand.hbm [shape: f32[16,384], index: 2, kind: output, shape index: {}]  }
   0x1   :  { %8 = vsyncpa [#allocation6], 0 }
   0x2   :  { %9 = vsyncpa [#allocation4], 0  ;;  %s11215_s9 = smov [#allocation2]   ;;  %s11143_s13 = scalar_lea.hbm %s15508_s0, 768 }
   0x3   :  { %s15_s10 = sshll.u32 %s11215_s9, 4  ;;  %p11144_p0 = scmp.ne.s32.totalorder %s15508_s0, %s11143_s13  ;;  %s16_s10 = int_to_ptr.vmem [resolvable:$true] %s15_s10 }
   0x4   :  { %p11147_p1 = scmp.lt.u32.totalorder %s11143_s13, %s15508_s0 }
   0x6   :  { %p11149_p2 = pnand %p11147_p1, %p11144_p0 }
   0x8   :  { %11152 = shalt.err (!%p11149_p2)
}
   0x9   :  { %s11153_s18 = scalar_lea.vmem %s16_s10, 768  ;;  %p11158_p4 = scmp.lt.s32.totalorder %s16_s10, %s16_s10 }
   0xa   :  { %p11154_p3 = scmp.ne.s32.totalorder %s16_s10, %s11153_s18  ;;  %p11159_p5 = scmp.lt.s32.totalorder %s11153_s18, %s11153_s18 }
   0xc   :  { %p11160_p6 = por %p11159_p5, %p11158_p4 }
   0xe   :  { %p11161_p7 = pnand %p11160_p6, %p11154_p3 }
  0x10   :  { %11164 = shalt.err (!%p11161_p7)
}
  0x11   :  { %s11216_s19 = smov 384   ;;  %s11217_s20 = smov 24  }
  0x12   :  { %21 = dma.hbm_to_vmem [thread:$0]  %s15508_s0, 768, %s16_s10, [#allocation3], %s11216_s19, %s11216_s19, %s11217_s20  }
  0x13   :  { %s11218_s23 = smov [#allocation5]   ;;  %s11165_s27 = scalar_lea.hbm %s15509_s1, 18432 }
  0x14   :  { %s27_s24 = sshll.u32 %s11218_s23, 4  ;;  %p11166_p8 = scmp.ne.s32.totalorder %s15509_s1, %s11165_s27  ;;  %s28_s24 = int_to_ptr.vmem [resolvable:$true] %s27_s24 }
  0x15   :  { %p11169_p9 = scmp.lt.u32.totalorder %s11165_s27, %s15509_s1 }
  0x17   :  { %p11171_p10 = pnand %p11169_p9, %p11166_p8 }
  0x19   :  { %11174 = shalt.err (!%p11171_p10)
}
  0x1a   :  { %s11175_s4 = scalar_lea.vmem %s28_s24, 18432  ;;  %p11180_p12 = scmp.lt.s32.totalorder %s28_s24, %s28_s24 }
  0x1b   :  { %p11176_p11 = scmp.ne.s32.totalorder %s28_s24, %s11175_s4  ;;  %p11181_p13 = scmp.lt.s32.totalorder %s11175_s4, %s11175_s4 }
  0x1d   :  { %p11182_p0 = por %p11181_p13, %p11180_p12 }
  0x1f   :  { %p11183_p1 = pnand %p11182_p0, %p11176_p11 }
  0x21   :  { %11186 = shalt.err (!%p11183_p1)
}
  0x22   :  { %33 = dma.hbm_to_vmem [thread:$0]  %s15509_s1, 18432, %s28_s24, [#allocation6], %s11216_s19, %s11216_s19, %s11217_s20  }
  0x23   :  { %11209 = dma.done.wait [#allocation3], 768  }
  0x24   :  { %11210 = vsyncadd [#allocation3], 4294966528 }
  0x25   :  { %11211 = dma.done.wait [#allocation6], 18432  }
  0x26   :  { %11212 = vsyncadd [#allocation6], 4294948864  ;;  %v11266_v0 = vld [vmem:[#allocation5 + $0x8] sm:$0xff]  ;;  %v11268_v1 = vld [vmem:[#allocation5 + $0x20] sm:$0xff]  ;;  %s11220_s1 = smov [#allocation7]  }
  0x27   :  { %v11270_v2 = vld [vmem:[#allocation5] sm:$0xff]  ;;  %v15530_v3 = vand.u32 4294901760, %v11266_v0  ;;  %v15529_v4 = vand.u32 4294901760, %v11268_v1  ;;  %v11274_v5 = vld [vmem:[#allocation5 + $0x18] sm:$0xff]  ;;  %v11279_v8 = vld [vmem:[#allocation5 + $0x50] sm:$0xff]  ;;  %s7947_s6 = sshll.u32 %s11220_s1, 4  ;;  %s7948_s6 = int_to_ptr.vmem [resolvable:$true] %s7947_s6 }
  0x28   :  { %v15528_v6 = vand.u32 4294901760, %v11270_v2  ;;  %v11277_v7 = vld [vmem:[#allocation5 + $0x38] sm:$0xff]  ;;  %16299 = vst [vmem:[#allocation11_spill] sm:$0xff] %v11279_v8  ;;  %v15527_v9 = vand.u32 4294901760, %v11274_v5  ;;  %v15523_v11 = vand.u32 4294901760, %v11279_v8  ;;  %v11284_v12 = vld [vmem:[#allocation5 + $0x30] sm:$0xff]  ;;  %p11192_p3 = scmp.lt.s32.totalorder %s7948_s6, %s7948_s6 }
  0x29   :  { %v15524_v10 = vand.u32 4294901760, %v11277_v7  ;;  %16300 = vst [vmem:[#allocation12_spill] sm:$0xff] %v11284_v12  ;;  %v11286_v13 = vld [vmem:[#allocation5 + $0x48] sm:$0xff]  ;;  %v11294_v15 = vpack.c.bf16 %v15529_v4, %v15530_v3  ;;  %v15522_v16 = vand.u32 4294901760, %v11284_v12  ;;  %v11298_v18 = vld [vmem:[#allocation5 + $0x80] sm:$0xff]  ;;  %v11303_v21 = vld [vmem:[#allocation5 + $0x78] sm:$0xff] }
  0x2a   :  { %16301 = vst [vmem:[#allocation13_spill] sm:$0xff] %v11286_v13  ;;  %v11288_v14 = vld [vmem:[#allocation5 + $0x68] sm:$0xff]  ;;  %v15521_v17 = vand.u32 4294901760, %v11286_v13  ;;  %16304 = vst [vmem:[#allocation16_spill] sm:$0xff] %v11298_v18  ;;  %v11301_v20 = vld [vmem:[#allocation5 + $0x60] sm:$0xff]  ;;  %v11309_v22 = vpack.c.bf16 %v15527_v9, %v15528_v6  ;;  %v15517_v24 = vand.u32 4294901760, %v11298_v18 }
  0x2b   :  { %16302 = vst [vmem:[#allocation14_spill] sm:$0xff] %v11288_v14  ;;  %16303 = vst [vmem:[#allocation15_spill] sm:$0xff] %v11294_v15  ;;  %v15520_v19 = vand.u32 4294901760, %v11288_v14  ;;  %v11315_v23 = vpack.c.bf16 %v15523_v11, %v15524_v10  ;;  %v15516_v25 = vand.u32 4294901760, %v11301_v20  ;;  %v11319_v26 = vld [vmem:[#allocation5 + $0x98] sm:$0xff]  ;;  %v11321_v27 = vld [vmem:[#allocation5 + $0xb0] sm:$0xff]  ;;  %9053 = vmatprep.subr.bf16.mxu0 %v11294_v15 }
  0x2c   :  { %16305 = vst [vmem:[#allocation17_spill] sm:$0xff] %v11301_v20  ;;  %16306 = vst [vmem:[#allocation18_spill] sm:$0xff] %v11303_v21  ;;  %v11323_v28 = vld [vmem:[#allocation5 + $0x90] sm:$0xff]  ;;  %v11330_v29 = vpack.c.bf16 %v15521_v17, %v15522_v16  ;;  %v15515_v30 = vand.u32 4294901760, %v11303_v21  ;;  %v15514_v31 = vand.u32 4294901760, %v11319_v26  ;;  %v15513_v32 = vand.u32 4294901760, %v11321_v27  ;;  %9055 = vmatpush1.bf16.msra.mxu0 %v11309_v22 }
  0x2d   :  { %16307 = vst [vmem:[#allocation19_spill] sm:$0xff] %v11309_v22  ;;  %16308 = vst [vmem:[#allocation20_spill] sm:$0xff] %v11315_v23  ;;  %v11335_v33 = vld [vmem:[#allocation5 + $0xa8] sm:$0xff]  ;;  %v11337_v34 = vld [vmem:[#allocation5 + $0x190] sm:$0xff]  ;;  %v11346_v36 = vpack.c.bf16 %v15517_v24, %v15520_v19  ;;  %v15512_v37 = vand.u32 4294901760, %v11323_v28  ;;  %9057 = vmatprep.subr.bf16.mxu0 %v11315_v23  ;;  %s11187_s7 = scalar_lea.vmem %s7948_s6, 768 }
  0x2e   :  { %16309 = vst [vmem:[#allocation21_spill] sm:$0xff] %v11319_v26  ;;  %16310 = vst [vmem:[#allocation22_spill] sm:$0xff] %v11321_v27  ;;  %v11339_v35 = vld [vmem:[#allocation5 + $0x1a8] sm:$0xff]  ;;  %v15511_v38 = vand.u32 4294901760, %v11335_v33  ;;  %v15536_v39 = vand.u32 4294901760, %v11337_v34  ;;  %v11351_v40 = vld [vmem:[#allocation5 + $0x10] sm:$0xff]  ;;  %v11362_v43 = vpack.c.bf16 %v15515_v30, %v15516_v25  ;;  %v11368_v44 = vpack.c.bf16 %v15513_v32, %v15514_v31  ;;  %p11188_p2 = scmp.ne.s32.totalorder %s7948_s6, %s11187_s7  ;;  %p11193_p4 = scmp.lt.s32.totalorder %s11187_s7, %s11187_s7 }
  0x2f   :  { %16311 = vst [vmem:[#allocation23_spill] sm:$0xff] %v11323_v28  ;;  %16312 = vst [vmem:[#allocation24_spill] sm:$0xff] %v11330_v29  ;;  %v11353_v41 = vld [vmem:[#allocation5 + $0x28] sm:$0xff]  ;;  %v15535_v45 = vand.u32 4294901760, %v11339_v35  ;;  %v15532_v46 = vand.u32 4294901760, %v11351_v40  ;;  %v11372_v47 = vld [vmem:[#allocation5 + $0xe0] sm:$0xff] }
  0x30   :  { %16313 = vst [vmem:[#allocation25_spill] sm:$0xff] %v11335_v33  ;;  %16314 = vst [vmem:[#allocation26_spill] sm:$0xff] %v11346_v36  ;;  %v11355_v42 = vld [vmem:[#allocation5 + $0xc8] sm:$0xff]  ;;  %v11374_v48 = vld [vmem:[#allocation5 + $0xc0] sm:$0xff]  ;;  %v11382_v50 = vpack.c.bf16 %v15511_v38, %v15512_v37  ;;  %v15531_v51 = vand.u32 4294901760, %v11353_v41  ;;  %v15518_v53 = vand.u32 4294901760, %v11372_v47  ;;  %9059 = vmatpush1.bf16.msra.mxu0 %v11330_v29  ;;  %p11194_p5 = por %p11193_p4, %p11192_p3 }
  0x31   :  { %16315 = vst [vmem:[#allocation27_spill] sm:$0xff] %v11355_v42  ;;  %16316 = vst [vmem:[#allocation28_spill] sm:$0xff] %v11362_v43  ;;  %v11376_v49 = vld [vmem:[#allocation5 + $0xd8] sm:$0xff]  ;;  %v15519_v52 = vand.u32 4294901760, %v11355_v42  ;;  %v11387_v54 = vld [vmem:[#allocation5 + $0x1c0] sm:$0xff]  ;;  %v11397_v57 = vpack.c.bf16 %v15535_v45, %v15536_v39  ;;  %v15526_v58 = vand.u32 4294901760, %v11374_v48  ;;  %9061 = vmatprep.subr.bf16.mxu0 %v11346_v36 }
  0x32   :  { %16317 = vst [vmem:[#allocation29_spill] sm:$0xff] %v11368_v44  ;;  %16318 = vst [vmem:[#allocation30_spill] sm:$0xff] %v11372_v47  ;;  %v11389_v55 = vld [vmem:[#allocation5 + $0x1d8] sm:$0xff]  ;;  %v11391_v56 = vld [vmem:[#allocation5 + $0x40] sm:$0xff]  ;;  %v15525_v59 = vand.u32 4294901760, %v11376_v49  ;;  %v15534_v60 = vand.u32 4294901760, %v11387_v54  ;;  %v11413_v38 = vpack.c.bf16 %v15531_v51, %v15532_v46  ;;  %p11195_p6 = pnand %p11194_p5, %p11188_p2 }
  0x33   :  { %16319 = vst [vmem:[#allocation31_spill] sm:$0xff] %v11374_v48  ;;  %16320 = vst [vmem:[#allocation32_spill] sm:$0xff] %v11376_v49  ;;  %v11402_v61 = vld [vmem:[#allocation5 + $0x58] sm:$0xff]  ;;  %v11406_v63 = vld [vmem:[#allocation5 + $0x110] sm:$0xff]  ;;  %v11419_v37 = vpack.c.bf16 %v15518_v53, %v15519_v52  ;;  %v15533_v32 = vand.u32 4294901760, %v11389_v55  ;;  %v15540_v31 = vand.u32 4294901760, %v11391_v56  ;;  %9629 = vmatprep.subr.bf16.mxu1 %v11397_v57 }
  0x34   :  { %16321 = vst [vmem:[#allocation33_spill] sm:$0xff] %v11382_v50  ;;  %16322 = vst [vmem:[#allocation34_spill] sm:$0xff] %v11397_v57  ;;  %v11404_v62 = vld [vmem:[#allocation5 + $0xf8] sm:$0xff]  ;;  %v11423_v30 = vld [vmem:[#allocation5 + $0xf0] sm:$0xff]  ;;  %v11435_v53 = vpack.c.bf16 %v15525_v59, %v15526_v58  ;;  %v15537_v52 = vand.u32 4294901760, %v11402_v61  ;;  %v15538_v17 = vand.u32 4294901760, %v11406_v63  ;;  %9631 = vmatpush3.bf16.msra.mxu1 %v11413_v38  ;;  %9063 = vmatpush1.bf16.msra.mxu0 %v11362_v43 }
  0x35   :  { %16323 = vst [vmem:[#allocation35_spill] sm:$0xff] %v11404_v62  ;;  %16324 = vst [vmem:[#allocation36_spill] sm:$0xff] %v11406_v63  ;;  %v11425_v25 = vld [vmem:[#allocation5 + $0x108] sm:$0xff]  ;;  %v11427_v24 = vld [vmem:[#allocation5 + $0x1f0] sm:$0xff]  ;;  %v15539_v19 = vand.u32 4294901760, %v11404_v62  ;;  %v11451_v59 = vpack.c.bf16 %v15533_v32, %v15534_v60  ;;  %v15549_v58 = vand.u32 4294901760, %v11423_v30  ;;  %9065 = vmatprep.subr.bf16.mxu0 %v11368_v44 }
  0x36   :  { %16325 = vst [vmem:[#allocation37_spill] sm:$0xff] %v11413_v38  ;;  %16326 = vst [vmem:[#allocation38_spill] sm:$0xff] %v11419_v37  ;;  %v11440_v16 = vld [vmem:[#allocation5 + $0x208] sm:$0xff]  ;;  %v11442_v11 = vld [vmem:[#allocation5 + $0x70] sm:$0xff]  ;;  %v11466_v46 = vpack.c.bf16 %v15537_v52, %v15540_v31  ;;  %v16337_v52 = vand.u32 4294901760, %v11425_v25  ;;  %v16340_v43 = vand.u32 4294901760, %v11427_v24 }
  0x37   :  { %16327 = vst [vmem:[#allocation39_spill] sm:$0xff] %v11423_v30  ;;  %16328 = vst [vmem:[#allocation40_spill] sm:$0xff] %v11425_v25  ;;  %v11444_v10 = vld [vmem:[#allocation5 + $0x88] sm:$0xff]  ;;  %v11458_v3 = vld [vmem:[#allocation5 + $0x140] sm:$0xff]  ;;  %v11472_v32 = vpack.c.bf16 %v15538_v17, %v15539_v19  ;;  %9633 = vmatprep.subr.bf16.mxu1 %v11451_v59  ;;  %v16341_v23 = vand.u32 4294901760, %v11440_v16  ;;  %v16346_v44 = vand.u32 4294901760, %v11442_v11 }
  0x38   :  { %16329 = vst [vmem:[#allocation41_spill] sm:$0xff] %v11435_v53  ;;  %16330 = vst [vmem:[#allocation42_spill] sm:$0xff] %v11451_v59  ;;  %v11456_v4 = vld [vmem:[#allocation5 + $0x128] sm:$0xff]  ;;  %v11460_v51 = vld [vmem:[#allocation5 + $0x120] sm:$0xff]  ;;  %v11488_v17 = vpack.c.bf16 %v16337_v52, %v15549_v58  ;;  %9635 = vmatpush3.bf16.msra.mxu1 %v11466_v46  ;;  %v16347_v59 = vand.u32 4294901760, %v11444_v10  ;;  %v16350_v31 = vand.u32 4294901760, %v11458_v3  ;;  %9067 = vmatpush1.bf16.msra.mxu0 %v11382_v50 }
  0x39   :  { %16331 = vst [vmem:[#allocation43_spill] sm:$0xff] %v11456_v4  ;;  %16332 = vst [vmem:[#allocation44_spill] sm:$0xff] %v11458_v3  ;;  %v11476_v39 = vld [vmem:[#allocation5 + $0x138] sm:$0xff]  ;;  %v11478_v6 = vld [vmem:[#allocation5 + $0x220] sm:$0xff]  ;;  %v11504_v52 = vpack.c.bf16 %v16341_v23, %v16340_v43  ;;  %v16349_v43 = vand.u32 4294901760, %v11456_v4  ;;  %9069 = vmatprep.subr.bf16.mxu0 %v11419_v37 }
  0x3a   :  { %16333 = vst [vmem:[#allocation45_spill] sm:$0xff] %v11460_v51  ;;  %16334 = vst [vmem:[#allocation46_spill] sm:$0xff] %v11466_v46  ;;  %v11480_v9 = vld [vmem:[#allocation5 + $0x238] sm:$0xff]  ;;  %v11493_v60 = vld [vmem:[#allocation5 + $0xa0] sm:$0xff]  ;;  %v11520_v23 = vpack.c.bf16 %v16347_v59, %v16346_v44  ;;  %v16352_v44 = vand.u32 4294901760, %v11460_v51  ;;  %v16353_v59 = vand.u32 4294901760, %v11476_v39 }
  0x3b   :  { %16335 = vst [vmem:[#allocation47_spill] sm:$0xff] %v11472_v32  ;;  %16336 = vst [vmem:[#allocation48_spill] sm:$0xff] %v11476_v39  ;;  %v11495_v36 = vld [vmem:[#allocation5 + $0xb8] sm:$0xff]  ;;  %v11509_v19 = vld [vmem:[#allocation5 + $0x170] sm:$0xff]  ;;  %v11526_v58 = vpack.c.bf16 %v16350_v31, %v16349_v43  ;;  %9637 = vmatprep.subr.bf16.mxu1 %v11504_v52  ;;  %v16358_v39 = vand.u32 4294901760, %v11480_v9  ;;  %v16362_v50 = vand.u32 4294901760, %v11493_v60 }
  0x3c   :  { %16338 = vst [vmem:[#allocation49_spill] sm:$0xff] %v11488_v17  ;;  %v11497_v29 = vld [vmem:[#allocation5 + $0x158] sm:$0xff]  ;;  %16342 = vst [vmem:[#allocation51_spill] sm:$0xff] %v11504_v52  ;;  %v11511_v22 = vld [vmem:[#allocation5 + $0x150] sm:$0xff]  ;;  %v11541_v4 = vpack.c.bf16 %v16353_v59, %v16352_v44  ;;  %v16357_v52 = vand.u32 4294901760, %v11478_v6  ;;  %v16363_v62 = vand.u32 4294901760, %v11495_v36  ;;  %9639 = vmatpush3.bf16.msra.mxu1 %v11520_v23  ;;  %9071 = vmatpush1.bf16.msra.mxu0 %v11435_v53 }
  0x3d   :  { %16339 = vst [vmem:[#allocation50_spill] sm:$0xff] %v11497_v29  ;;  %16343 = vst [vmem:[#allocation52_spill] sm:$0xff] %v11509_v19  ;;  %v11513_v15 = vld [vmem:[#allocation5 + $0x168] sm:$0xff]  ;;  %v11530_v57 = vld [vmem:[#allocation5 + $0x250] sm:$0xff]  ;;  %v16366_v43 = vand.u32 4294901760, %v11509_v19  ;;  %v16368_v37 = vand.u32 4294901760, %v11511_v22  ;;  %9073 = vmatprep.subr.bf16.mxu0 %v11472_v32 }
  0x3e   :  { %16344 = vst [vmem:[#allocation53_spill] sm:$0xff] %v11511_v22  ;;  %16345 = vst [vmem:[#allocation54_spill] sm:$0xff] %v11513_v15  ;;  %v11532_v25 = vld [vmem:[#allocation5 + $0x268] sm:$0xff]  ;;  %v11534_v46 = vld [vmem:[#allocation5 + $0xd0] sm:$0xff]  ;;  %v11557_v44 = vpack.c.bf16 %v16358_v39, %v16357_v52  ;;  %v11573_v39 = vpack.c.bf16 %v16363_v62, %v16362_v50  ;;  %v16365_v52 = vand.u32 4294901760, %v11497_v29  ;;  %v16369_v50 = vand.u32 4294901760, %v11513_v15 }
  0x3f   :  { %16348 = vst [vmem:[#allocation55_spill] sm:$0xff] %v11520_v23  ;;  %16351 = vst [vmem:[#allocation56_spill] sm:$0xff] %v11526_v58  ;;  %v11546_v45 = vld [vmem:[#allocation5 + $0xe8] sm:$0xff]  ;;  %v11550_v30 = vld [vmem:[#allocation5 + $0x1a0] sm:$0xff]  ;;  %v16373_v23 = vand.u32 4294901760, %v11530_v57  ;;  %v16374_v15 = vand.u32 4294901760, %v11532_v25 }
  0x40   :  { %16354 = vst [vmem:[#allocation57_spill] sm:$0xff] %v11541_v4  ;;  %v11548_v3 = vld [vmem:[#allocation5 + $0x188] sm:$0xff]  ;;  %16356 = vst [vmem:[#allocation59_spill] sm:$0xff] %v11550_v30  ;;  %v11562_v31 = vld [vmem:[#allocation5 + $0x180] sm:$0xff]  ;;  %v11579_v59 = vpack.c.bf16 %v16366_v43, %v16365_v52  ;;  %v11592_v62 = vpack.c.bf16 %v16369_v50, %v16368_v37  ;;  %9641 = vmatprep.subr.bf16.mxu1 %v11557_v44  ;;  %v16380_v33 = vand.u32 4294901760, %v11546_v45  ;;  %v16383_v43 = vand.u32 4294901760, %v11550_v30 }
  0x41   :  { %16355 = vst [vmem:[#allocation58_spill] sm:$0xff] %v11548_v3  ;;  %16359 = vst [vmem:[#allocation60_spill] sm:$0xff] %v11557_v44  ;;  %v11564_v51 = vld [vmem:[#allocation5 + $0x198] sm:$0xff]  ;;  %v11566_v63 = vld [vmem:[#allocation5 + $0x280] sm:$0xff]  ;;  %v11608_v37 = vpack.c.bf16 %v16374_v15, %v16373_v23  ;;  %v16379_v44 = vand.u32 4294901760, %v11534_v46  ;;  %v16382_v23 = vand.u32 4294901760, %v11548_v3  ;;  %9643 = vmatpush3.bf16.msra.mxu1 %v11573_v39  ;;  %9075 = vmatpush1.bf16.msra.mxu0 %v11488_v17 }
  0x42   :  { %16360 = vst [vmem:[#allocation61_spill] sm:$0xff] %v11562_v31  ;;  %16361 = vst [vmem:[#allocation62_spill] sm:$0xff] %v11564_v51  ;;  %v11583_v48 = vld [vmem:[#allocation5 + $0x298] sm:$0xff]  ;;  %v11585_v47 = vld [vmem:[#allocation5 + $0x100] sm:$0xff]  ;;  %v16387_v53 = vand.u32 4294901760, %v11562_v31  ;;  %v16392_v32 = vand.u32 4294901760, %v11566_v63  ;;  %9077 = vmatprep.subr.bf16.mxu0 %v11526_v58 }
  0x43   :  { %16364 = vst [vmem:[#allocation63_spill] sm:$0xff] %v11573_v39  ;;  %16367 = vst [vmem:[#allocation64_spill] sm:$0xff] %v11579_v59  ;;  %v11597_v38 = vld [vmem:[#allocation5 + $0x118] sm:$0xff]  ;;  %v11601_v29 = vld [vmem:[#allocation5 + $0x1d0] sm:$0xff]  ;;  %v11624_v15 = vpack.c.bf16 %v16380_v33, %v16379_v44  ;;  %v11630_v50 = vpack.c.bf16 %v16383_v43, %v16382_v23  ;;  %v16388_v33 = vand.u32 4294901760, %v11564_v51  ;;  %v16393_v51 = vand.u32 4294901760, %v11583_v48  ;;  %9645 = vmatprep.subr.bf16.mxu1 %v11608_v37 }
  0x44   :  { %16370 = vst [vmem:[#allocation65_spill] sm:$0xff] %v11592_v62  ;;  %v11599_v49 = vld [vmem:[#allocation5 + $0x1b8] sm:$0xff]  ;;  %16372 = vst [vmem:[#allocation67_spill] sm:$0xff] %v11601_v29  ;;  %v11613_v19 = vld [vmem:[#allocation5 + $0x1b0] sm:$0xff]  ;;  %v16397_v39 = vand.u32 4294901760, %v11585_v47  ;;  %v16398_v20 = vand.u32 4294901760, %v11597_v38 }
  0x45   :  { %16371 = vst [vmem:[#allocation66_spill] sm:$0xff] %v11599_v49  ;;  %16375 = vst [vmem:[#allocation68_spill] sm:$0xff] %v11608_v37  ;;  %v11615_v22 = vld [vmem:[#allocation5 + $0x1c8] sm:$0xff]  ;;  %v11617_v42 = vld [vmem:[#allocation5 + $0x2b0] sm:$0xff]  ;;  %v11643_v44 = vpack.c.bf16 %v16388_v33, %v16387_v53  ;;  %v11659_v53 = vpack.c.bf16 %v16393_v51, %v16392_v32  ;;  %v16400_v51 = vand.u32 4294901760, %v11599_v49  ;;  %v16401_v43 = vand.u32 4294901760, %v11601_v29  ;;  %9647 = vmatpush3.bf16.msra.mxu1 %v11624_v15 }
  0x46   :  { %16376 = vst [vmem:[#allocation69_spill] sm:$0xff] %v11613_v19  ;;  %16377 = vst [vmem:[#allocation70_spill] sm:$0xff] %v11615_v22  ;;  %v11634_v27 = vld [vmem:[#allocation5 + $0x2c8] sm:$0xff]  ;;  %v11636_v26 = vld [vmem:[#allocation5 + $0x130] sm:$0xff]  ;;  %v11675_v32 = vpack.c.bf16 %v16398_v20, %v16397_v39  ;;  %v16403_v37 = vand.u32 4294901760, %v11613_v19  ;;  %v16404_v20 = vand.u32 4294901760, %v11615_v22  ;;  %9079 = vmatpush1.bf16.msra.mxu0 %v11541_v4 }
  0x47   :  { %16378 = vst [vmem:[#allocation71_spill] sm:$0xff] %v11617_v42  ;;  %16381 = vst [vmem:[#allocation72_spill] sm:$0xff] %v11624_v15  ;;  %v11648_v52 = vld [vmem:[#allocation5 + $0x148] sm:$0xff]  ;;  %v11652_v3 = vld [vmem:[#allocation5 + $0x200] sm:$0xff]  ;;  %v11681_v33 = vpack.c.bf16 %v16401_v43, %v16400_v51  ;;  %v16408_v17 = vand.u32 4294901760, %v11617_v42  ;;  %v16409_v22 = vand.u32 4294901760, %v11634_v27  ;;  %9649 = vmatprep.subr.bf16.mxu1 %v11659_v53  ;;  %9081 = vmatprep.subr.bf16.mxu0 %v11579_v59 }
  0x48   :  { %16384 = vst [vmem:[#allocation73_spill] sm:$0xff] %v11630_v50  ;;  %16385 = vst [vmem:[#allocation74_spill] sm:$0xff] %v11634_v27  ;;  %v11650_v28 = vld [vmem:[#allocation5 + $0x1e8] sm:$0xff]  ;;  %v11664_v30 = vld [vmem:[#allocation5 + $0x1e0] sm:$0xff]  ;;  %v11694_v39 = vpack.c.bf16 %v16404_v20, %v16403_v37  ;;  %v16413_v58 = vand.u32 4294901760, %v11636_v26  ;;  %v16414_v42 = vand.u32 4294901760, %v11648_v52 }
  0x49   :  { %16386 = vst [vmem:[#allocation75_spill] sm:$0xff] %v11636_v26  ;;  %16389 = vst [vmem:[#allocation76_spill] sm:$0xff] %v11643_v44  ;;  %v11666_v31 = vld [vmem:[#allocation5 + $0x1f8] sm:$0xff]  ;;  %v11668_v21 = vld [vmem:[#allocation5 + $0x2e0] sm:$0xff]  ;;  %v11710_v37 = vpack.c.bf16 %v16409_v22, %v16408_v17  ;;  %v16416_v17 = vand.u32 4294901760, %v11650_v28  ;;  %v16417_v22 = vand.u32 4294901760, %v11652_v3  ;;  %9651 = vmatpush3.bf16.msra.mxu1 %v11675_v32 }
  0x4a   :  { %16390 = vst [vmem:[#allocation77_spill] sm:$0xff] %v11650_v28  ;;  %16391 = vst [vmem:[#allocation78_spill] sm:$0xff] %v11652_v3  ;;  %v11685_v14 = vld [vmem:[#allocation5 + $0x2f8] sm:$0xff]  ;;  %v11687_v13 = vld [vmem:[#allocation5 + $0x160] sm:$0xff]  ;;  %v11724_v27 = vpack.c.bf16 %v16414_v42, %v16413_v58  ;;  %v16419_v15 = vand.u32 4294901760, %v11664_v30  ;;  %v16420_v26 = vand.u32 4294901760, %v11666_v31  ;;  %9083 = vmatpush1.bf16.msra.mxu0 %v11592_v62 }
  0x4b   :  { %16394 = vst [vmem:[#allocation79_spill] sm:$0xff] %v11659_v53  ;;  %16395 = vst [vmem:[#allocation80_spill] sm:$0xff] %v11664_v30  ;;  %v11699_v23 = vld [vmem:[#allocation5 + $0x178] sm:$0xff]  ;;  %v11703_v49 = vld [vmem:[#allocation5 + $0x230] sm:$0xff]  ;;  %v11730_v43 = vpack.c.bf16 %v16417_v22, %v16416_v17  ;;  %v15651_v51 = vand.u32 4294901760, %v11685_v14  ;;  %v16422_v22 = vand.u32 4294901760, %v11668_v21  ;;  %9653 = vmatprep.subr.bf16.mxu1 %v11710_v37  ;;  %9085 = vmatprep.subr.bf16.mxu0 %v11630_v50 }
  0x4c   :  { %16396 = vst [vmem:[#allocation81_spill] sm:$0xff] %v11666_v31  ;;  %16399 = vst [vmem:[#allocation82_spill] sm:$0xff] %v11675_v32  ;;  %v11701_v18 = vld [vmem:[#allocation5 + $0x218] sm:$0xff]  ;;  %v11715_v29 = vld [vmem:[#allocation5 + $0x210] sm:$0xff]  ;;  %v11739_v8 = vpack.c.bf16 %v16420_v26, %v16419_v15  ;;  %v16426_v3 = vand.u32 4294901760, %v11687_v13  ;;  %v16427_v58 = vand.u32 4294901760, %v11699_v23 }
  0x4d   :  { %16402 = vst [vmem:[#allocation83_spill] sm:$0xff] %v11681_v33  ;;  %16405 = vst [vmem:[#allocation84_spill] sm:$0xff] %v11694_v39  ;;  %v11717_v19 = vld [vmem:[#allocation5 + $0x228] sm:$0xff]  ;;  %v41_v12 = vld [vmem:[#allocation2 + $0x8] sm:$0xff]  ;;  %v11749_v20 = vpack.c.bf16 %v15651_v51, %v16422_v22  ;;  %v16429_v31 = vand.u32 4294901760, %v11701_v18  ;;  %v16430_v22 = vand.u32 4294901760, %v11703_v49  ;;  %9655 = vmatpush3.bf16.msra.mxu1 %v11724_v27 }
  0x4e   :  { %16406 = vst [vmem:[#allocation85_spill] sm:$0xff] %v11701_v18  ;;  %16407 = vst [vmem:[#allocation86_spill] sm:$0xff] %v11703_v49  ;;  %v40_v17 = vld [vmem:[#allocation2] sm:$0xff]  ;;  %v11753_v15 = vand.u32 4294901760, %v41_v12  ;;  %v11755_v42 = vld [vmem:[#allocation5 + $0x248] sm:$0xff]  ;;  %v11762_v4 = vpack.c.bf16 %v16427_v58, %v16426_v3  ;;  %v16432_v26 = vand.u32 4294901760, %v11337_v34  ;;  %9087 = vmatpush1.bf16.msra.mxu0 %v11643_v44 }
  0x4f   :  { %16410 = vst [vmem:[#allocation87_spill] sm:$0xff] %v11710_v37  ;;  %16411 = vst [vmem:[#allocation88_spill] sm:$0xff] %v11715_v29  ;;  %v11768_v51 = vpack.c.bf16 %v16430_v22, %v16429_v31  ;;  %v16433_v30 = vand.u32 4294901760, %v11339_v35  ;;  %v11780_v28 = vld [vmem:[#allocation5 + $0x260] sm:$0xff]  ;;  %v16434_v3 = vand.u32 4294901760, %v11715_v29  ;;  %v16435_v58 = vand.u32 4294901760, %v11717_v19  ;;  %9657 = vmatprep.subr.bf16.mxu1 %v11749_v20  ;;  %9089 = vmatprep.subr.bf16.mxu0 %v11681_v33 }
  0x50   :  { %16412 = vst [vmem:[#allocation89_spill] sm:$0xff] %v11717_v19  ;;  %16415 = vst [vmem:[#allocation90_spill] sm:$0xff] %v11724_v27  ;;  %v11773_v53 = vsub.f32 %v11337_v34, %v16432_v26  ;;  %v11790_v22 = vsub.f32 %v41_v12, %v11753_v15  ;;  %v11792_v34 = vand.u32 4294901760, %v40_v17  ;;  %v16439_v26 = vand.u32 4294901760, %v11351_v40  ;;  %v11819_v19 = vld [vmem:[#allocation5 + $0x258] sm:$0xff] }
  0x51   :  { %16418 = vst [vmem:[#allocation91_spill] sm:$0xff] %v11730_v43  ;;  %16421 = vst [vmem:[#allocation92_spill] sm:$0xff] %v11739_v8  ;;  %v11778_v59 = vsub.f32 %v11339_v35, %v16433_v30  ;;  %v11787_v31 = vpack.c.bf16 %v16435_v58, %v16434_v3  ;;  %v11799_v35 = vld [vmem:[#allocation5 + $0x240] sm:$0xff]  ;;  %v16441_v3 = vand.u32 4294901760, %v11353_v41  ;;  %v16449_v49 = vand.u32 4294901760, %v11755_v42  ;;  %9659 = vmatpush3.bf16.msra.mxu1 %v11762_v4 }
  0x52   :  { %16423 = vst [vmem:[#allocation93_spill] sm:$0xff] %v11749_v20  ;;  %16424 = vst [vmem:[#allocation94_spill] sm:$0xff] %v11753_v15  ;;  %v11797_v30 = vsub.f32 %v11351_v40, %v16439_v26  ;;  %v11812_v40 = vand.u32 4294901760, %v11790_v22  ;;  %v11815_v26 = vsub.f32 %v40_v17, %v11792_v34  ;;  %v16458_v44 = vand.u32 4294901760, %v11819_v19  ;;  %9091 = vmatpush1.bf16.msra.mxu0 %v11694_v39 }
  0x53   :  { %16425 = vst [vmem:[#allocation95_spill] sm:$0xff] %v11755_v42  ;;  %16428 = vst [vmem:[#allocation96_spill] sm:$0xff] %v11762_v4  ;;  %v11807_v12 = vsub.f32 %v11353_v41, %v16441_v3  ;;  %v16445_v41 = vand.u32 4294901760, %v11773_v53  ;;  %v16446_v58 = vand.u32 4294901760, %v11778_v59  ;;  %9093 = vmatprep.subr.bf16.mxu0 %v11730_v43  ;;  %v16480_v20 = vand.u32 4294901760, %v11442_v11 }
  0x54   :  { %16431 = vst [vmem:[#allocation97_spill] sm:$0xff] %v11768_v51  ;;  %16436 = vst [vmem:[#allocation98_spill] sm:$0xff] %v11787_v31  ;;  %v321_v32 = vsub.f32 %v11790_v22, %v11812_v40  ;;  %v11834_v37 = vand.u32 4294901760, %v11815_v26  ;;  %v16448_v50 = vand.u32 4294901760, %v11797_v30 }
  0x55   :  { %16437 = vst [vmem:[#allocation99_spill] sm:$0xff] %v11790_v22  ;;  %16438 = vst [vmem:[#allocation100_spill] sm:$0xff] %v11792_v34  ;;  %v2683_v3 = vsub.f32 %v11773_v53, %v16445_v41  ;;  %v2690_v62 = vsub.f32 %v11778_v59, %v16446_v58  ;;  %v16450_v58 = vand.u32 4294901760, %v11780_v28  ;;  %v16452_v27 = vand.u32 4294901760, %v11807_v12 }
  0x56   :  { %16440 = vst [vmem:[#allocation101_spill] sm:$0xff] %v11797_v30  ;;  %16442 = vst [vmem:[#allocation102_spill] sm:$0xff] %v11807_v12  ;;  %v2571_v41 = vsub.f32 %v11797_v30, %v16448_v50  ;;  %v322_v34 = vand.u32 4294901760, %v321_v32  ;;  %v327_v50 = vsub.f32 %v11815_v26, %v11834_v37  ;;  %v16457_v32 = vand.u32 4294901760, %v11799_v35  ;;  %9095 = vmatpush1.bf16.msra.mxu0 %v11739_v8 }
  0x57   :  { %16443 = vst [vmem:[#allocation103_spill] sm:$0xff] %v11812_v40  ;;  %16444 = vst [vmem:[#allocation104_spill] sm:$0xff] %v11815_v26  ;;  %v11843_v18 = vpack.c.bf16 %v16450_v58, %v16449_v49  ;;  %v2684_v17 = vand.u32 4294901760, %v2683_v3  ;;  %v2691_v29 = vand.u32 4294901760, %v2690_v62  ;;  %v2578_v40 = vsub.f32 %v11807_v12, %v16452_v27  ;;  %v11858_v3 = vld [vmem:[#allocation5 + $0x278] sm:$0xff]  ;;  %v11860_v62 = vld [vmem:[#allocation5 + $0x290] sm:$0xff]  ;;  %9097 = vmatprep.subr.bf16.mxu0 %v11768_v51 }
  0x58   :  { %16447 = vst [vmem:[#allocation105_spill] sm:$0xff] %v11834_v37  ;;  %v2572_v42 = vand.u32 4294901760, %v2571_v41  ;;  %v16453_v49 = vand.u32 4294901760, %v11387_v54  ;;  %16455 = vst [vmem:[#allocation108_spill] sm:$0xff] %v11860_v62  ;;  %v11869_v37 = vpack.c.bf16 %v16458_v44, %v16457_v32  ;;  %v16460_v41 = vand.u32 4294901760, %v11389_v55  ;;  %2541 = vmatprep.mubr.f32.mxu1 %v322_v34  ;;  %323 = vmatprep.mubr.f32.mxu0 %v322_v34 }
  0x59   :  { %16451 = vst [vmem:[#allocation106_spill] sm:$0xff] %v11843_v18  ;;  %v11863_v27 = vpack.c.bf16 %v2691_v29, %v2684_v17  ;;  %v2579_v22 = vand.u32 4294901760, %v2578_v40  ;;  %v11879_v33 = vand.u32 4294901760, %v327_v50  ;;  %v16463_v40 = vand.u32 4294901760, %v11391_v56 }
  0x5a   :  { %v11856_v58 = vsub.f32 %v11387_v54, %v16453_v49  ;;  %16459 = vst [vmem:[#allocation110_spill] sm:$0xff] %v11869_v37  ;;  %v11874_v54 = vsub.f32 %v11389_v55, %v16460_v41  ;;  %v11876_v49 = vld [vmem:[#allocation5 + $0x270] sm:$0xff]  ;;  %v16465_v44 = vand.u32 4294901760, %v11402_v61  ;;  %v11892_v55 = vld [vmem:[#allocation5 + $0x288] sm:$0xff]  ;;  %v15692_v29 = vand.u32 4294901760, %v11858_v3  ;;  %9099 = vmatpush1.bf16.msra.mxu0 %v11787_v31 }
  0x5b   :  { %16456 = vst [vmem:[#allocation109_spill] sm:$0xff] %v11863_v27  ;;  %16462 = vst [vmem:[#allocation112_spill] sm:$0xff] %v11876_v49  ;;  %v11885_v17 = vsub.f32 %v11391_v56, %v16463_v40  ;;  %9661 = vmatprep.subr.bf16.mxu1 %v11863_v27  ;;  %v11895_v41 = vpack.c.bf16 %v2579_v22, %v2572_v42  ;;  %v15691_v4 = vand.u32 4294901760, %v11860_v62  ;;  %2547 = vmatmul.mubr.f32.vlgmr.msra.gmra.mrb[0].mxu1 %v11879_v33  ;;  %v11950_v62 = vld [vmem:[#allocation5 + $0x2c0] sm:$0xff] }
  0x5c   :  { %16454 = vst [vmem:[#allocation107_spill] sm:$0xff] %v11856_v58  ;;  %16461 = vst [vmem:[#allocation111_spill] sm:$0xff] %v11874_v54  ;;  %v11890_v32 = vsub.f32 %v11402_v61, %v16465_v44  ;;  %v15686_v50 = vand.u32 4294901760, %v11874_v54  ;;  %v16469_v56 = vand.u32 4294901760, %v11856_v58  ;;  %v16471_v44 = vand.u32 4294901760, %v11427_v24  ;;  %9101 = vmatprep.subr.bf16.mxu0 %v11843_v18 }
  0x5d   :  { %16464 = vst [vmem:[#allocation113_spill] sm:$0xff] %v11885_v17  ;;  %16467 = vst [vmem:[#allocation115_spill] sm:$0xff] %v11892_v55  ;;  %v11916_v34 = vpack.c.bf16 %v15691_v4, %v15692_v29  ;;  %9663 = vmatpush3.bf16.msra.mxu1 %v11895_v41  ;;  %v16473_v27 = vand.u32 4294901760, %v11885_v17  ;;  %v16475_v4 = vand.u32 4294901760, %v11440_v16  ;;  %v15712_v51 = vand.u32 4294901760, %v11950_v62 }
  0x5e   :  { %16466 = vst [vmem:[#allocation114_spill] sm:$0xff] %v11890_v32  ;;  %16468 = vst [vmem:[#allocation116_spill] sm:$0xff] %v11895_v41  ;;  %v2697_v61 = vsub.f32 %v11856_v58, %v16469_v56  ;;  %v2704_v22 = vsub.f32 %v11874_v54, %v15686_v50  ;;  %v11922_v42 = vsub.f32 %v11427_v24, %v16471_v44  ;;  %v16474_v43 = vand.u32 4294901760, %v11890_v32  ;;  %v11936_v56 = vld [vmem:[#allocation5 + $0x2a8] sm:$0xff] }
  0x5f   :  { %16470 = vst [vmem:[#allocation117_spill] sm:$0xff] %v11916_v34  ;;  %v2585_v50 = vsub.f32 %v11885_v17, %v16473_v27  ;;  %v11934_v29 = vsub.f32 %v11440_v16, %v16475_v4  ;;  %v16477_v44 = vand.u32 4294901760, %v11876_v49  ;;  %16482 = vst [vmem:[#allocation122_spill] sm:$0xff] %v11950_v62  ;;  %v16483_v49 = vand.u32 4294901760, %v11444_v10  ;;  %v11961_v27 = vld [vmem:[#allocation5 + $0x2b8] sm:$0xff]  ;;  %v12021_v62 = vld [vmem:[#allocation5 + $0x2d0] sm:$0xff]  ;;  %9103 = vmatpush1.bf16.msra.mxu0 %v11869_v37 }
  0x60   :  { %16472 = vst [vmem:[#allocation118_spill] sm:$0xff] %v11922_v42  ;;  %v2698_v40 = vand.u32 4294901760, %v2697_v61  ;;  %v2592_v39 = vsub.f32 %v11890_v32, %v16474_v43  ;;  %v2705_v24 = vand.u32 4294901760, %v2704_v22  ;;  %v16478_v61 = vand.u32 4294901760, %v11892_v55  ;;  %16486 = vst [vmem:[#allocation125_spill] sm:$0xff] %v11961_v27  ;;  %9105 = vmatprep.subr.bf16.mxu0 %v11916_v34 }
  0x61   :  { %16476 = vst [vmem:[#allocation119_spill] sm:$0xff] %v11934_v29  ;;  %v11948_v43 = vsub.f32 %v11442_v11, %v16480_v20  ;;  %v2586_v4 = vand.u32 4294901760, %v2585_v50  ;;  %v16488_v20 = vand.u32 4294901760, %v11922_v42  ;;  %v15713_v22 = vand.u32 4294901760, %v11936_v56  ;;  %16503 = vst [vmem:[#allocation135_spill] sm:$0xff] %v12021_v62 }
  0x62   :  { %v11942_v41 = vpack.c.bf16 %v16478_v61, %v16477_v44  ;;  %v2593_v16 = vand.u32 4294901760, %v2592_v39  ;;  %v11957_v44 = vsub.f32 %v11444_v10, %v16483_v49  ;;  %v11959_v61 = vld [vmem:[#allocation5 + $0x2a0] sm:$0xff]  ;;  %v11964_v11 = vpack.c.bf16 %v2705_v24, %v2698_v40 }
  0x63   :  { %16481 = vst [vmem:[#allocation121_spill] sm:$0xff] %v11948_v43  ;;  %16485 = vst [vmem:[#allocation124_spill] sm:$0xff] %v11959_v61  ;;  %v2711_v50 = vsub.f32 %v11922_v42, %v16488_v20  ;;  %v15706_v39 = vand.u32 4294901760, %v11948_v43  ;;  %v16490_v10 = vand.u32 4294901760, %v11934_v29 }
  0x64   :  { %16479 = vst [vmem:[#allocation120_spill] sm:$0xff] %v11942_v41  ;;  %16484 = vst [vmem:[#allocation123_spill] sm:$0xff] %v11957_v44  ;;  %v11971_v8 = vpack.c.bf16 %v2593_v16, %v2586_v4  ;;  %v15708_v55 = vand.u32 4294901760, %v11957_v44  ;;  %9665 = vmatprep.subr.bf16.mxu1 %v11964_v11  ;;  %v12000_v4 = vld [vmem:[#allocation5 + $0x2d8] sm:$0xff]  ;;  %9107 = vmatpush1.bf16.msra.mxu0 %v11942_v41 }
  0x65   :  { %16487 = vst [vmem:[#allocation126_spill] sm:$0xff] %v11964_v11  ;;  %v2718_v49 = vsub.f32 %v11934_v29, %v16490_v10  ;;  %v2712_v40 = vand.u32 4294901760, %v2711_v50  ;;  %v2599_v24 = vsub.f32 %v11948_v43, %v15706_v39  ;;  %v11993_v50 = vpack.c.bf16 %v15712_v51, %v15713_v22  ;;  %16494 = vst [vmem:[#allocation130_spill] sm:$0xff] %v12000_v4  ;;  %v12002_v11 = vld [vmem:[#allocation5 + $0x2f0] sm:$0xff] }
  0x66   :  { %16489 = vst [vmem:[#allocation127_spill] sm:$0xff] %v11971_v8  ;;  %9667 = vmatpush3.bf16.msra.mxu1 %v11971_v8  ;;  %v2606_v10 = vsub.f32 %v11957_v44, %v15708_v55  ;;  %v16492_v39 = vand.u32 4294901760, %v11478_v6  ;;  %16495 = vst [vmem:[#allocation131_spill] sm:$0xff] %v12002_v11  ;;  %v16496_v55 = vand.u32 4294901760, %v11959_v61  ;;  %v16497_v8 = vand.u32 4294901760, %v11961_v27  ;;  %v12031_v27 = vld [vmem:[#allocation5 + $0x2e8] sm:$0xff] }
  0x67   :  { %v2719_v16 = vand.u32 4294901760, %v2718_v49  ;;  %16491 = vst [vmem:[#allocation128_spill] sm:$0xff] %v11993_v50  ;;  %v2600_v49 = vand.u32 4294901760, %v2599_v24  ;;  %v16499_v51 = vand.u32 4294901760, %v11480_v9  ;;  %16507 = vst [vmem:[#allocation138_spill] sm:$0xff] %v12031_v27  ;;  %9109 = vmatprep.subr.bf16.mxu0 %v11993_v50 }
  0x68   :  { %v11998_v20 = vsub.f32 %v11478_v6, %v16492_v39  ;;  %v12009_v31 = vpack.c.bf16 %v16497_v8, %v16496_v55  ;;  %v16501_v6 = vand.u32 4294901760, %v11493_v60  ;;  %v2607_v24 = vand.u32 4294901760, %v2606_v10 }
  0x69   :  { %v12014_v22 = vsub.f32 %v11480_v9, %v16499_v51  ;;  %v12023_v18 = vpack.c.bf16 %v2719_v16, %v2712_v40  ;;  %v16505_v8 = vand.u32 4294901760, %v11495_v36 }
  0x6a   :  { %16493 = vst [vmem:[#allocation129_spill] sm:$0xff] %v11998_v20  ;;  %16498 = vst [vmem:[#allocation132_spill] sm:$0xff] %v12009_v31  ;;  %v12019_v39 = vsub.f32 %v11493_v60, %v16501_v6  ;;  %v15722_v61 = vand.u32 4294901760, %v11998_v20  ;;  %v15730_v60 = vand.u32 4294901760, %v12000_v4  ;;  %v12039_v40 = vpack.c.bf16 %v2607_v24, %v2600_v49  ;;  %9111 = vmatpush1.bf16.msra.mxu0 %v12009_v31 }
  0x6b   :  { %16500 = vst [vmem:[#allocation133_spill] sm:$0xff] %v12014_v22  ;;  %16504 = vst [vmem:[#allocation136_spill] sm:$0xff] %v12023_v18  ;;  %v12029_v55 = vsub.f32 %v11495_v36, %v16505_v8  ;;  %v15724_v9 = vand.u32 4294901760, %v12014_v22  ;;  %9669 = vmatprep.subr.bf16.mxu1 %v12023_v18  ;;  %v16509_v49 = vand.u32 4294901760, %v12002_v11 }
  0x6c   :  { %16502 = vst [vmem:[#allocation134_spill] sm:$0xff] %v12019_v39  ;;  %v15727_v51 = vand.u32 4294901760, %v12019_v39  ;;  %16508 = vst [vmem:[#allocation139_spill] sm:$0xff] %v12039_v40  ;;  %v2725_v36 = vsub.f32 %v11998_v20, %v15722_v61  ;;  %9671 = vmatpush3.bf16.msra.mxu1 %v12039_v40  ;;  %v16515_v61 = vand.u32 4294901760, %v12021_v62 }
  0x6d   :  { %16506 = vst [vmem:[#allocation137_spill] sm:$0xff] %v12029_v55  ;;  %v15732_v16 = vand.u32 4294901760, %v12029_v55  ;;  %v2732_v8 = vsub.f32 %v12014_v22, %v15724_v9  ;;  %v12057_v24 = vpack.c.bf16 %v16509_v49, %v15730_v60  ;;  %v16511_v9 = vand.u32 4294901760, %v11530_v57 }
  0x6e   :  { %v2613_v6 = vsub.f32 %v12019_v39, %v15727_v51  ;;  %v2726_v10 = vand.u32 4294901760, %v2725_v36  ;;  %v16513_v51 = vand.u32 4294901760, %v11532_v25  ;;  %v16516_v36 = vand.u32 4294901760, %v12031_v27 }
  0x6f   :  { %16510 = vst [vmem:[#allocation140_spill] sm:$0xff] %v12057_v24  ;;  %v2620_v18 = vsub.f32 %v12029_v55, %v15732_v16  ;;  %v12067_v34 = vsub.f32 %v11530_v57, %v16511_v9  ;;  %v2733_v49 = vand.u32 4294901760, %v2732_v8  ;;  %v16518_v16 = vand.u32 4294901760, %v11534_v46  ;;  %9113 = vmatprep.subr.bf16.mxu0 %v12057_v24 }
  0x70   :  { %v12072_v37 = vsub.f32 %v11532_v25, %v16513_v51  ;;  %v2614_v60 = vand.u32 4294901760, %v2613_v6  ;;  %v12078_v40 = vpack.c.bf16 %v16516_v36, %v16515_v61  ;;  %v16520_v51 = vand.u32 4294901760, %v11546_v45 }
  0x71   :  { %16512 = vst [vmem:[#allocation141_spill] sm:$0xff] %v12067_v34  ;;  %v12083_v11 = vsub.f32 %v11534_v46, %v16518_v16  ;;  %v2621_v57 = vand.u32 4294901760, %v2620_v18  ;;  %v15735_v9 = vand.u32 4294901760, %v12067_v34  ;;  %v12094_v61 = vpack.c.bf16 %v2733_v49, %v2726_v10 }
  0x72   :  { %16514 = vst [vmem:[#allocation142_spill] sm:$0xff] %v12072_v37  ;;  %16517 = vst [vmem:[#allocation143_spill] sm:$0xff] %v12078_v40  ;;  %v12091_v6 = vsub.f32 %v11546_v45, %v16520_v51  ;;  %v16523_v46 = vand.u32 4294901760, %v11266_v0  ;;  %v16525_v18 = vand.u32 4294901760, %v11268_v1  ;;  %v16528_v10 = vand.u32 4294901760, %v12072_v37  ;;  %9115 = vmatpush1.bf16.msra.mxu0 %v12078_v40 }
  0x73   :  { %16519 = vst [vmem:[#allocation144_spill] sm:$0xff] %v12083_v11  ;;  %16522 = vst [vmem:[#allocation146_spill] sm:$0xff] %v12094_v61  ;;  %v15736_v8 = vand.u32 4294901760, %v12083_v11  ;;  %v12107_v25 = vpack.c.bf16 %v2621_v57, %v2614_v60  ;;  %v2739_v45 = vsub.f32 %v12067_v34, %v15735_v9  ;;  %9673 = vmatprep.subr.bf16.mxu1 %v12094_v61  ;;  %v16529_v57 = vand.u32 4294901760, %v11270_v2 }
  0x74   :  { %16521 = vst [vmem:[#allocation145_spill] sm:$0xff] %v12091_v6  ;;  %v12100_v16 = vsub.f32 %v11266_v0, %v16523_v46  ;;  %v12105_v36 = vsub.f32 %v11268_v1, %v16525_v18  ;;  %v2746_v49 = vsub.f32 %v12072_v37, %v16528_v10  ;;  %v15739_v51 = vand.u32 4294901760, %v12091_v6 }
  0x75   :  { %16527 = vst [vmem:[#allocation149_spill] sm:$0xff] %v12107_v25  ;;  %v2627_v0 = vsub.f32 %v12083_v11, %v15736_v8  ;;  %v12125_v46 = vsub.f32 %v11270_v2, %v16529_v57  ;;  %9675 = vmatpush3.bf16.msra.mxu1 %v12107_v25  ;;  %v2740_v18 = vand.u32 4294901760, %v2739_v45  ;;  %v16531_v8 = vand.u32 4294901760, %v11274_v5  ;;  %329 = vmatmul.mubr.f32.vlgmr.msra.gmra.mrb[0].mxu0 %v11879_v33 }
  0x76   :  { %16524 = vst [vmem:[#allocation147_spill] sm:$0xff] %v12100_v16  ;;  %16526 = vst [vmem:[#allocation148_spill] sm:$0xff] %v12105_v36  ;;  %v2747_v10 = vand.u32 4294901760, %v2746_v49  ;;  %v2634_v9 = vsub.f32 %v12091_v6, %v15739_v51  ;;  %v16533_v2 = vand.u32 4294901760, %v12100_v16  ;;  %v16534_v25 = vand.u32 4294901760, %v12105_v36 }
  0x77   :  { %16530 = vst [vmem:[#allocation150_spill] sm:$0xff] %v12125_v46  ;;  %v12135_v1 = vsub.f32 %v11274_v5, %v16531_v8  ;;  %v2628_v60 = vand.u32 4294901760, %v2627_v0  ;;  %v15747_v49 = vand.u32 4294901760, %v12125_v46  ;;  %v16536_v5 = vand.u32 4294901760, %v11566_v63 }
  0x78   :  { %v354_v57 = vsub.f32 %v12100_v16, %v16533_v2  ;;  %v366_v45 = vsub.f32 %v12105_v36, %v16534_v25  ;;  %v12145_v61 = vpack.c.bf16 %v2747_v10, %v2740_v18  ;;  %v2635_v51 = vand.u32 4294901760, %v2634_v9 }
  0x79   :  { %16532 = vst [vmem:[#allocation151_spill] sm:$0xff] %v12135_v1  ;;  %v15746_v31 = vand.u32 4294901760, %v12135_v1  ;;  %v12151_v8 = vsub.f32 %v11566_v63, %v16536_v5  ;;  %v360_v2 = vsub.f32 %v12125_v46, %v15747_v49  ;;  %v16538_v25 = vand.u32 4294901760, %v11583_v48  ;;  %v16551_v49 = vld [vmem:[#allocation12_spill] sm:$0xff] }
  0x7a   :  { %16535 = vst [vmem:[#allocation152_spill] sm:$0xff] %v12145_v61  ;;  %v355_v0 = vand.u32 4294901760, %v354_v57  ;;  %v367_v24 = vand.u32 4294901760, %v366_v45  ;;  %9677 = vmatprep.subr.bf16.mxu1 %v12145_v61  ;;  %v12163_v9 = vpack.c.bf16 %v2635_v51, %v2628_v60  ;;  %v16541_v10 = vand.u32 4294901760, %v11585_v47 }
  0x7b   :  { %16537 = vst [vmem:[#allocation153_spill] sm:$0xff] %v12151_v8  ;;  %v12159_v50 = vsub.f32 %v11583_v48, %v16538_v25  ;;  %v372_v63 = vsub.f32 %v12135_v1, %v15746_v31  ;;  %v15748_v18 = vand.u32 4294901760, %v12151_v8  ;;  %v361_v48 = vand.u32 4294901760, %v360_v2 }
  0x7c   :  { %16540 = vst [vmem:[#allocation155_spill] sm:$0xff] %v12163_v9  ;;  %v12172_v57 = vsub.f32 %v11585_v47, %v16541_v10  ;;  %v12174_v45 = vpack.c.bf16 %v367_v24, %v355_v0  ;;  %v16544_v25 = vand.u32 4294901760, %v11597_v38  ;;  %9679 = vmatpush3.bf16.msra.mxu1 %v12163_v9  ;;  %v16546_v24 = vand.u32 4294901760, %v11277_v7 }
  0x7d   :  { %16539 = vst [vmem:[#allocation154_spill] sm:$0xff] %v12159_v50  ;;  %v15750_v5 = vand.u32 4294901760, %v12159_v50  ;;  %v373_v60 = vand.u32 4294901760, %v372_v63  ;;  %v2753_v31 = vsub.f32 %v12151_v8, %v15748_v18  ;;  %v16548_v63 = vld [vmem:[#allocation11_spill] sm:$0xff]  ;;  %v16552_v18 = vand.u32 4294901760, %v16551_v49 }
  0x7e   :  { %16542 = vst [vmem:[#allocation156_spill] sm:$0xff] %v12172_v57  ;;  %16543 = vst [vmem:[#allocation157_spill] sm:$0xff] %v12174_v45  ;;  %v12180_v51 = vsub.f32 %v11597_v38, %v16544_v25  ;;  %v12190_v0 = vsub.f32 %v11277_v7, %v16546_v24  ;;  %9117 = vmatprep.subr.bf16.mxu0 %v12174_v45  ;;  %v16549_v10 = vand.u32 4294901760, %v16548_v63  ;;  %v16555_v33 = vand.u32 4294901760, %v12172_v57 }
  0x7f   :  { %v2760_v38 = vsub.f32 %v12159_v50, %v15750_v5  ;;  %v12206_v7 = vsub.f32 %v16551_v49, %v16552_v18  ;;  %v12208_v24 = vpack.c.bf16 %v373_v60, %v361_v48  ;;  %v2754_v47 = vand.u32 4294901760, %v2753_v31  ;;  %v16557_v18 = vld [vmem:[#allocation13_spill] sm:$0xff] }
  0x80   :  { %16545 = vst [vmem:[#allocation158_spill] sm:$0xff] %v12180_v51  ;;  %16547 = vst [vmem:[#allocation159_spill] sm:$0xff] %v12190_v0  ;;  %v12201_v25 = vsub.f32 %v16548_v63, %v16549_v10  ;;  %v2641_v9 = vsub.f32 %v12172_v57, %v16555_v33  ;;  %v15756_v5 = vand.u32 4294901760, %v12190_v0  ;;  %v16556_v61 = vand.u32 4294901760, %v12180_v51 }
  0x81   :  { %16553 = vst [vmem:[#allocation12_spill] sm:$0xff] %v12206_v7  ;;  %16554 = vst [vmem:[#allocation160_spill] sm:$0xff] %v12208_v24  ;;  %v2761_v2 = vand.u32 4294901760, %v2760_v38  ;;  %9119 = vmatpush1.bf16.msra.mxu0 %v12208_v24  ;;  %v16558_v48 = vand.u32 4294901760, %v16557_v18  ;;  %v16560_v38 = vld [vmem:[#allocation71_spill] sm:$0xff]  ;;  %v16565_v40 = vand.u32 4294901760, %v12206_v7 }
  0x82   :  { %16550 = vst [vmem:[#allocation11_spill] sm:$0xff] %v12201_v25  ;;  %v2648_v63 = vsub.f32 %v12180_v51, %v16556_v61  ;;  %v2642_v49 = vand.u32 4294901760, %v2641_v9  ;;  %v378_v31 = vsub.f32 %v12190_v0, %v15756_v5  ;;  %v16561_v33 = vand.u32 4294901760, %v16560_v38  ;;  %v16566_v0 = vld [vmem:[#allocation74_spill] sm:$0xff] }
  0x83   :  { %v12226_v60 = vsub.f32 %v16557_v18, %v16558_v48  ;;  %v12233_v10 = vpack.c.bf16 %v2761_v2, %v2754_v47  ;;  %v16564_v24 = vand.u32 4294901760, %v12201_v25  ;;  %v384_v5 = vsub.f32 %v12206_v7, %v16565_v40 }
  0x84   :  { %v12231_v61 = vsub.f32 %v16560_v38, %v16561_v33  ;;  %v2649_v45 = vand.u32 4294901760, %v2648_v63  ;;  %v379_v41 = vand.u32 4294901760, %v378_v31  ;;  %v16567_v1 = vand.u32 4294901760, %v16566_v0  ;;  %v16570_v63 = vld [vmem:[#allocation75_spill] sm:$0xff] }
  0x85   :  { %16559 = vst [vmem:[#allocation13_spill] sm:$0xff] %v12226_v60  ;;  %16563 = vst [vmem:[#allocation161_spill] sm:$0xff] %v12233_v10  ;;  %v390_v9 = vsub.f32 %v12201_v25, %v16564_v24  ;;  %v15763_v18 = vand.u32 4294901760, %v12226_v60  ;;  %9681 = vmatprep.subr.bf16.mxu1 %v12233_v10  ;;  %v385_v24 = vand.u32 4294901760, %v384_v5  ;;  %v16571_v33 = vand.u32 4294901760, %v16570_v63  ;;  %v16579_v10 = vld [vmem:[#allocation16_spill] sm:$0xff] }
  0x86   :  { %16562 = vst [vmem:[#allocation71_spill] sm:$0xff] %v12231_v61  ;;  %v15765_v48 = vand.u32 4294901760, %v12231_v61  ;;  %v12246_v38 = vsub.f32 %v16566_v0, %v16567_v1  ;;  %v12249_v47 = vpack.c.bf16 %v2649_v45, %v2642_v49  ;;  %v16573_v45 = vand.u32 4294901760, %v11648_v52  ;;  %v16587_v25 = vld [vmem:[#allocation18_spill] sm:$0xff] }
  0x87   :  { %v391_v2 = vand.u32 4294901760, %v390_v9  ;;  %v12254_v40 = vsub.f32 %v16570_v63, %v16571_v33  ;;  %v396_v31 = vsub.f32 %v12226_v60, %v15763_v18  ;;  %v16576_v63 = vld [vmem:[#allocation14_spill] sm:$0xff]  ;;  %v16588_v46 = vand.u32 4294901760, %v16587_v25 }
  0x88   :  { %16568 = vst [vmem:[#allocation74_spill] sm:$0xff] %v12246_v38  ;;  %16569 = vst [vmem:[#allocation162_spill] sm:$0xff] %v12249_v47  ;;  %v2767_v1 = vsub.f32 %v12231_v61, %v15765_v48  ;;  %v12266_v49 = vsub.f32 %v11648_v52, %v16573_v45  ;;  %9683 = vmatpush3.bf16.msra.mxu1 %v12249_v47  ;;  %v16577_v33 = vand.u32 4294901760, %v16576_v63  ;;  %v16580_v48 = vand.u32 4294901760, %v16579_v10 }
  0x89   :  { %16572 = vst [vmem:[#allocation75_spill] sm:$0xff] %v12254_v40  ;;  %v12269_v5 = vpack.c.bf16 %v391_v2, %v379_v41  ;;  %v15776_v9 = vand.u32 4294901760, %v12254_v40  ;;  %v397_v60 = vand.u32 4294901760, %v396_v31  ;;  %v16582_v52 = vand.u32 4294901760, %v12246_v38 }
  0x8a   :  { %16574 = vst [vmem:[#allocation163_spill] sm:$0xff] %v12266_v49  ;;  %v12275_v18 = vsub.f32 %v16576_v63, %v16577_v33  ;;  %v12280_v0 = vsub.f32 %v16579_v10, %v16580_v48  ;;  %v2768_v7 = vand.u32 4294901760, %v2767_v1  ;;  %v15779_v41 = vand.u32 4294901760, %v12266_v49  ;;  %v16583_v10 = vld [vmem:[#allocation17_spill] sm:$0xff]  ;;  %v44_v1 = vld [vmem:[#allocation2 + $0x20] sm:$0xff] }
  0x8b   :  { %16575 = vst [vmem:[#allocation164_spill] sm:$0xff] %v12269_v5  ;;  %v2774_v45 = vsub.f32 %v12246_v38, %v16582_v52  ;;  %9121 = vmatprep.subr.bf16.mxu0 %v12269_v5  ;;  %v2655_v2 = vsub.f32 %v12254_v40, %v15776_v9  ;;  %v16584_v48 = vand.u32 4294901760, %v16583_v10  ;;  %v12297_v47 = vpack.c.bf16 %v397_v60, %v385_v24 }
  0x8c   :  { %16578 = vst [vmem:[#allocation14_spill] sm:$0xff] %v12275_v18  ;;  %16581 = vst [vmem:[#allocation16_spill] sm:$0xff] %v12280_v0  ;;  %v2662_v5 = vsub.f32 %v12266_v49, %v15779_v41  ;;  %v12305_v9 = vsub.f32 %v16587_v25, %v16588_v46  ;;  %v16590_v33 = vand.u32 4294901760, %v12275_v18  ;;  %v12318_v46 = vand.u32 4294901760, %v44_v1  ;;  %v43_v25 = vld [vmem:[#allocation2 + $0x18] sm:$0xff] }
  0x8d   :  { %v12295_v31 = vsub.f32 %v16583_v10, %v16584_v48  ;;  %16586 = vst [vmem:[#allocation165_spill] sm:$0xff] %v12297_v47  ;;  %v2775_v52 = vand.u32 4294901760, %v2774_v45  ;;  %v2656_v63 = vand.u32 4294901760, %v2655_v2  ;;  %v16591_v10 = vand.u32 4294901760, %v12280_v0  ;;  %9123 = vmatpush1.bf16.msra.mxu0 %v12297_v47 }
  0x8e   :  { %16589 = vst [vmem:[#allocation18_spill] sm:$0xff] %v12305_v9  ;;  %v402_v36 = vsub.f32 %v12275_v18, %v16590_v33  ;;  %v2663_v48 = vand.u32 4294901760, %v2662_v5  ;;  %v15786_v41 = vand.u32 4294901760, %v12305_v9  ;;  %16593 = vst [vmem:[#allocation167_spill] sm:$0xff] %v12318_v46 }
  0x8f   :  { %16585 = vst [vmem:[#allocation17_spill] sm:$0xff] %v12295_v31  ;;  %v414_v60 = vsub.f32 %v12280_v0, %v16591_v10  ;;  %v15784_v24 = vand.u32 4294901760, %v12295_v31  ;;  %v12315_v45 = vpack.c.bf16 %v2775_v52, %v2768_v7  ;;  %v16594_v10 = vand.u32 4294901760, %v11668_v21 }
  0x90   :  { %v403_v2 = vand.u32 4294901760, %v402_v36  ;;  %v12329_v7 = vpack.c.bf16 %v2663_v48, %v2656_v63  ;;  %v420_v5 = vsub.f32 %v12305_v9, %v15786_v41  ;;  %v12335_v36 = vsub.f32 %v44_v1, %v12318_v46 }
  0x91   :  { %16592 = vst [vmem:[#allocation166_spill] sm:$0xff] %v12315_v45  ;;  %v415_v16 = vand.u32 4294901760, %v414_v60  ;;  %v408_v33 = vsub.f32 %v12295_v31, %v15784_v24  ;;  %v12326_v0 = vsub.f32 %v11668_v21, %v16594_v10  ;;  %9685 = vmatprep.subr.bf16.mxu1 %v12315_v45  ;;  %v16598_v52 = vand.u32 4294901760, %v11685_v14 }
  0x92   :  { %16596 = vst [vmem:[#allocation169_spill] sm:$0xff] %v12329_v7  ;;  %16597 = vst [vmem:[#allocation170_spill] sm:$0xff] %v12335_v36  ;;  %v12345_v45 = vand.u32 4294901760, %v43_v25  ;;  %9687 = vmatpush3.bf16.msra.mxu1 %v12329_v7  ;;  %v421_v63 = vand.u32 4294901760, %v420_v5  ;;  %v12349_v48 = vand.u32 4294901760, %v12335_v36  ;;  %v16603_v41 = vand.u32 4294901760, %v11687_v13 }
  0x93   :  { %16595 = vst [vmem:[#allocation168_spill] sm:$0xff] %v12326_v0  ;;  %v12340_v60 = vsub.f32 %v11685_v14, %v16598_v52  ;;  %v12342_v24 = vpack.c.bf16 %v415_v16, %v403_v2  ;;  %v409_v21 = vand.u32 4294901760, %v408_v33  ;;  %v15788_v10 = vand.u32 4294901760, %v12326_v0  ;;  %v16608_v52 = vld [vmem:[#allocation21_spill] sm:$0xff] }
  0x94   :  { %16601 = vst [vmem:[#allocation173_spill] sm:$0xff] %v12345_v45  ;;  %16602 = vst [vmem:[#allocation174_spill] sm:$0xff] %v12349_v48  ;;  %v12355_v14 = vsub.f32 %v11687_v13, %v16603_v41  ;;  %v12362_v2 = vsub.f32 %v43_v25, %v12345_v45  ;;  %v16606_v33 = vand.u32 4294901760, %v11699_v23  ;;  %v16609_v1 = vand.u32 4294901760, %v16608_v52 }
  0x95   :  { %16599 = vst [vmem:[#allocation171_spill] sm:$0xff] %v12340_v60  ;;  %16600 = vst [vmem:[#allocation172_spill] sm:$0xff] %v12342_v24  ;;  %9125 = vmatprep.subr.bf16.mxu0 %v12342_v24  ;;  %v2781_v16 = vsub.f32 %v12326_v0, %v15788_v10  ;;  %v12374_v13 = vpack.c.bf16 %v421_v63, %v409_v21  ;;  %v337_v41 = vsub.f32 %v12335_v36, %v12349_v48  ;;  %v16614_v48 = vld [vmem:[#allocation22_spill] sm:$0xff] }
  0x96   :  { %16604 = vst [vmem:[#allocation175_spill] sm:$0xff] %v12355_v14  ;;  %16605 = vst [vmem:[#allocation176_spill] sm:$0xff] %v12362_v2  ;;  %v12367_v5 = vsub.f32 %v11699_v23, %v16606_v33  ;;  %v12372_v7 = vsub.f32 %v16608_v52, %v16609_v1  ;;  %v16612_v10 = vand.u32 4294901760, %v12340_v60  ;;  %v15798_v24 = vand.u32 4294901760, %v12355_v14 }
  0x97   :  { %16611 = vst [vmem:[#allocation178_spill] sm:$0xff] %v12374_v13  ;;  %v2782_v47 = vand.u32 4294901760, %v2781_v16  ;;  %v12383_v23 = vand.u32 4294901760, %v12362_v2  ;;  %9127 = vmatpush1.bf16.msra.mxu0 %v12374_v13  ;;  %v338_v21 = vand.u32 4294901760, %v337_v41 }
  0x98   :  { %16607 = vst [vmem:[#allocation177_spill] sm:$0xff] %v12367_v5  ;;  %16610 = vst [vmem:[#allocation21_spill] sm:$0xff] %v12372_v7  ;;  %v2788_v25 = vsub.f32 %v12340_v60, %v16612_v10  ;;  %v15807_v33 = vand.u32 4294901760, %v12367_v5  ;;  %v2669_v52 = vsub.f32 %v12355_v14, %v15798_v24  ;;  %v16615_v10 = vand.u32 4294901760, %v16614_v48 }
  0x99   :  { %16613 = vst [vmem:[#allocation179_spill] sm:$0xff] %v12383_v23  ;;  %v343_v16 = vsub.f32 %v12362_v2, %v12383_v23  ;;  %v16617_v13 = vand.u32 4294901760, %v12372_v7  ;;  %2556 = vmatprep.mubr.f32.mxu1 %v338_v21  ;;  %v16622_v23 = vld [vmem:[#allocation25_spill] sm:$0xff]  ;;  %339 = vmatprep.mubr.f32.mxu0 %v338_v21  ;;  %v16628_v21 = vld [vmem:[#allocation27_spill] sm:$0xff] }
  0x9a   :  { %v2789_v63 = vand.u32 4294901760, %v2788_v25  ;;  %v12394_v9 = vsub.f32 %v16614_v48, %v16615_v10  ;;  %v2676_v1 = vsub.f32 %v12367_v5, %v15807_v33  ;;  %v16618_v25 = vld [vmem:[#allocation23_spill] sm:$0xff]  ;;  %v2670_v48 = vand.u32 4294901760, %v2669_v52 }
  0x9b   :  { %v426_v41 = vsub.f32 %v12372_v7, %v16617_v13  ;;  %v16619_v31 = vand.u32 4294901760, %v16618_v25  ;;  %v16623_v27 = vand.u32 4294901760, %v16622_v23  ;;  %v344_v33 = vand.u32 4294901760, %v343_v16 }
  0x9c   :  { %16616 = vst [vmem:[#allocation22_spill] sm:$0xff] %v12394_v9  ;;  %v12409_v18 = vpack.c.bf16 %v2789_v63, %v2782_v47  ;;  %v15812_v10 = vand.u32 4294901760, %v12394_v9  ;;  %v2677_v4 = vand.u32 4294901760, %v2676_v1  ;;  %v12425_v63 = vpack.c.bf16 %v11778_v59, %v11773_v53 }
  0x9d   :  { %v12407_v24 = vsub.f32 %v16618_v25, %v16619_v31  ;;  %v12415_v62 = vsub.f32 %v16622_v23, %v16623_v27  ;;  %v427_v13 = vand.u32 4294901760, %v426_v41  ;;  %v12429_v27 = vpack.c.bf16 %v11807_v12, %v11797_v30  ;;  %2562 = vmatmul.mubr.f32.gmra.mrb[2].mxu1 %v344_v33  ;;  %v16631_v41 = vld [vmem:[#allocation30_spill] sm:$0xff]  ;;  %v16638_v12 = vld [vmem:[#allocation32_spill] sm:$0xff]  ;;  %345 = vmatmul.mubr.f32.gmra.mrb[2].mxu0 %v344_v33 }
  0x9e   :  { %16621 = vst [vmem:[#allocation180_spill] sm:$0xff] %v12409_v18  ;;  %9689 = vmatprep.subr.bf16.mxu1 %v12409_v18  ;;  %v438_v47 = vsub.f32 %v12394_v9, %v15812_v10  ;;  %16625 = vst [vmem:[#allocation181_spill] sm:$0xff] %v12425_v63  ;;  %v12431_v23 = vpack.c.bf16 %v2677_v4, %v2670_v48  ;;  %v16629_v52 = vand.u32 4294901760, %v16628_v21  ;;  %v16632_v25 = vand.u32 4294901760, %v16631_v41  ;;  %v16635_v48 = vld [vmem:[#allocation31_spill] sm:$0xff] }
  0x9f   :  { %16620 = vst [vmem:[#allocation23_spill] sm:$0xff] %v12407_v24  ;;  %16624 = vst [vmem:[#allocation25_spill] sm:$0xff] %v12415_v62  ;;  %v15816_v7 = vand.u32 4294901760, %v12407_v24  ;;  %v16634_v18 = vand.u32 4294901760, %v12415_v62  ;;  %2792 = vmatprep.mubr.f32.mxu1 %v11753_v15  ;;  %v16636_v9 = vand.u32 4294901760, %v16635_v48  ;;  %736 = vmatprep.mubr.f32.mxu0 %v11753_v15 }
  0xa0   :  { %16626 = vst [vmem:[#allocation182_spill] sm:$0xff] %v12429_v27  ;;  %16627 = vst [vmem:[#allocation183_spill] sm:$0xff] %v12431_v23  ;;  %v12439_v16 = vsub.f32 %v16628_v21, %v16629_v52  ;;  %v12444_v10 = vsub.f32 %v16631_v41, %v16632_v25  ;;  %v439_v31 = vand.u32 4294901760, %v438_v47  ;;  %v16639_v21 = vand.u32 4294901760, %v16638_v12  ;;  %9691 = vmatpush3.bf16.msra.mxu1 %v12431_v23 }
  0xa1   :  { %v432_v1 = vsub.f32 %v12407_v24, %v15816_v7  ;;  %v444_v4 = vsub.f32 %v12415_v62, %v16634_v18  ;;  %v12453_v7 = vsub.f32 %v16635_v48, %v16636_v9  ;;  %v12465_v25 = vpack.c.bf16 %v11874_v54, %v11856_v58  ;;  %9693 = vmatprep.subr.bf16.mxu1 %v12425_v63  ;;  %v16654_v58 = vld [vmem:[#allocation39_spill] sm:$0xff] }
  0xa2   :  { %16630 = vst [vmem:[#allocation27_spill] sm:$0xff] %v12439_v16  ;;  %16633 = vst [vmem:[#allocation30_spill] sm:$0xff] %v12444_v10  ;;  %v12458_v52 = vsub.f32 %v16638_v12, %v16639_v21  ;;  %v15819_v41 = vand.u32 4294901760, %v12439_v16  ;;  %v15821_v18 = vand.u32 4294901760, %v12444_v10  ;;  %v12468_v9 = vpack.c.bf16 %v439_v31, %v427_v13  ;;  %v16644_v13 = vld [vmem:[#allocation35_spill] sm:$0xff]  ;;  %v16648_v12 = vld [vmem:[#allocation100_spill] sm:$0xff] }
  0xa3   :  { %16637 = vst [vmem:[#allocation31_spill] sm:$0xff] %v12453_v7  ;;  %v433_v47 = vand.u32 4294901760, %v432_v1  ;;  %16641 = vst [vmem:[#allocation184_spill] sm:$0xff] %v12465_v25  ;;  %v445_v48 = vand.u32 4294901760, %v444_v4  ;;  %v12481_v23 = vpack.c.bf16 %v11890_v32, %v11885_v17  ;;  %v16645_v31 = vand.u32 4294901760, %v16644_v13  ;;  %2794 = vmatmul.mubr.f32.vlgmr.msra.gmra.mrb[4].mxu1 %v16648_v12 }
  0xa4   :  { %16640 = vst [vmem:[#allocation32_spill] sm:$0xff] %v12458_v52  ;;  %16642 = vst [vmem:[#allocation185_spill] sm:$0xff] %v12468_v9  ;;  %v450_v1 = vsub.f32 %v12439_v16, %v15819_v41  ;;  %v462_v21 = vsub.f32 %v12444_v10, %v15821_v18  ;;  %9129 = vmatprep.subr.bf16.mxu0 %v12468_v9  ;;  %v16649_v41 = vand.u32 4294901760, %v12453_v7  ;;  %v16650_v18 = vand.u32 4294901760, %v12458_v52  ;;  %v16651_v9 = vld [vmem:[#allocation36_spill] sm:$0xff] }
  0xa5   :  { %16643 = vst [vmem:[#allocation186_spill] sm:$0xff] %v12481_v23  ;;  %v12486_v4 = vsub.f32 %v16644_v13, %v16645_v31  ;;  %v12489_v33 = vpack.c.bf16 %v445_v48, %v433_v47  ;;  %9695 = vmatpush3.bf16.msra.mxu1 %v12429_v27  ;;  %v11102_v31 = vld [vmem:[#allocation5 + $0x110] sm:$0xff]  ;;  %v16652_v47 = vand.u32 4294901760, %v16651_v9  ;;  %2799 = vmatprep.mubr.f32.mxu1 %v12318_v46  ;;  %v16655_v27 = vand.u32 4294901760, %v16654_v58  ;;  %v16657_v13 = vld [vmem:[#allocation40_spill] sm:$0xff] }
  0xa6   :  { %v456_v63 = vsub.f32 %v12453_v7, %v16649_v41  ;;  %v468_v15 = vsub.f32 %v12458_v52, %v16650_v18  ;;  %v451_v32 = vand.u32 4294901760, %v450_v1  ;;  %v463_v17 = vand.u32 4294901760, %v462_v21  ;;  %9697 = vmatprep.subr.bf16.mxu1 %v12465_v25  ;;  %v11103_v18 = vld [vmem:[#allocation5 + $0xf0] sm:$0xff]  ;;  %v11104_v21 = vld [vmem:[#allocation5 + $0x108] sm:$0xff] }
  0xa7   :  { %16646 = vst [vmem:[#allocation35_spill] sm:$0xff] %v12486_v4  ;;  %16647 = vst [vmem:[#allocation187_spill] sm:$0xff] %v12489_v33  ;;  %v12502_v48 = vsub.f32 %v11102_v31, %v16652_v47  ;;  %9131 = vmatpush1.bf16.msra.mxu0 %v12489_v33  ;;  %v12509_v1 = vsub.f32 %v11103_v18, %v16655_v27  ;;  %v16658_v30 = vand.u32 4294901760, %v16657_v13  ;;  %v16661_v31 = vand.u32 4294901760, %v12486_v4  ;;  %v16668_v13 = vld [vmem:[#allocation44_spill] sm:$0xff] }
  0xa8   :  { %v457_v41 = vand.u32 4294901760, %v456_v63  ;;  %v469_v54 = vand.u32 4294901760, %v468_v15  ;;  %v12515_v9 = vpack.c.bf16 %v463_v17, %v451_v32  ;;  %v12523_v63 = vpack.c.bf16 %v11934_v29, %v11922_v42  ;;  %2801 = vmatmul.mubr.f32.gmra.mrb[6].mxu1 %v12345_v45  ;;  %v11105_v32 = vld [vmem:[#allocation5 + $0x128] sm:$0xff]  ;;  %v16679_v45 = vld [vmem:[#allocation99_spill] sm:$0xff] }
  0xa9   :  { %16653 = vst [vmem:[#allocation36_spill] sm:$0xff] %v12502_v48  ;;  %16656 = vst [vmem:[#allocation39_spill] sm:$0xff] %v12509_v1  ;;  %v12513_v12 = vsub.f32 %v11104_v21, %v16658_v30  ;;  %v474_v47 = vsub.f32 %v12486_v4, %v16661_v31  ;;  %v15834_v15 = vand.u32 4294901760, %v12502_v48  ;;  %v12531_v30 = vpack.c.bf16 %v11957_v44, %v11948_v43  ;;  %v11106_v31 = vld [vmem:[#allocation5 + $0x140] sm:$0xff]  ;;  %v16676_v44 = vld [vmem:[#allocation48_spill] sm:$0xff] }
  0xaa   :  { %16660 = vst [vmem:[#allocation188_spill] sm:$0xff] %v12515_v9  ;;  %16662 = vst [vmem:[#allocation189_spill] sm:$0xff] %v12523_v63  ;;  %v12525_v58 = vpack.c.bf16 %v469_v54, %v457_v41  ;;  %9133 = vmatprep.subr.bf16.mxu0 %v12515_v9  ;;  %9699 = vmatpush3.bf16.msra.mxu1 %v12481_v23  ;;  %v16665_v41 = vld [vmem:[#allocation43_spill] sm:$0xff]  ;;  %v16669_v27 = vand.u32 4294901760, %v16668_v13  ;;  %v16671_v9 = vand.u32 4294901760, %v12509_v1  ;;  %v16677_v43 = vand.u32 4294901760, %v16676_v44 }
  0xab   :  { %16659 = vst [vmem:[#allocation40_spill] sm:$0xff] %v12513_v12  ;;  %16664 = vst [vmem:[#allocation191_spill] sm:$0xff] %v12531_v30  ;;  %v475_v17 = vand.u32 4294901760, %v474_v47  ;;  %v486_v54 = vsub.f32 %v12502_v48, %v15834_v15  ;;  %v16666_v18 = vand.u32 4294901760, %v16665_v41  ;;  %v16672_v23 = vand.u32 4294901760, %v12513_v12  ;;  %9701 = vmatprep.subr.bf16.mxu1 %v12523_v63  ;;  %v11107_v41 = vld [vmem:[#allocation5 + $0x120] sm:$0xff]  ;;  %2936 = vmatprep.mubr.f32.mxu1 %v16679_v45 }
  0xac   :  { %16663 = vst [vmem:[#allocation190_spill] sm:$0xff] %v12525_v58  ;;  %v12545_v25 = vsub.f32 %v11106_v31, %v16669_v27  ;;  %9135 = vmatpush1.bf16.msra.mxu0 %v12525_v58  ;;  %v480_v47 = vsub.f32 %v12509_v1, %v16671_v9  ;;  %v11108_v58 = vld [vmem:[#allocation5 + $0x138] sm:$0xff] }
  0xad   :  { %v12541_v21 = vsub.f32 %v11105_v32, %v16666_v18  ;;  %v492_v15 = vsub.f32 %v12513_v12, %v16672_v23  ;;  %v16673_v32 = vld [vmem:[#allocation45_spill] sm:$0xff]  ;;  %v487_v13 = vand.u32 4294901760, %v486_v54  ;;  %v12563_v9 = vsub.f32 %v11108_v58, %v16677_v43 }
  0xae   :  { %16670 = vst [vmem:[#allocation44_spill] sm:$0xff] %v12545_v25  ;;  %v16674_v18 = vand.u32 4294901760, %v16673_v32  ;;  %v15844_v31 = vand.u32 4294901760, %v12545_v25  ;;  %v481_v23 = vand.u32 4294901760, %v480_v47  ;;  %9703 = vmatpush3.bf16.msra.mxu1 %v12531_v30  ;;  %v11109_v32 = vld [vmem:[#allocation5 + $0x158] sm:$0xff] }
  0xaf   :  { %16667 = vst [vmem:[#allocation43_spill] sm:$0xff] %v12541_v21  ;;  %v15843_v27 = vand.u32 4294901760, %v12541_v21  ;;  %16678 = vst [vmem:[#allocation48_spill] sm:$0xff] %v12563_v9  ;;  %v493_v29 = vand.u32 4294901760, %v492_v15  ;;  %v12571_v54 = vpack.c.bf16 %v487_v13, %v475_v17  ;;  %v15853_v15 = vand.u32 4294901760, %v12563_v9  ;;  %v16687_v30 = vld [vmem:[#allocation52_spill] sm:$0xff] }
  0xb0   :  { %v12557_v33 = vsub.f32 %v11107_v41, %v16674_v18  ;;  %v12569_v41 = vpack.c.bf16 %v12014_v22, %v11998_v20  ;;  %v510_v43 = vsub.f32 %v12545_v25, %v15844_v31  ;;  %v12589_v17 = vpack.c.bf16 %v12029_v55, %v12019_v39  ;;  %v16684_v18 = vld [vmem:[#allocation50_spill] sm:$0xff] }
  0xb1   :  { %16681 = vst [vmem:[#allocation193_spill] sm:$0xff] %v12571_v54  ;;  %v498_v44 = vsub.f32 %v12541_v21, %v15843_v27  ;;  %v12581_v58 = vpack.c.bf16 %v493_v29, %v481_v23  ;;  %v16685_v13 = vand.u32 4294901760, %v16684_v18  ;;  %9137 = vmatprep.subr.bf16.mxu0 %v12571_v54  ;;  %v516_v23 = vsub.f32 %v12563_v9, %v15853_v15 }
  0xb2   :  { %16675 = vst [vmem:[#allocation45_spill] sm:$0xff] %v12557_v33  ;;  %v15845_v63 = vand.u32 4294901760, %v12557_v33  ;;  %16680 = vst [vmem:[#allocation192_spill] sm:$0xff] %v12569_v41  ;;  %9705 = vmatprep.subr.bf16.mxu1 %v12569_v41  ;;  %v511_v29 = vand.u32 4294901760, %v510_v43  ;;  %v16688_v41 = vand.u32 4294901760, %v16687_v30  ;;  %v16693_v43 = vld [vmem:[#allocation54_spill] sm:$0xff] }
  0xb3   :  { %16682 = vst [vmem:[#allocation194_spill] sm:$0xff] %v12581_v58  ;;  %16683 = vst [vmem:[#allocation195_spill] sm:$0xff] %v12589_v17  ;;  %v12593_v27 = vsub.f32 %v11109_v32, %v16685_v13  ;;  %v499_v31 = vand.u32 4294901760, %v498_v44  ;;  %9139 = vmatpush1.bf16.msra.mxu0 %v12581_v58  ;;  %v11111_v32 = vld [vmem:[#allocation5 + $0x150] sm:$0xff]  ;;  %v16690_v13 = vld [vmem:[#allocation53_spill] sm:$0xff]  ;;  %v16694_v20 = vand.u32 4294901760, %v16693_v43  ;;  %9707 = vmatpush3.bf16.msra.mxu1 %v12589_v17 }
  0xb4   :  { %v504_v47 = vsub.f32 %v12557_v33, %v15845_v63  ;;  %v11110_v63 = vld [vmem:[#allocation5 + $0x170] sm:$0xff]  ;;  %v16691_v39 = vand.u32 4294901760, %v16690_v13  ;;  %v11112_v44 = vld [vmem:[#allocation5 + $0x168] sm:$0xff]  ;;  %v517_v30 = vand.u32 4294901760, %v516_v23 }
  0xb5   :  { %16686 = vst [vmem:[#allocation50_spill] sm:$0xff] %v12593_v27  ;;  %v12601_v22 = vsub.f32 %v11110_v63, %v16688_v41  ;;  %v15854_v18 = vand.u32 4294901760, %v12593_v27  ;;  %v12611_v45 = vsub.f32 %v11112_v44, %v16694_v20  ;;  %v12613_v15 = vpack.c.bf16 %v511_v29, %v499_v31  ;;  %v16700_v13 = vld [vmem:[#allocation58_spill] sm:$0xff] }
  0xb6   :  { %v505_v55 = vand.u32 4294901760, %v504_v47  ;;  %v12607_v54 = vsub.f32 %v11111_v32, %v16691_v39  ;;  %v12619_v41 = vpack.c.bf16 %v12072_v37, %v12067_v34  ;;  %v12628_v31 = vpack.c.bf16 %v12091_v6, %v12083_v11  ;;  %v11113_v32 = vld [vmem:[#allocation5 + $0x188] sm:$0xff]  ;;  %v11116_v6 = vld [vmem:[#allocation5 + $0x198] sm:$0xff] }
  0xb7   :  { %16689 = vst [vmem:[#allocation52_spill] sm:$0xff] %v12601_v22  ;;  %16695 = vst [vmem:[#allocation54_spill] sm:$0xff] %v12611_v45  ;;  %v15858_v63 = vand.u32 4294901760, %v12601_v22  ;;  %v522_v39 = vsub.f32 %v12593_v27, %v15854_v18  ;;  %9141 = vmatprep.subr.bf16.mxu0 %v12613_v15  ;;  %v16701_v44 = vand.u32 4294901760, %v16700_v13  ;;  %v16703_v17 = vand.u32 4294901760, %v12611_v45  ;;  %v16707_v13 = vld [vmem:[#allocation61_spill] sm:$0xff] }
  0xb8   :  { %16692 = vst [vmem:[#allocation53_spill] sm:$0xff] %v12607_v54  ;;  %16696 = vst [vmem:[#allocation196_spill] sm:$0xff] %v12613_v15  ;;  %v15860_v47 = vand.u32 4294901760, %v12607_v54  ;;  %v12631_v29 = vpack.c.bf16 %v517_v30, %v505_v55  ;;  %9709 = vmatprep.subr.bf16.mxu1 %v12619_v41  ;;  %v11114_v30 = vld [vmem:[#allocation5 + $0x1a0] sm:$0xff]  ;;  %v16704_v15 = vld [vmem:[#allocation59_spill] sm:$0xff] }
  0xb9   :  { %16697 = vst [vmem:[#allocation197_spill] sm:$0xff] %v12619_v41  ;;  %16698 = vst [vmem:[#allocation198_spill] sm:$0xff] %v12628_v31  ;;  %v534_v23 = vsub.f32 %v12601_v22, %v15858_v63  ;;  %v12639_v43 = vsub.f32 %v11113_v32, %v16701_v44  ;;  %v523_v18 = vand.u32 4294901760, %v522_v39  ;;  %v540_v55 = vsub.f32 %v12611_v45, %v16703_v17  ;;  %v11115_v32 = vld [vmem:[#allocation5 + $0x180] sm:$0xff]  ;;  %v16710_v11 = vld [vmem:[#allocation62_spill] sm:$0xff] }
  0xba   :  { %16699 = vst [vmem:[#allocation199_spill] sm:$0xff] %v12631_v29  ;;  %v528_v20 = vsub.f32 %v12607_v54, %v15860_v47  ;;  %v16705_v58 = vand.u32 4294901760, %v16704_v15  ;;  %9143 = vmatpush1.bf16.msra.mxu0 %v12631_v29  ;;  %9711 = vmatpush3.bf16.msra.mxu1 %v12628_v31  ;;  %v16708_v44 = vand.u32 4294901760, %v16707_v13  ;;  %v16711_v17 = vand.u32 4294901760, %v16710_v11 }
  0xbb   :  { %16702 = vst [vmem:[#allocation58_spill] sm:$0xff] %v12639_v43  ;;  %v535_v41 = vand.u32 4294901760, %v534_v23  ;;  %v15865_v39 = vand.u32 4294901760, %v12639_v43  ;;  %v12665_v23 = vpack.c.bf16 %v12159_v50, %v12151_v8  ;;  %v16726_v50 = vld [vmem:[#allocation70_spill] sm:$0xff] }
  0xbc   :  { %v12649_v63 = vsub.f32 %v11114_v30, %v16705_v58  ;;  %v12656_v47 = vsub.f32 %v11115_v32, %v16708_v44  ;;  %v12660_v37 = vsub.f32 %v11116_v6, %v16711_v17  ;;  %v529_v15 = vand.u32 4294901760, %v528_v20 }
  0xbd   :  { %v541_v58 = vand.u32 4294901760, %v540_v55  ;;  %16713 = vst [vmem:[#allocation200_spill] sm:$0xff] %v12665_v23  ;;  %v12667_v31 = vpack.c.bf16 %v535_v41, %v523_v18  ;;  %v546_v32 = vsub.f32 %v12639_v43, %v15865_v39  ;;  %9713 = vmatprep.subr.bf16.mxu1 %v12665_v23  ;;  %v12682_v18 = vpack.c.bf16 %v12180_v51, %v12172_v57  ;;  %v11117_v41 = vld [vmem:[#allocation5 + $0x1b8] sm:$0xff]  ;;  %v16717_v55 = vld [vmem:[#allocation66_spill] sm:$0xff]  ;;  %v16720_v23 = vld [vmem:[#allocation67_spill] sm:$0xff] }
  0xbe   :  { %16706 = vst [vmem:[#allocation59_spill] sm:$0xff] %v12649_v63  ;;  %16709 = vst [vmem:[#allocation61_spill] sm:$0xff] %v12656_v47  ;;  %v15866_v30 = vand.u32 4294901760, %v12649_v63  ;;  %v15871_v13 = vand.u32 4294901760, %v12656_v47  ;;  %v15874_v11 = vand.u32 4294901760, %v12660_v37  ;;  %v16718_v44 = vand.u32 4294901760, %v16717_v55 }
  0xbf   :  { %16712 = vst [vmem:[#allocation62_spill] sm:$0xff] %v12660_v37  ;;  %16714 = vst [vmem:[#allocation201_spill] sm:$0xff] %v12667_v31  ;;  %v12674_v6 = vpack.c.bf16 %v541_v58, %v529_v15  ;;  %9145 = vmatprep.subr.bf16.mxu0 %v12667_v31  ;;  %v547_v39 = vand.u32 4294901760, %v546_v32  ;;  %v16721_v29 = vand.u32 4294901760, %v16720_v23  ;;  %9715 = vmatpush3.bf16.msra.mxu1 %v12682_v18  ;;  %v11119_v55 = vld [vmem:[#allocation5 + $0x1b0] sm:$0xff]  ;;  %v11120_v57 = vld [vmem:[#allocation5 + $0x1c8] sm:$0xff] }
  0xc0   :  { %v558_v20 = vsub.f32 %v12649_v63, %v15866_v30  ;;  %16716 = vst [vmem:[#allocation203_spill] sm:$0xff] %v12682_v18  ;;  %v12686_v17 = vsub.f32 %v11117_v41, %v16718_v44  ;;  %v552_v15 = vsub.f32 %v12656_v47, %v15871_v13  ;;  %v564_v58 = vsub.f32 %v12660_v37, %v15874_v11  ;;  %v11118_v30 = vld [vmem:[#allocation5 + $0x1d0] sm:$0xff]  ;;  %v16723_v44 = vld [vmem:[#allocation69_spill] sm:$0xff] }
  0xc1   :  { %16715 = vst [vmem:[#allocation202_spill] sm:$0xff] %v12674_v6  ;;  %v12697_v51 = vsub.f32 %v11118_v30, %v16721_v29  ;;  %9147 = vmatpush1.bf16.msra.mxu0 %v12674_v6  ;;  %v16724_v31 = vand.u32 4294901760, %v16723_v44  ;;  %v16727_v11 = vand.u32 4294901760, %v16726_v50 }
  0xc2   :  { %16719 = vst [vmem:[#allocation66_spill] sm:$0xff] %v12686_v17  ;;  %v559_v41 = vand.u32 4294901760, %v558_v20  ;;  %v15877_v32 = vand.u32 4294901760, %v12686_v17  ;;  %v553_v23 = vand.u32 4294901760, %v552_v15  ;;  %v565_v29 = vand.u32 4294901760, %v564_v58  ;;  %v11121_v15 = vld [vmem:[#allocation5 + $0x1e8] sm:$0xff] }
  0xc3   :  { %16722 = vst [vmem:[#allocation67_spill] sm:$0xff] %v12697_v51  ;;  %v12704_v13 = vsub.f32 %v11119_v55, %v16724_v31  ;;  %v12708_v8 = vsub.f32 %v11120_v57, %v16727_v11  ;;  %v15878_v30 = vand.u32 4294901760, %v12697_v51  ;;  %v12713_v20 = vpack.c.bf16 %v12246_v38, %v12231_v61  ;;  %v16733_v58 = vld [vmem:[#allocation77_spill] sm:$0xff] }
  0xc4   :  { %v12715_v18 = vpack.c.bf16 %v559_v41, %v547_v39  ;;  %v570_v31 = vsub.f32 %v12686_v17, %v15877_v32  ;;  %v12722_v57 = vpack.c.bf16 %v565_v29, %v553_v23  ;;  %v12730_v39 = vpack.c.bf16 %v12266_v49, %v12254_v40  ;;  %v11124_v40 = vld [vmem:[#allocation5 + $0x1f8] sm:$0xff]  ;;  %v16742_v38 = vld [vmem:[#allocation81_spill] sm:$0xff] }
  0xc5   :  { %16725 = vst [vmem:[#allocation69_spill] sm:$0xff] %v12704_v13  ;;  %16728 = vst [vmem:[#allocation70_spill] sm:$0xff] %v12708_v8  ;;  %v15883_v55 = vand.u32 4294901760, %v12704_v13  ;;  %v15886_v50 = vand.u32 4294901760, %v12708_v8  ;;  %v582_v11 = vsub.f32 %v12697_v51, %v15878_v30  ;;  %9717 = vmatprep.subr.bf16.mxu1 %v12713_v20  ;;  %v16734_v41 = vand.u32 4294901760, %v16733_v58  ;;  %v11122_v30 = vld [vmem:[#allocation5 + $0x200] sm:$0xff] }
  0xc6   :  { %16729 = vst [vmem:[#allocation204_spill] sm:$0xff] %v12713_v20  ;;  %16730 = vst [vmem:[#allocation205_spill] sm:$0xff] %v12715_v18  ;;  %9149 = vmatprep.subr.bf16.mxu0 %v12715_v18  ;;  %v571_v32 = vand.u32 4294901760, %v570_v31  ;;  %v16736_v20 = vld [vmem:[#allocation78_spill] sm:$0xff]  ;;  %9719 = vmatpush3.bf16.msra.mxu1 %v12730_v39  ;;  %v11123_v58 = vld [vmem:[#allocation5 + $0x1e0] sm:$0xff] }
  0xc7   :  { %16731 = vst [vmem:[#allocation206_spill] sm:$0xff] %v12722_v57  ;;  %16732 = vst [vmem:[#allocation207_spill] sm:$0xff] %v12730_v39  ;;  %v12734_v44 = vsub.f32 %v11121_v15, %v16734_v41  ;;  %v576_v23 = vsub.f32 %v12704_v13, %v15883_v55  ;;  %v588_v29 = vsub.f32 %v12708_v8, %v15886_v50  ;;  %v16737_v6 = vand.u32 4294901760, %v16736_v20  ;;  %v16739_v41 = vld [vmem:[#allocation80_spill] sm:$0xff] }
  0xc8   :  { %9151 = vmatpush1.bf16.msra.mxu0 %v12722_v57  ;;  %v583_v15 = vand.u32 4294901760, %v582_v11  ;;  %v16740_v18 = vand.u32 4294901760, %v16739_v41  ;;  %v16743_v50 = vand.u32 4294901760, %v16742_v38  ;;  %v12761_v11 = vpack.c.bf16 %v12340_v60, %v12326_v0  ;;  %v16758_v60 = vld [vmem:[#allocation89_spill] sm:$0xff] }
  0xc9   :  { %16735 = vst [vmem:[#allocation77_spill] sm:$0xff] %v12734_v44  ;;  %v12745_v49 = vsub.f32 %v11122_v30, %v16737_v6  ;;  %v15889_v31 = vand.u32 4294901760, %v12734_v44  ;;  %v577_v20 = vand.u32 4294901760, %v576_v23  ;;  %v589_v6 = vand.u32 4294901760, %v588_v29  ;;  %v11125_v23 = vld [vmem:[#allocation5 + $0x218] sm:$0xff]  ;;  %v16749_v29 = vld [vmem:[#allocation85_spill] sm:$0xff] }
  0xca   :  { %v12752_v55 = vsub.f32 %v11123_v58, %v16740_v18  ;;  %v12756_v61 = vsub.f32 %v11124_v40, %v16743_v50  ;;  %16745 = vst [vmem:[#allocation208_spill] sm:$0xff] %v12761_v11  ;;  %v12763_v39 = vpack.c.bf16 %v583_v15, %v571_v32  ;;  %9721 = vmatprep.subr.bf16.mxu1 %v12761_v11  ;;  %v16750_v15 = vand.u32 4294901760, %v16749_v29  ;;  %v16752_v11 = vld [vmem:[#allocation86_spill] sm:$0xff]  ;;  %v11127_v29 = vld [vmem:[#allocation5 + $0x210] sm:$0xff] }
  0xcb   :  { %16738 = vst [vmem:[#allocation78_spill] sm:$0xff] %v12745_v49  ;;  %v15890_v30 = vand.u32 4294901760, %v12745_v49  ;;  %v594_v18 = vsub.f32 %v12734_v44, %v15889_v31  ;;  %v12770_v40 = vpack.c.bf16 %v589_v6, %v577_v20  ;;  %v12778_v32 = vpack.c.bf16 %v12367_v5, %v12355_v14  ;;  %v11128_v14 = vld [vmem:[#allocation5 + $0x228] sm:$0xff] }
  0xcc   :  { %16741 = vst [vmem:[#allocation80_spill] sm:$0xff] %v12752_v55  ;;  %16744 = vst [vmem:[#allocation81_spill] sm:$0xff] %v12756_v61  ;;  %v15895_v58 = vand.u32 4294901760, %v12752_v55  ;;  %v15898_v38 = vand.u32 4294901760, %v12756_v61  ;;  %v12782_v41 = vsub.f32 %v11125_v23, %v16750_v15  ;;  %9153 = vmatprep.subr.bf16.mxu0 %v12763_v39  ;;  %v16753_v57 = vand.u32 4294901760, %v16752_v11  ;;  %v16755_v15 = vld [vmem:[#allocation88_spill] sm:$0xff] }
  0xcd   :  { %16746 = vst [vmem:[#allocation209_spill] sm:$0xff] %v12763_v39  ;;  %16747 = vst [vmem:[#allocation210_spill] sm:$0xff] %v12770_v40  ;;  %v606_v50 = vsub.f32 %v12745_v49, %v15890_v30  ;;  %v595_v31 = vand.u32 4294901760, %v594_v18  ;;  %v11126_v30 = vld [vmem:[#allocation5 + $0x230] sm:$0xff]  ;;  %9155 = vmatpush1.bf16.msra.mxu0 %v12770_v40  ;;  %9723 = vmatpush3.bf16.msra.mxu1 %v12778_v32  ;;  %v16756_v39 = vand.u32 4294901760, %v16755_v15  ;;  %v16761_v40 = vld [vmem:[#allocation34_spill] sm:$0xff] }
  0xce   :  { %16748 = vst [vmem:[#allocation211_spill] sm:$0xff] %v12778_v32  ;;  %16751 = vst [vmem:[#allocation85_spill] sm:$0xff] %v12782_v41  ;;  %v600_v20 = vsub.f32 %v12752_v55, %v15895_v58  ;;  %v612_v6 = vsub.f32 %v12756_v61, %v15898_v38  ;;  %v12793_v5 = vsub.f32 %v11126_v30, %v16753_v57  ;;  %v16759_v38 = vand.u32 4294901760, %v16758_v60  ;;  %v16762_v32 = vld [vmem:[#allocation95_spill] sm:$0xff] }
  0xcf   :  { %v607_v23 = vand.u32 4294901760, %v606_v50  ;;  %v12800_v58 = vsub.f32 %v11127_v29, %v16756_v39  ;;  %9725 = vmatprep.subr.bf16.mxu1 %v16761_v40  ;;  %v11129_v50 = vld [vmem:[#allocation5 + $0x248] sm:$0xff]  ;;  %v16763_v34 = vand.u32 4294901760, %v16762_v32  ;;  %v16766_v39 = vand.u32 4294901760, %v12782_v41 }
  0xd0   :  { %16754 = vst [vmem:[#allocation86_spill] sm:$0xff] %v12793_v5  ;;  %v12804_v0 = vsub.f32 %v11128_v14, %v16759_v38  ;;  %v601_v11 = vand.u32 4294901760, %v600_v20  ;;  %v613_v57 = vand.u32 4294901760, %v612_v6  ;;  %v15904_v30 = vand.u32 4294901760, %v12793_v5  ;;  %2939 = vmatmul.mubr.f32.vlgmr.msra.gmra.mrb[8].mxu1 %v11815_v26 }
  0xd1   :  { %16757 = vst [vmem:[#allocation88_spill] sm:$0xff] %v12800_v58  ;;  %v12810_v18 = vsub.f32 %v11129_v50, %v16763_v34  ;;  %v12812_v42 = vpack.c.bf16 %v607_v23, %v595_v31  ;;  %v618_v29 = vsub.f32 %v12782_v41, %v16766_v39  ;;  %v15905_v60 = vand.u32 4294901760, %v12800_v58  ;;  %v11130_v31 = vld [vmem:[#allocation5 + $0x260] sm:$0xff]  ;;  %2945 = vmatprep.mubr.f32.mxu1 %v12335_v36 }
  0xd2   :  { %16760 = vst [vmem:[#allocation89_spill] sm:$0xff] %v12804_v0  ;;  %v15906_v14 = vand.u32 4294901760, %v12804_v0  ;;  %v12819_v38 = vpack.c.bf16 %v613_v57, %v601_v11  ;;  %v630_v20 = vsub.f32 %v12793_v5, %v15904_v30  ;;  %v16768_v32 = vand.u32 4294901760, %v11780_v28  ;;  %v16770_v57 = vld [vmem:[#allocation37_spill] sm:$0xff] }
  0xd3   :  { %16764 = vst [vmem:[#allocation95_spill] sm:$0xff] %v12810_v18  ;;  %16765 = vst [vmem:[#allocation212_spill] sm:$0xff] %v12812_v42  ;;  %v15909_v34 = vand.u32 4294901760, %v12810_v18  ;;  %9157 = vmatprep.subr.bf16.mxu0 %v12812_v42  ;;  %v619_v23 = vand.u32 4294901760, %v618_v29  ;;  %v624_v15 = vsub.f32 %v12800_v58, %v15905_v60  ;;  %9727 = vmatpush3.bf16.msra.mxu1 %v16770_v57  ;;  %v11131_v50 = vld [vmem:[#allocation5 + $0x240] sm:$0xff]  ;;  %v16771_v39 = vand.u32 4294901760, %v11799_v35 }
  0xd4   :  { %16767 = vst [vmem:[#allocation213_spill] sm:$0xff] %v12819_v38  ;;  %v12828_v6 = vsub.f32 %v11130_v31, %v16768_v32  ;;  %v636_v11 = vsub.f32 %v12804_v0, %v15906_v14  ;;  %9159 = vmatpush1.bf16.msra.mxu0 %v12819_v38  ;;  %v631_v28 = vand.u32 4294901760, %v630_v20  ;;  %v11132_v32 = vld [vmem:[#allocation5 + $0x258] sm:$0xff]  ;;  %v16773_v60 = vand.u32 4294901760, %v11819_v19  ;;  %v16775_v42 = vld [vmem:[#allocation42_spill] sm:$0xff]  ;;  %2948 = vmatmul.mubr.f32.gmra.mrb[10].mxu1 %v12362_v2 }
  0xd5   :  { %v12840_v30 = vsub.f32 %v11131_v50, %v16771_v39  ;;  %v642_v29 = vsub.f32 %v12810_v18, %v15909_v34  ;;  %9729 = vmatprep.subr.bf16.mxu1 %v16775_v42  ;;  %v625_v26 = vand.u32 4294901760, %v624_v15  ;;  %v16776_v39 = vand.u32 4294901760, %v11858_v3  ;;  %v16787_v38 = vld [vmem:[#allocation112_spill] sm:$0xff]  ;;  %v16799_v57 = vld [vmem:[#allocation122_spill] sm:$0xff] }
  0xd6   :  { %16769 = vst [vmem:[#allocation214_spill] sm:$0xff] %v12828_v6  ;;  %v12849_v14 = vsub.f32 %v11132_v32, %v16773_v60  ;;  %v637_v35 = vand.u32 4294901760, %v636_v11  ;;  %v12859_v34 = vpack.c.bf16 %v631_v28, %v619_v23  ;;  %v16779_v19 = vand.u32 4294901760, %v12828_v6  ;;  %v16781_v11 = vld [vmem:[#allocation46_spill] sm:$0xff]  ;;  %v16782_v28 = vld [vmem:[#allocation108_spill] sm:$0xff]  ;;  %v16790_v23 = vld [vmem:[#allocation115_spill] sm:$0xff] }
  0xd7   :  { %16772 = vst [vmem:[#allocation215_spill] sm:$0xff] %v12840_v30  ;;  %v15911_v50 = vand.u32 4294901760, %v12840_v30  ;;  %v12856_v20 = vsub.f32 %v11858_v3, %v16776_v39  ;;  %v643_v31 = vand.u32 4294901760, %v642_v29  ;;  %9731 = vmatpush3.bf16.msra.mxu1 %v16781_v11  ;;  %v16783_v29 = vand.u32 4294901760, %v16782_v28 }
  0xd8   :  { %16774 = vst [vmem:[#allocation216_spill] sm:$0xff] %v12849_v14  ;;  %16778 = vst [vmem:[#allocation218_spill] sm:$0xff] %v12859_v34  ;;  %v654_v60 = vsub.f32 %v12828_v6, %v16779_v19  ;;  %v12866_v15 = vpack.c.bf16 %v637_v35, %v625_v26  ;;  %v16785_v19 = vld [vmem:[#allocation103_spill] sm:$0xff]  ;;  %9161 = vmatprep.subr.bf16.mxu0 %v12859_v34  ;;  %v16786_v26 = vand.u32 4294901760, %v12849_v14  ;;  %v16791_v36 = vand.u32 4294901760, %v16790_v23 }
  0xd9   :  { %16777 = vst [vmem:[#allocation217_spill] sm:$0xff] %v12856_v20  ;;  %v648_v3 = vsub.f32 %v12840_v30, %v15911_v50  ;;  %v12876_v39 = vsub.f32 %v16782_v28, %v16783_v29  ;;  %3052 = vmatprep.mubr.f32.mxu1 %v16785_v19  ;;  %v16788_v50 = vand.u32 4294901760, %v16787_v38  ;;  %v16793_v28 = vld [vmem:[#allocation51_spill] sm:$0xff]  ;;  %v16795_v19 = vand.u32 4294901760, %v11936_v56 }
  0xda   :  { %16780 = vst [vmem:[#allocation219_spill] sm:$0xff] %v12866_v15  ;;  %v655_v32 = vand.u32 4294901760, %v654_v60  ;;  %v660_v35 = vsub.f32 %v12849_v14, %v16786_v26  ;;  %v12891_v11 = vsub.f32 %v16790_v23, %v16791_v36  ;;  %9733 = vmatprep.subr.bf16.mxu1 %v16793_v28  ;;  %9163 = vmatpush1.bf16.msra.mxu0 %v12866_v15  ;;  %v16794_v60 = vand.u32 4294901760, %v12856_v20 }
  0xdb   :  { %16784 = vst [vmem:[#allocation108_spill] sm:$0xff] %v12876_v39  ;;  %v12886_v2 = vsub.f32 %v16787_v38, %v16788_v50  ;;  %v649_v29 = vand.u32 4294901760, %v648_v3  ;;  %v15916_v26 = vand.u32 4294901760, %v12876_v39  ;;  %v12902_v38 = vsub.f32 %v11936_v56, %v16795_v19  ;;  %v16803_v19 = vld [vmem:[#allocation124_spill] sm:$0xff] }
  0xdc   :  { %16792 = vst [vmem:[#allocation115_spill] sm:$0xff] %v12891_v11  ;;  %v666_v34 = vsub.f32 %v12856_v20, %v16794_v60  ;;  %v12904_v50 = vpack.c.bf16 %v655_v32, %v643_v31  ;;  %v661_v36 = vand.u32 4294901760, %v660_v35  ;;  %v15919_v28 = vand.u32 4294901760, %v12891_v11  ;;  %v16798_v60 = vld [vmem:[#allocation55_spill] sm:$0xff] }
  0xdd   :  { %16789 = vst [vmem:[#allocation112_spill] sm:$0xff] %v12886_v2  ;;  %16796 = vst [vmem:[#allocation220_spill] sm:$0xff] %v12902_v38  ;;  %v15918_v23 = vand.u32 4294901760, %v12886_v2  ;;  %v678_v3 = vsub.f32 %v12876_v39, %v15916_v26  ;;  %9735 = vmatpush3.bf16.msra.mxu1 %v16798_v60  ;;  %v16800_v40 = vand.u32 4294901760, %v16799_v57  ;;  %v16804_v35 = vand.u32 4294901760, %v16803_v19  ;;  %v16810_v60 = vld [vmem:[#allocation60_spill] sm:$0xff] }
  0xde   :  { %16797 = vst [vmem:[#allocation221_spill] sm:$0xff] %v12904_v50  ;;  %v667_v15 = vand.u32 4294901760, %v666_v34  ;;  %9165 = vmatprep.subr.bf16.mxu0 %v12904_v50  ;;  %v12919_v31 = vpack.c.bf16 %v661_v36, %v649_v29  ;;  %v684_v32 = vsub.f32 %v12891_v11, %v15919_v28  ;;  %v16807_v36 = vld [vmem:[#allocation125_spill] sm:$0xff]  ;;  %9737 = vmatprep.subr.bf16.mxu1 %v16810_v60  ;;  %v16816_v60 = vld [vmem:[#allocation63_spill] sm:$0xff] }
  0xdf   :  { %v12916_v56 = vsub.f32 %v16799_v57, %v16800_v40  ;;  %v672_v34 = vsub.f32 %v12886_v2, %v15918_v23  ;;  %v12930_v26 = vsub.f32 %v16803_v19, %v16804_v35  ;;  %v679_v42 = vand.u32 4294901760, %v678_v3  ;;  %v16811_v3 = vld [vmem:[#allocation130_spill] sm:$0xff] }
  0xe0   :  { %16802 = vst [vmem:[#allocation222_spill] sm:$0xff] %v12919_v31  ;;  %v16806_v40 = vand.u32 4294901760, %v12902_v38  ;;  %v16808_v50 = vand.u32 4294901760, %v16807_v36  ;;  %9167 = vmatpush1.bf16.msra.mxu0 %v12919_v31  ;;  %v685_v11 = vand.u32 4294901760, %v684_v32  ;;  %v16812_v35 = vand.u32 4294901760, %v16811_v3 }
  0xe1   :  { %16801 = vst [vmem:[#allocation122_spill] sm:$0xff] %v12916_v56  ;;  %16805 = vst [vmem:[#allocation124_spill] sm:$0xff] %v12930_v26  ;;  %v673_v28 = vand.u32 4294901760, %v672_v34  ;;  %v15927_v19 = vand.u32 4294901760, %v12930_v26  ;;  %9739 = vmatpush3.bf16.msra.mxu1 %v16816_v60 }
  0xe2   :  { %v690_v57 = vsub.f32 %v12902_v38, %v16806_v40  ;;  %v12939_v23 = vsub.f32 %v16807_v36, %v16808_v50  ;;  %v12947_v2 = vsub.f32 %v16811_v3, %v16812_v35  ;;  %v12949_v40 = vpack.c.bf16 %v679_v42, %v667_v15  ;;  %v16818_v35 = vld [vmem:[#allocation131_spill] sm:$0xff]  ;;  %v16825_v3 = vld [vmem:[#allocation138_spill] sm:$0xff] }
  0xe3   :  { %v16815_v38 = vand.u32 4294901760, %v12916_v56  ;;  %v12956_v34 = vpack.c.bf16 %v685_v11, %v673_v28  ;;  %v696_v32 = vsub.f32 %v12930_v26, %v15927_v19  ;;  %v16819_v42 = vand.u32 4294901760, %v16818_v35  ;;  %v16822_v28 = vld [vmem:[#allocation135_spill] sm:$0xff] }
  0xe4   :  { %16809 = vst [vmem:[#allocation125_spill] sm:$0xff] %v12939_v23  ;;  %16813 = vst [vmem:[#allocation130_spill] sm:$0xff] %v12947_v2  ;;  %v691_v29 = vand.u32 4294901760, %v690_v57  ;;  %v15931_v36 = vand.u32 4294901760, %v12939_v23  ;;  %v16821_v57 = vld [vmem:[#allocation68_spill] sm:$0xff]  ;;  %9169 = vmatprep.subr.bf16.mxu0 %v12949_v40  ;;  %v16823_v31 = vand.u32 4294901760, %v16822_v28 }
  0xe5   :  { %16814 = vst [vmem:[#allocation223_spill] sm:$0xff] %v12949_v40  ;;  %v702_v50 = vsub.f32 %v12916_v56, %v16815_v38  ;;  %16817 = vst [vmem:[#allocation224_spill] sm:$0xff] %v12956_v34  ;;  %v12965_v15 = vsub.f32 %v16818_v35, %v16819_v42  ;;  %9741 = vmatprep.subr.bf16.mxu1 %v16821_v57  ;;  %v16826_v60 = vand.u32 4294901760, %v16825_v3  ;;  %9171 = vmatpush1.bf16.msra.mxu0 %v12956_v34 }
  0xe6   :  { %v708_v11 = vsub.f32 %v12939_v23, %v15931_v36  ;;  %v12975_v19 = vsub.f32 %v16822_v28, %v16823_v31  ;;  %v697_v35 = vand.u32 4294901760, %v696_v32  ;;  %v16828_v42 = vand.u32 4294901760, %v12947_v2  ;;  %v16830_v23 = vld [vmem:[#allocation72_spill] sm:$0xff] }
  0xe7   :  { %16820 = vst [vmem:[#allocation131_spill] sm:$0xff] %v12965_v15  ;;  %v703_v38 = vand.u32 4294901760, %v702_v50  ;;  %v12980_v26 = vsub.f32 %v16825_v3, %v16826_v60  ;;  %v15935_v40 = vand.u32 4294901760, %v12965_v15  ;;  %9743 = vmatpush3.bf16.msra.mxu1 %v16830_v23  ;;  %v16831_v3 = vld [vmem:[#allocation79_spill] sm:$0xff] }
  0xe8   :  { %16824 = vst [vmem:[#allocation135_spill] sm:$0xff] %v12975_v19  ;;  %v714_v50 = vsub.f32 %v12947_v2, %v16828_v42  ;;  %v709_v57 = vand.u32 4294901760, %v708_v11  ;;  %v15937_v31 = vand.u32 4294901760, %v12975_v19  ;;  %9745 = vmatprep.subr.bf16.mxu1 %v16831_v3  ;;  %v16837_v3 = vld [vmem:[#allocation148_spill] sm:$0xff]  ;;  %v16839_v23 = vld [vmem:[#allocation87_spill] sm:$0xff] }
  0xe9   :  { %16827 = vst [vmem:[#allocation138_spill] sm:$0xff] %v12980_v26  ;;  %v12987_v36 = vpack.c.bf16 %v703_v38, %v691_v29  ;;  %v15938_v28 = vand.u32 4294901760, %v12980_v26  ;;  %v726_v32 = vsub.f32 %v12965_v15, %v15935_v40  ;;  %v16833_v40 = vld [vmem:[#allocation82_spill] sm:$0xff] }
  0xea   :  { %v715_v60 = vand.u32 4294901760, %v714_v50  ;;  %v12997_v42 = vpack.c.bf16 %v709_v57, %v697_v35  ;;  %v720_v29 = vsub.f32 %v12975_v19, %v15937_v31  ;;  %v16836_v35 = vld [vmem:[#allocation147_spill] sm:$0xff] }
  0xeb   :  { %16829 = vst [vmem:[#allocation225_spill] sm:$0xff] %v12987_v36  ;;  %9173 = vmatprep.subr.bf16.mxu0 %v12987_v36  ;;  %v732_v38 = vsub.f32 %v12980_v26, %v15938_v28  ;;  %v727_v11 = vand.u32 4294901760, %v726_v32  ;;  %9747 = vmatpush3.bf16.msra.mxu1 %v16833_v40  ;;  %v13009_v36 = vpack.c.bf16 %v12415_v62, %v12407_v24 }
  0xec   :  { %16832 = vst [vmem:[#allocation226_spill] sm:$0xff] %v12997_v42  ;;  %9175 = vmatpush1.bf16.msra.mxu0 %v12997_v42  ;;  %v721_v50 = vand.u32 4294901760, %v720_v29  ;;  %v13015_v31 = vpack.c.bf16 %v16837_v3, %v16836_v35  ;;  %9749 = vmatprep.subr.bf16.mxu1 %v16839_v23  ;;  %v13020_v32 = vpack.c.bf16 %v12444_v10, %v12439_v16  ;;  %v16846_v42 = vld [vmem:[#allocation150_spill] sm:$0xff] }
  0xed   :  { %v733_v34 = vand.u32 4294901760, %v732_v38  ;;  %16834 = vst [vmem:[#allocation227_spill] sm:$0xff] %v13009_v36  ;;  %v13011_v57 = vpack.c.bf16 %v727_v11, %v715_v60  ;;  %v13024_v29 = vpack.c.bf16 %v12458_v52, %v12453_v7  ;;  %v13030_v60 = vpack.c.bf16 %v12502_v48, %v12486_v4  ;;  %v16847_v52 = vld [vmem:[#allocation151_spill] sm:$0xff]  ;;  %v16852_v4 = vld [vmem:[#allocation90_spill] sm:$0xff] }
  0xee   :  { %16838 = vst [vmem:[#allocation147_spill] sm:$0xff] %v13015_v31  ;;  %16840 = vst [vmem:[#allocation148_spill] sm:$0xff] %v13020_v32  ;;  %v13035_v11 = vpack.c.bf16 %v12513_v12, %v12509_v1  ;;  %v13039_v28 = vpack.c.bf16 %v12545_v25, %v12541_v21  ;;  %v16850_v7 = vld [vmem:[#allocation11_spill] sm:$0xff]  ;;  %v16854_v25 = vld [vmem:[#allocation93_spill] sm:$0xff]  ;;  %v16856_v21 = vand.u32 4294901760, %v11778_v59  ;;  %v13065_v1 = vpack.c.bf16 %v12601_v22, %v12593_v27 }
  0xef   :  { %16835 = vst [vmem:[#allocation228_spill] sm:$0xff] %v13011_v57  ;;  %16841 = vst [vmem:[#allocation229_spill] sm:$0xff] %v13024_v29  ;;  %v13026_v38 = vpack.c.bf16 %v733_v34, %v721_v50  ;;  %9177 = vmatprep.subr.bf16.mxu0 %v13011_v57  ;;  %v13044_v34 = vpack.c.bf16 %v16847_v52, %v16846_v42  ;;  %v16849_v50 = vld [vmem:[#allocation159_spill] sm:$0xff]  ;;  %9751 = vmatpush3.bf16.msra.mxu1 %v16852_v4  ;;  %v16863_v59 = vld [vmem:[#allocation12_spill] sm:$0xff] }
  0xf0   :  { %16843 = vst [vmem:[#allocation231_spill] sm:$0xff] %v13030_v60  ;;  %16844 = vst [vmem:[#allocation232_spill] sm:$0xff] %v13035_v11  ;;  %v13048_v48 = vpack.c.bf16 %v16850_v7, %v16849_v50  ;;  %v13053_v57 = vpack.c.bf16 %v12563_v9, %v12557_v33  ;;  %9753 = vmatprep.subr.bf16.mxu1 %v16854_v25  ;;  %v13069_v10 = vpack.c.bf16 %v12611_v45, %v12607_v54 }
  0xf1   :  { %16842 = vst [vmem:[#allocation230_spill] sm:$0xff] %v13026_v38  ;;  %16845 = vst [vmem:[#allocation233_spill] sm:$0xff] %v13039_v28  ;;  %9179 = vmatpush1.bf16.msra.mxu0 %v13026_v38  ;;  %v16855_v38 = vand.u32 4294901760, %v11773_v53  ;;  %v13073_v9 = vpack.c.bf16 %v12649_v63, %v12639_v43  ;;  %v16862_v53 = vld [vmem:[#allocation100_spill] sm:$0xff]  ;;  %v13086_v22 = vpack.c.bf16 %v12697_v51, %v12686_v17  ;;  %v16871_v43 = vld [vmem:[#allocation102_spill] sm:$0xff] }
  0xf2   :  { %16848 = vst [vmem:[#allocation150_spill] sm:$0xff] %v13044_v34  ;;  %16851 = vst [vmem:[#allocation151_spill] sm:$0xff] %v13048_v48  ;;  %9181 = vmatprep.subr.bf16.mxu0 %v13015_v31  ;;  %v13077_v31 = vpack.c.bf16 %v12660_v37, %v12656_v47  ;;  %v13090_v45 = vpack.c.bf16 %v12708_v8, %v12704_v13  ;;  %v16868_v63 = vld [vmem:[#allocation96_spill] sm:$0xff]  ;;  %v16869_v37 = vld [vmem:[#allocation101_spill] sm:$0xff]  ;;  %v16872_v54 = vand.u32 4294901760, %v16871_v43 }
  0xf3   :  { %16853 = vst [vmem:[#allocation159_spill] sm:$0xff] %v13053_v57  ;;  %v13061_v12 = vpack.c.bf16 %v16856_v21, %v16855_v38  ;;  %16858 = vst [vmem:[#allocation234_spill] sm:$0xff] %v13065_v1  ;;  %v16864_v21 = vld [vmem:[#allocation13_spill] sm:$0xff]  ;;  %9755 = vmatpush3.bf16.msra.mxu1 %v16868_v63  ;;  %v16870_v47 = vand.u32 4294901760, %v16869_v37  ;;  %v13102_v33 = vpack.c.bf16 %v12745_v49, %v12734_v44  ;;  %v16876_v8 = vld [vmem:[#allocation14_spill] sm:$0xff] }
  0xf4   :  { %16859 = vst [vmem:[#allocation235_spill] sm:$0xff] %v13069_v10  ;;  %16860 = vst [vmem:[#allocation236_spill] sm:$0xff] %v13073_v9  ;;  %738 = vmatmul.mubr.f32.vlgmr.msra.gmra.mrb[0].mxu0 %v16862_v53  ;;  %v13082_v38 = vpack.c.bf16 %v16864_v21, %v16863_v59  ;;  %v13106_v51 = vpack.c.bf16 %v12756_v61, %v12752_v55  ;;  %v16879_v37 = vld [vmem:[#allocation107_spill] sm:$0xff]  ;;  %v13122_v49 = vpack.c.bf16 %v12793_v5, %v12782_v41  ;;  %v16896_v5 = vld [vmem:[#allocation125_spill] sm:$0xff] }
  0xf5   :  { %16857 = vst [vmem:[#allocation11_spill] sm:$0xff] %v13061_v12  ;;  %16861 = vst [vmem:[#allocation237_spill] sm:$0xff] %v13077_v31  ;;  %9183 = vmatpush1.bf16.msra.mxu0 %v13044_v34  ;;  %v13098_v27 = vpack.c.bf16 %v16872_v54, %v16870_v47  ;;  %v16877_v34 = vld [vmem:[#allocation16_spill] sm:$0xff]  ;;  %9757 = vmatprep.subr.bf16.mxu1 %v13061_v12  ;;  %v16880_v43 = vand.u32 4294901760, %v16879_v37  ;;  %v16881_v54 = vld [vmem:[#allocation111_spill] sm:$0xff]  ;;  %v13126_v61 = vpack.c.bf16 %v12804_v0, %v12800_v58 }
  0xf6   :  { %16865 = vst [vmem:[#allocation12_spill] sm:$0xff] %v13082_v38  ;;  %16866 = vst [vmem:[#allocation13_spill] sm:$0xff] %v13086_v22  ;;  %9185 = vmatprep.subr.bf16.mxu0 %v13048_v48  ;;  %v13111_v13 = vpack.c.bf16 %v16877_v34, %v16876_v8  ;;  %v16882_v47 = vand.u32 4294901760, %v16881_v54  ;;  %v13130_v48 = vpack.c.bf16 %v12828_v6, %v12810_v18  ;;  %744 = vmatprep.mubr.f32.mxu0 %v12318_v46  ;;  %v16890_v54 = vld [vmem:[#allocation112_spill] sm:$0xff]  ;;  %v16913_v44 = vld [vmem:[#allocation119_spill] sm:$0xff] }
  0xf7   :  { %16867 = vst [vmem:[#allocation238_spill] sm:$0xff] %v13090_v45  ;;  %16873 = vst [vmem:[#allocation101_spill] sm:$0xff] %v13098_v27  ;;  %v13134_v12 = vpack.c.bf16 %v12849_v14, %v12840_v30  ;;  %v13138_v37 = vpack.c.bf16 %v12876_v39, %v12856_v20  ;;  %v16893_v58 = vld [vmem:[#allocation220_spill] sm:$0xff]  ;;  %v13156_v39 = vpack.c.bf16 %v12965_v15, %v12947_v2  ;;  %v16899_v20 = vld [vmem:[#allocation17_spill] sm:$0xff] }
  0xf8   :  { %16874 = vst [vmem:[#allocation102_spill] sm:$0xff] %v13102_v33  ;;  %16875 = vst [vmem:[#allocation239_spill] sm:$0xff] %v13106_v51  ;;  %v13118_v17 = vpack.c.bf16 %v16882_v47, %v16880_v43  ;;  %v16889_v43 = vld [vmem:[#allocation105_spill] sm:$0xff]  ;;  %v16891_v47 = vld [vmem:[#allocation115_spill] sm:$0xff]  ;;  %v13148_v6 = vpack.c.bf16 %v12916_v56, %v16893_v58 }
  0xf9   :  { %16878 = vst [vmem:[#allocation14_spill] sm:$0xff] %v13111_v13  ;;  %16884 = vst [vmem:[#allocation107_spill] sm:$0xff] %v13122_v49  ;;  %3056 = vmatmul.mubr.f32.vlgmr.msra.gmra.mrb[12].mxu1 %v16889_v43  ;;  %v13144_v0 = vpack.c.bf16 %v16891_v47, %v16890_v54  ;;  %v16895_v18 = vld [vmem:[#allocation124_spill] sm:$0xff]  ;;  %9187 = vmatpush1.bf16.msra.mxu0 %v13082_v38  ;;  %v16900_v30 = vld [vmem:[#allocation18_spill] sm:$0xff] }
  0xfa   :  { %16883 = vst [vmem:[#allocation16_spill] sm:$0xff] %v13118_v17  ;;  %16885 = vst [vmem:[#allocation111_spill] sm:$0xff] %v13126_v61  ;;  %v13152_v14 = vpack.c.bf16 %v16896_v5, %v16895_v18  ;;  %v13161_v41 = vpack.c.bf16 %v16900_v30, %v16899_v20  ;;  %9759 = vmatpush3.bf16.msra.mxu1 %v13098_v27  ;;  %v16902_v47 = vld [vmem:[#allocation113_spill] sm:$0xff]  ;;  %v16904_v56 = vld [vmem:[#allocation114_spill] sm:$0xff]  ;;  %v13172_v5 = vpack.c.bf16 %v12980_v26, %v12975_v19 }
  0xfb   :  { %16886 = vst [vmem:[#allocation240_spill] sm:$0xff] %v13130_v48  ;;  %16887 = vst [vmem:[#allocation241_spill] sm:$0xff] %v13134_v12  ;;  %v16903_v54 = vand.u32 4294901760, %v16902_v47  ;;  %v16905_v58 = vand.u32 4294901760, %v16904_v56  ;;  %9189 = vmatprep.subr.bf16.mxu0 %v13111_v13  ;;  %v16908_v15 = vld [vmem:[#allocation21_spill] sm:$0xff]  ;;  %v16909_v38 = vld [vmem:[#allocation22_spill] sm:$0xff]  ;;  %9761 = vmatprep.subr.bf16.mxu1 %v13118_v17 }
  0xfc   :  { %16888 = vst [vmem:[#allocation242_spill] sm:$0xff] %v13138_v37  ;;  %16892 = vst [vmem:[#allocation105_spill] sm:$0xff] %v13144_v0  ;;  %v13177_v2 = vpack.c.bf16 %v16909_v38, %v16908_v15  ;;  %v16911_v18 = vld [vmem:[#allocation118_spill] sm:$0xff]  ;;  %v16914_v47 = vand.u32 4294901760, %v16913_v44  ;;  %v16917_v56 = vld [vmem:[#allocation173_spill] sm:$0xff] }
  0xfd   :  { %16894 = vst [vmem:[#allocation243_spill] sm:$0xff] %v13148_v6  ;;  %16897 = vst [vmem:[#allocation244_spill] sm:$0xff] %v13152_v14  ;;  %v13168_v55 = vpack.c.bf16 %v16905_v58, %v16903_v54  ;;  %v16912_v27 = vand.u32 4294901760, %v16911_v18  ;;  %v16916_v58 = vld [vmem:[#allocation174_spill] sm:$0xff]  ;;  %746 = vmatmul.mubr.f32.gmra.mrb[2].mxu0 %v16917_v56  ;;  %v16918_v54 = vld [vmem:[#allocation179_spill] sm:$0xff] }
  0xfe   :  { %16898 = vst [vmem:[#allocation245_spill] sm:$0xff] %v13156_v39  ;;  %16901 = vst [vmem:[#allocation17_spill] sm:$0xff] %v13161_v41  ;;  %3063 = vmatprep.mubr.f32.mxu1 %v16916_v58  ;;  %v16919_v26 = vld [vmem:[#allocation99_spill] sm:$0xff]  ;;  %9191 = vmatpush1.bf16.msra.mxu0 %v13161_v41  ;;  %v16920_v13 = vld [vmem:[#allocation121_spill] sm:$0xff] }
  0xff   :  { %16906 = vst [vmem:[#allocation18_spill] sm:$0xff] %v13168_v55  ;;  %16907 = vst [vmem:[#allocation113_spill] sm:$0xff] %v13172_v5  ;;  %v13184_v16 = vpack.c.bf16 %v16914_v47, %v16912_v27  ;;  %3067 = vmatmul.mubr.f32.gmra.mrb[14].mxu1 %v16918_v54  ;;  %946 = vmatprep.mubr.f32.mxu0 %v16919_v26  ;;  %v16921_v17 = vand.u32 4294901760, %v16920_v13  ;;  %v16922_v19 = vld [vmem:[#allocation123_spill] sm:$0xff]  ;;  %v16925_v27 = vld [vmem:[#allocation129_spill] sm:$0xff] }
 0x100   :  { %16910 = vst [vmem:[#allocation114_spill] sm:$0xff] %v13177_v2  ;;  %9763 = vmatpush3.bf16.msra.mxu1 %v13168_v55  ;;  %v16923_v18 = vand.u32 4294901760, %v16922_v19  ;;  %9193 = vmatprep.subr.bf16.mxu0 %v13177_v2  ;;  %v16926_v44 = vand.u32 4294901760, %v16925_v27  ;;  %v16927_v47 = vld [vmem:[#allocation133_spill] sm:$0xff]  ;;  %v16930_v26 = vld [vmem:[#allocation94_spill] sm:$0xff] }
 0x101   :  { %16915 = vst [vmem:[#allocation21_spill] sm:$0xff] %v13184_v16  ;;  %9765 = vmatprep.subr.bf16.mxu1 %v13184_v16  ;;  %v16928_v24 = vand.u32 4294901760, %v16927_v47  ;;  %3233 = vmatprep.mubr.f32.mxu1 %v16930_v26  ;;  %v16931_v13 = vld [vmem:[#allocation134_spill] sm:$0xff]  ;;  %v16936_v27 = vld [vmem:[#allocation141_spill] sm:$0xff] }
 0x102   :  { %v13196_v62 = vpack.c.bf16 %v16923_v18, %v16921_v17  ;;  %9195 = vmatpush1.bf16.msra.mxu0 %v13009_v36  ;;  %v16932_v19 = vand.u32 4294901760, %v16931_v13  ;;  %v16933_v17 = vld [vmem:[#allocation137_spill] sm:$0xff]  ;;  %v16937_v47 = vand.u32 4294901760, %v16936_v27 }
 0x103   :  { %v13204_v38 = vpack.c.bf16 %v16928_v24, %v16926_v44  ;;  %v16934_v18 = vand.u32 4294901760, %v16933_v17  ;;  %9197 = vmatprep.subr.bf16.mxu0 %v13020_v32  ;;  %v16938_v24 = vld [vmem:[#allocation142_spill] sm:$0xff]  ;;  %v16943_v36 = vld [vmem:[#allocation145_spill] sm:$0xff]  ;;  %v16998_v32 = vld [vmem:[#allocation24_spill] sm:$0xff] }
 0x104   :  { %16924 = vst [vmem:[#allocation118_spill] sm:$0xff] %v13196_v62  ;;  %9767 = vmatpush3.bf16.msra.mxu1 %v13196_v62  ;;  %v16939_v44 = vand.u32 4294901760, %v16938_v24  ;;  %v16941_v62 = vld [vmem:[#allocation144_spill] sm:$0xff]  ;;  %v16944_v17 = vand.u32 4294901760, %v16943_v36  ;;  %v17005_v41 = vld [vmem:[#allocation29_spill] sm:$0xff] }
 0x105   :  { %16929 = vst [vmem:[#allocation119_spill] sm:$0xff] %v13204_v38  ;;  %v13213_v55 = vpack.c.bf16 %v16934_v18, %v16932_v19  ;;  %9769 = vmatprep.subr.bf16.mxu1 %v13204_v38  ;;  %v16942_v13 = vand.u32 4294901760, %v16941_v62  ;;  %v16946_v18 = vld [vmem:[#allocation153_spill] sm:$0xff]  ;;  %v16948_v38 = vld [vmem:[#allocation154_spill] sm:$0xff] }
 0x106   :  { %v13221_v16 = vpack.c.bf16 %v16939_v44, %v16937_v47  ;;  %9199 = vmatpush1.bf16.msra.mxu0 %v13024_v29  ;;  %v16947_v27 = vand.u32 4294901760, %v16946_v18  ;;  %v16949_v24 = vand.u32 4294901760, %v16948_v38  ;;  %v16951_v44 = vld [vmem:[#allocation156_spill] sm:$0xff] }
 0x107   :  { %16935 = vst [vmem:[#allocation174_spill] sm:$0xff] %v13213_v55  ;;  %v13229_v19 = vpack.c.bf16 %v16944_v17, %v16942_v13  ;;  %9201 = vmatprep.subr.bf16.mxu0 %v13030_v60  ;;  %v16952_v62 = vand.u32 4294901760, %v16951_v44  ;;  %v16956_v17 = vld [vmem:[#allocation71_spill] sm:$0xff]  ;;  %v16996_v60 = vld [vmem:[#allocation170_spill] sm:$0xff]  ;;  %v16997_v29 = vld [vmem:[#allocation176_spill] sm:$0xff] }
 0x108   :  { %16940 = vst [vmem:[#allocation179_spill] sm:$0xff] %v13221_v16  ;;  %9771 = vmatpush3.bf16.msra.mxu1 %v13213_v55  ;;  %v13237_v47 = vpack.c.bf16 %v16949_v24, %v16947_v27  ;;  %v16953_v55 = vld [vmem:[#allocation158_spill] sm:$0xff]  ;;  %v16957_v18 = vand.u32 4294901760, %v16956_v17  ;;  %v16961_v24 = vld [vmem:[#allocation75_spill] sm:$0xff] }
 0x109   :  { %16945 = vst [vmem:[#allocation99_spill] sm:$0xff] %v13229_v19  ;;  %9773 = vmatprep.subr.bf16.mxu1 %v13221_v16  ;;  %v16954_v36 = vand.u32 4294901760, %v16953_v55  ;;  %v16958_v16 = vld [vmem:[#allocation74_spill] sm:$0xff]  ;;  %v16962_v44 = vand.u32 4294901760, %v16961_v24 }
 0x10a   :  { %16950 = vst [vmem:[#allocation121_spill] sm:$0xff] %v13237_v47  ;;  %9203 = vmatpush1.bf16.msra.mxu0 %v13035_v11  ;;  %v16959_v38 = vand.u32 4294901760, %v16958_v16 }
 0x10b   :  { %v13245_v13 = vpack.c.bf16 %v16954_v36, %v16952_v62  ;;  %9205 = vmatprep.subr.bf16.mxu0 %v13039_v28  ;;  %v16966_v36 = vld [vmem:[#allocation168_spill] sm:$0xff]  ;;  %v13350_v28 = vld [vmem:[#allocation5 + $0x3a0] sm:$0xff] }
 0x10c   :  { %9775 = vmatpush3.bf16.msra.mxu1 %v13229_v19  ;;  %v13253_v27 = vpack.c.bf16 %v16959_v38, %v16957_v18  ;;  %v16963_v19 = vld [vmem:[#allocation163_spill] sm:$0xff]  ;;  %v16967_v17 = vand.u32 4294901760, %v16966_v36  ;;  %v16979_v36 = vld [vmem:[#allocation46_spill] sm:$0xff] }
 0x10d   :  { %16955 = vst [vmem:[#allocation123_spill] sm:$0xff] %v13245_v13  ;;  %9777 = vmatprep.subr.bf16.mxu1 %v13237_v47  ;;  %v16964_v55 = vand.u32 4294901760, %v16963_v19  ;;  %v16968_v47 = vld [vmem:[#allocation171_spill] sm:$0xff] }
 0x10e   :  { %16960 = vst [vmem:[#allocation129_spill] sm:$0xff] %v13253_v27  ;;  %9207 = vmatpush1.bf16.msra.mxu0 %v13053_v57  ;;  %v16969_v16 = vand.u32 4294901760, %v16968_v47  ;;  %v16971_v38 = vld [vmem:[#allocation175_spill] sm:$0xff]  ;;  %v16976_v47 = vld [vmem:[#allocation34_spill] sm:$0xff] }
 0x10f   :  { %v13261_v62 = vpack.c.bf16 %v16964_v55, %v16962_v44  ;;  %9209 = vmatprep.subr.bf16.mxu0 %v13065_v1  ;;  %v16972_v24 = vand.u32 4294901760, %v16971_v38  ;;  %v16977_v55 = vld [vmem:[#allocation37_spill] sm:$0xff]  ;;  %v16982_v38 = vld [vmem:[#allocation60_spill] sm:$0xff]  ;;  %v16999_v57 = vld [vmem:[#allocation26_spill] sm:$0xff] }
 0x110   :  { %9779 = vmatpush3.bf16.msra.mxu1 %v13245_v13  ;;  %v13269_v18 = vpack.c.bf16 %v16969_v16, %v16967_v17  ;;  %v16973_v13 = vld [vmem:[#allocation177_spill] sm:$0xff]  ;;  %v16980_v17 = vld [vmem:[#allocation51_spill] sm:$0xff] }
 0x111   :  { %16965 = vst [vmem:[#allocation133_spill] sm:$0xff] %v13261_v62  ;;  %9781 = vmatprep.subr.bf16.mxu1 %v13253_v27  ;;  %v16974_v19 = vand.u32 4294901760, %v16973_v13  ;;  %v16978_v13 = vld [vmem:[#allocation42_spill] sm:$0xff]  ;;  %v16981_v16 = vld [vmem:[#allocation55_spill] sm:$0xff] }
 0x112   :  { %16970 = vst [vmem:[#allocation94_spill] sm:$0xff] %v13269_v18  ;;  %9211 = vmatpush1.bf16.msra.mxu0 %v13069_v10  ;;  %v144_v27 = vld [vmem:[#allocation5 + $0x310] sm:$0xff] }
 0x113   :  { %v13277_v44 = vpack.c.bf16 %v16974_v19, %v16972_v24  ;;  %9213 = vmatprep.subr.bf16.mxu0 %v13073_v9  ;;  %v16983_v24 = vld [vmem:[#allocation63_spill] sm:$0xff]  ;;  %v16984_v19 = vld [vmem:[#allocation68_spill] sm:$0xff] }
 0x114   :  { %9783 = vmatpush3.bf16.msra.mxu1 %v13261_v62  ;;  %v16986_v62 = vld [vmem:[#allocation79_spill] sm:$0xff]  ;;  %v16994_v9 = vld [vmem:[#allocation20_spill] sm:$0xff] }
 0x115   :  { %16975 = vst [vmem:[#allocation134_spill] sm:$0xff] %v13277_v44  ;;  %9785 = vmatprep.subr.bf16.mxu1 %v13269_v18  ;;  %v16985_v18 = vld [vmem:[#allocation72_spill] sm:$0xff] }
 0x116   :  { %9215 = vmatpush1.bf16.msra.mxu0 %v13077_v31  ;;  %v16993_v31 = vld [vmem:[#allocation19_spill] sm:$0xff] }
 0x117   :  { %9217 = vmatprep.subr.bf16.mxu0 %v13086_v22  ;;  %v13332_v22 = vld [vmem:[#allocation5 + $0x388] sm:$0xff] }
 0x118   :  { %9787 = vmatpush3.bf16.msra.mxu1 %v13277_v44  ;;  %v42_v44 = vld [vmem:[#allocation2 + $0x10] sm:$0xff] }
 0x119   :  { %9789 = vmatprep.subr.bf16.mxu1 %v16976_v47  ;;  %v13436_v47 = vld [vmem:[#allocation5 + $0x478] sm:$0xff] }
 0x11a   :  { %9219 = vmatpush1.bf16.msra.mxu0 %v13090_v45  ;;  %v13330_v45 = vld [vmem:[#allocation5 + $0x370] sm:$0xff] }
 0x11b   :  { %3235 = vmatmul.mubr.f32.vlgmr.msra.gmra.mrb[16].mxu1 %v16862_v53  ;;  %9221 = vmatprep.subr.bf16.mxu0 %v13102_v33  ;;  %v16038_v1 = vand.u32 4294901760, %v13330_v45 }
 0x11c   :  { %9791 = vmatpush3.bf16.msra.mxu1 %v16977_v55  ;;  %3240 = vmatprep.mubr.f32.mxu1 %v12318_v46  ;;  %v17013_v55 = vld [vmem:[#allocation41_spill] sm:$0xff] }
 0x11d   :  { %9793 = vmatprep.subr.bf16.mxu1 %v16978_v13 }
 0x11e   :  { %9223 = vmatpush1.bf16.msra.mxu0 %v13106_v51 }
 0x11f   :  { %3242 = vmatmul.mubr.f32.gmra.mrb[18].mxu1 %v16917_v56  ;;  %9225 = vmatprep.subr.bf16.mxu0 %v13122_v49  ;;  %v13317_v49 = vld [vmem:[#allocation5 + $0x358] sm:$0xff] }
 0x120   :  { %9795 = vmatpush3.bf16.msra.mxu1 %v16979_v36  ;;  %3344 = vmatprep.mubr.f32.mxu1 %v16930_v26  ;;  %v16033_v33 = vand.u32 4294901760, %v13317_v49  ;;  %v13413_v36 = vld [vmem:[#allocation5 + $0x448] sm:$0xff] }
 0x121   :  { %9797 = vmatprep.subr.bf16.mxu1 %v16980_v17  ;;  %v13411_v17 = vld [vmem:[#allocation5 + $0x430] sm:$0xff] }
 0x122   :  { %9227 = vmatpush1.bf16.msra.mxu0 %v13126_v61  ;;  %v13309_v61 = vand.u32 4294901760, %v42_v44 }
 0x123   :  { %9229 = vmatprep.subr.bf16.mxu0 %v13130_v48  ;;  %v147_v48 = vld [vmem:[#allocation5 + $0x328] sm:$0xff] }
 0x124   :  { %9799 = vmatpush3.bf16.msra.mxu1 %v16981_v16  ;;  %16987 = vst [vmem:[#allocation137_spill] sm:$0xff] %v13309_v61 }
 0x125   :  { %9801 = vmatprep.subr.bf16.mxu1 %v16982_v38 }
 0x126   :  { %9231 = vmatpush1.bf16.msra.mxu0 %v13134_v12  ;;  %v13315_v12 = vld [vmem:[#allocation5 + $0x340] sm:$0xff] }
 0x127   :  { %9233 = vmatprep.subr.bf16.mxu0 %v13138_v37  ;;  %v3359_v37 = vand.u32 4294901760, %v144_v27  ;;  %v16034_v51 = vand.u32 4294901760, %v13315_v12  ;;  %v17014_v38 = vand.u32 4294901760, %v13315_v12 }
 0x128   :  { %9803 = vmatpush3.bf16.msra.mxu1 %v16983_v24  ;;  %v17010_v24 = vld [vmem:[#allocation38_spill] sm:$0xff] }
 0x129   :  { %9805 = vmatprep.subr.bf16.mxu1 %v16984_v19  ;;  %v13346_v10 = vpack.c.bf16 %v16033_v33, %v16034_v51  ;;  %v13361_v33 = vsub.f32 %v144_v27, %v3359_v37  ;;  %v17004_v27 = vld [vmem:[#allocation28_spill] sm:$0xff]  ;;  %v13426_v16 = vsub.f32 %v13315_v12, %v17014_v38 }
 0x12a   :  { %9235 = vmatpush1.bf16.msra.mxu0 %v13144_v0  ;;  %v3362_v0 = vand.u32 4294901760, %v147_v48  ;;  %v45_v19 = vld [vmem:[#allocation2 + $0x28] sm:$0xff] }
 0x12b   :  { %9237 = vmatprep.subr.bf16.mxu0 %v13148_v6  ;;  %v13320_v6 = vsub.f32 %v42_v44, %v13309_v61  ;;  %16995 = vst [vmem:[#allocation145_spill] sm:$0xff] %v13346_v10  ;;  %v13415_v13 = vand.u32 4294901760, %v45_v19 }
 0x12c   :  { %9807 = vmatpush3.bf16.msra.mxu1 %v16985_v18  ;;  %v13363_v51 = vsub.f32 %v147_v48, %v3362_v0  ;;  %v17003_v48 = vld [vmem:[#allocation103_spill] sm:$0xff]  ;;  %v17009_v18 = vld [vmem:[#allocation33_spill] sm:$0xff] }
 0x12d   :  { %9809 = vmatprep.subr.bf16.mxu1 %v16986_v62  ;;  %16988 = vst [vmem:[#allocation141_spill] sm:$0xff] %v13320_v6  ;;  %v13335_v44 = vand.u32 4294901760, %v13320_v6  ;;  %17012 = vst [vmem:[#allocation74_spill] sm:$0xff] %v13415_v13  ;;  %v13445_v38 = vsub.f32 %v45_v19, %v13415_v13  ;;  %v17026_v19 = vld [vmem:[#allocation56_spill] sm:$0xff] }
 0x12e   :  { %9239 = vmatpush1.bf16.msra.mxu0 %v13152_v14  ;;  %v16989_v14 = vld [vmem:[#allocation15_spill] sm:$0xff] }
 0x12f   :  { %9241 = vmatprep.subr.bf16.mxu0 %v13156_v39  ;;  %v13326_v39 = vpack.c.bf16 %v3362_v0, %v3359_v37  ;;  %16991 = vst [vmem:[#allocation144_spill] sm:$0xff] %v13335_v44  ;;  %v1636_v11 = vsub.f32 %v13320_v6, %v13335_v44  ;;  %v13377_v37 = vld [vmem:[#allocation5 + $0x3e8] sm:$0xff]  ;;  %17020 = vst [vmem:[#allocation163_spill] sm:$0xff] %v13445_v38 }
 0x130   :  { %9811 = vmatpush3.bf16.msra.mxu1 %v16833_v40  ;;  %v13398_v40 = vld [vmem:[#allocation5 + $0x418] sm:$0xff] }
 0x131   :  { %9813 = vmatprep.subr.bf16.mxu1 %v16839_v23  ;;  %16990 = vst [vmem:[#allocation142_spill] sm:$0xff] %v13326_v39  ;;  %v13380_v0 = vand.u32 4294901760, %v1636_v11  ;;  %v13396_v23 = vld [vmem:[#allocation5 + $0x400] sm:$0xff] }
 0x132   :  { %9243 = vmatpush1.bf16.msra.mxu0 %v13172_v5  ;;  %v16992_v5 = vld [vmem:[#allocation104_spill] sm:$0xff] }
 0x133   :  { %9245 = vmatprep.subr.bf16.mxu0 %v16989_v14  ;;  %17002 = vst [vmem:[#allocation154_spill] sm:$0xff] %v13380_v0 }
 0x134   :  { %9815 = vmatpush3.bf16.msra.mxu1 %v16852_v4  ;;  %v3386_v4 = vand.u32 4294901760, %v13377_v37 }
 0x135   :  { %9817 = vmatprep.subr.bf16.mxu1 %v16854_v25  ;;  %949 = vmatmul.mubr.f32.vlgmr.msra.gmra.mrb[0].mxu0 %v16992_v5  ;;  %v13352_v5 = vld [vmem:[#allocation5 + $0x3b8] sm:$0xff] }
 0x136   :  { %9247 = vmatpush1.bf16.msra.mxu0 %v16993_v31  ;;  %956 = vmatprep.mubr.f32.mxu0 %v16996_v60  ;;  %v17000_v60 = vand.u32 4294901760, %v13332_v22  ;;  %v17006_v25 = vand.u32 4294901760, %v13352_v5 }
 0x137   :  { %9249 = vmatprep.subr.bf16.mxu0 %v16994_v9 }
 0x138   :  { %9819 = vmatpush3.bf16.msra.mxu1 %v16868_v63  ;;  %v13371_v2 = vpack.c.bf16 %v17000_v60, %v16038_v1  ;;  %v13375_v63 = vld [vmem:[#allocation5 + $0x3d0] sm:$0xff]  ;;  %v3462_v60 = vand.u32 4294901760, %v13361_v33  ;;  %v3469_v1 = vand.u32 4294901760, %v13363_v51 }
 0x139   :  { %9821 = vmatprep.subr.bf16.mxu1 %v13326_v39  ;;  %959 = vmatmul.mubr.f32.gmra.mrb[2].mxu0 %v16997_v29  ;;  %v3377_v29 = vand.u32 4294901760, %v13350_v28 }
 0x13a   :  { %9251 = vmatpush1.bf16.msra.mxu0 %v16998_v32  ;;  %17001 = vst [vmem:[#allocation153_spill] sm:$0xff] %v13371_v2  ;;  %1096 = vmatprep.mubr.f32.mxu0 %v17003_v48  ;;  %v3383_v48 = vand.u32 4294901760, %v13375_v63  ;;  %v13401_v62 = vpack.c.bf16 %v3469_v1, %v3462_v60  ;;  %v17022_v32 = vand.u32 4294901760, %v13411_v17 }
 0x13b   :  { %3346 = vmatmul.mubr.f32.vlgmr.msra.gmra.mrb[20].mxu1 %v16862_v53  ;;  %9253 = vmatprep.subr.bf16.mxu0 %v16999_v57  ;;  %v13392_v11 = vpack.c.bf16 %v17006_v25, %v3377_v29 }
 0x13c   :  { %9823 = vmatpush3.bf16.msra.mxu1 %v13326_v39  ;;  %3351 = vmatprep.mubr.f32.mxu1 %v12318_v46  ;;  %17008 = vst [vmem:[#allocation158_spill] sm:$0xff] %v13401_v62  ;;  %v13407_v25 = vpack.c.bf16 %v3386_v4, %v3383_v48  ;;  %v3470_v46 = vsub.f32 %v13363_v51, %v3469_v1  ;;  %v17031_v1 = vand.u32 4294901760, %v13436_v47  ;;  %v17034_v62 = vand.u32 4294901760, %v13352_v5 }
 0x13d   :  { %9825 = vmatprep.subr.bf16.mxu1 %v13346_v10  ;;  %17007 = vst [vmem:[#allocation156_spill] sm:$0xff] %v13392_v11 }
 0x13e   :  { %9255 = vmatpush1.bf16.msra.mxu0 %v17004_v27  ;;  %17011 = vst [vmem:[#allocation71_spill] sm:$0xff] %v13407_v25  ;;  %v3471_v9 = vand.u32 4294901760, %v3470_v46  ;;  %v17048_v46 = vld [vmem:[#allocation83_spill] sm:$0xff] }
 0x13f   :  { %3353 = vmatmul.mubr.f32.gmra.mrb[22].mxu1 %v16917_v56  ;;  %9257 = vmatprep.subr.bf16.mxu0 %v17005_v41  ;;  %v17016_v41 = vand.u32 4294901760, %v13396_v23 }
 0x140   :  { %9827 = vmatpush3.bf16.msra.mxu1 %v13346_v10  ;;  %8664 = vmatprep.mubr.f32.mxu1 %v13380_v0  ;;  %v17019_v0 = vand.u32 4294901760, %v13317_v49 }
 0x141   :  { %9829 = vmatprep.subr.bf16.mxu1 %v13371_v2 }
 0x142   :  { %9259 = vmatpush1.bf16.msra.mxu0 %v17009_v18  ;;  %v17015_v18 = vld [vmem:[#allocation47_spill] sm:$0xff]  ;;  %v13441_v57 = vsub.f32 %v13317_v49, %v17019_v0  ;;  %v17025_v0 = vand.u32 4294901760, %v13330_v45  ;;  %v13473_v49 = vand.u32 4294901760, %v13445_v38 }
 0x143   :  { %9261 = vmatprep.subr.bf16.mxu0 %v17010_v24  ;;  %v13421_v24 = vld [vmem:[#allocation5 + $0x460] sm:$0xff] }
 0x144   :  { %9831 = vmatpush3.bf16.msra.mxu1 %v13371_v2  ;;  %v13460_v12 = vsub.f32 %v13330_v45, %v17025_v0  ;;  %17028 = vst [vmem:[#allocation171_spill] sm:$0xff] %v13473_v49  ;;  %v13476_v45 = vsub.f32 %v13350_v28, %v3377_v29  ;;  %v17029_v0 = vld [vmem:[#allocation57_spill] sm:$0xff]  ;;  %v13493_v28 = vsub.f32 %v13352_v5, %v17034_v62  ;;  %v17035_v29 = vld [vmem:[#allocation64_spill] sm:$0xff] }
 0x145   :  { %9833 = vmatprep.subr.bf16.mxu1 %v13392_v11  ;;  %v13505_v62 = vsub.f32 %v13375_v63, %v3383_v48  ;;  %v17037_v5 = vld [vmem:[#allocation65_spill] sm:$0xff] }
 0x146   :  { %9263 = vmatpush1.bf16.msra.mxu0 %v17013_v55  ;;  %v17017_v55 = vand.u32 4294901760, %v13398_v40  ;;  %v17040_v63 = vand.u32 4294901760, %v13460_v12 }
 0x147   :  { %9265 = vmatprep.subr.bf16.mxu0 %v17015_v18  ;;  %v17021_v18 = vld [vmem:[#allocation49_spill] sm:$0xff] }
 0x148   :  { %9835 = vmatpush3.bf16.msra.mxu1 %v13392_v11  ;;  %v13434_v27 = vpack.c.bf16 %v17017_v55, %v17016_v41  ;;  %v17023_v41 = vand.u32 4294901760, %v13413_v36  ;;  %v3491_v48 = vsub.f32 %v13460_v12, %v17040_v63  ;;  %v17047_v63 = vand.u32 4294901760, %v13398_v40 }
 0x149   :  { %9837 = vmatprep.subr.bf16.mxu1 %v13407_v25 }
 0x14a   :  { %17018 = vst [vmem:[#allocation75_spill] sm:$0xff] %v13434_v27  ;;  %9267 = vmatpush1.bf16.msra.mxu0 %v17021_v18  ;;  %v13453_v55 = vpack.c.bf16 %v17023_v41, %v17022_v32  ;;  %v3463_v18 = vsub.f32 %v13361_v33, %v3462_v60  ;;  %v17027_v41 = vand.u32 4294901760, %v13332_v22  ;;  %v17030_v60 = vand.u32 4294901760, %v13421_v24 }
 0x14b   :  { %9269 = vmatprep.subr.bf16.mxu0 %v17026_v19  ;;  %v17033_v19 = vand.u32 4294901760, %v13426_v16  ;;  %v3492_v53 = vand.u32 4294901760, %v3491_v48  ;;  %v17053_v48 = vld [vmem:[#allocation91_spill] sm:$0xff] }
 0x14c   :  { %9839 = vmatpush3.bf16.msra.mxu1 %v13407_v25  ;;  %17024 = vst [vmem:[#allocation168_spill] sm:$0xff] %v13453_v55  ;;  %v13470_v56 = vsub.f32 %v13332_v22, %v17027_v41  ;;  %v13484_v32 = vpack.c.bf16 %v17031_v1, %v17030_v60  ;;  %v17036_v60 = vand.u32 4294901760, %v13441_v57 }
 0x14d   :  { %9841 = vmatprep.subr.bf16.mxu1 %v13434_v27  ;;  %v3477_v22 = vsub.f32 %v13426_v16, %v17033_v19  ;;  %v1647_v19 = vsub.f32 %v13445_v38, %v13473_v49 }
 0x14e   :  { %9271 = vmatpush1.bf16.msra.mxu0 %v17029_v0  ;;  %17032 = vst [vmem:[#allocation175_spill] sm:$0xff] %v13484_v32  ;;  %v3464_v0 = vand.u32 4294901760, %v3463_v18  ;;  %v3484_v1 = vsub.f32 %v13441_v57, %v17036_v60  ;;  %v17038_v60 = vld [vmem:[#allocation73_spill] sm:$0xff] }
 0x14f   :  { %9273 = vmatprep.subr.bf16.mxu0 %v17035_v29  ;;  %v3478_v18 = vand.u32 4294901760, %v3477_v22  ;;  %v13511_v29 = vsub.f32 %v13377_v37, %v3386_v4  ;;  %v13523_v49 = vand.u32 4294901760, %v1647_v19  ;;  %v17043_v4 = vand.u32 4294901760, %v13476_v45 }
 0x150   :  { %9843 = vmatpush3.bf16.msra.mxu1 %v13434_v27  ;;  %v13515_v31 = vpack.c.bf16 %v3471_v9, %v3464_v0  ;;  %v3485_v41 = vand.u32 4294901760, %v3484_v1  ;;  %v17045_v9 = vand.u32 4294901760, %v13493_v28 }
 0x151   :  { %9845 = vmatprep.subr.bf16.mxu1 %v13453_v55  ;;  %17042 = vst [vmem:[#allocation104_spill] sm:$0xff] %v13523_v49  ;;  %v3505_v37 = vsub.f32 %v13476_v45, %v17043_v4  ;;  %v13543_v4 = vsub.f32 %v13398_v40, %v17047_v63  ;;  %v17052_v63 = vand.u32 4294901760, %v13511_v29 }
 0x152   :  { %9275 = vmatpush1.bf16.msra.mxu0 %v17037_v5  ;;  %17039 = vst [vmem:[#allocation177_spill] sm:$0xff] %v13515_v31  ;;  %v17041_v5 = vand.u32 4294901760, %v13470_v56  ;;  %v3512_v0 = vsub.f32 %v13493_v28, %v17045_v9 }
 0x153   :  { %9277 = vmatprep.subr.bf16.mxu0 %v17038_v60  ;;  %v17044_v60 = vld [vmem:[#allocation76_spill] sm:$0xff]  ;;  %v3506_v1 = vand.u32 4294901760, %v3505_v37 }
 0x154   :  { %9847 = vmatpush3.bf16.msra.mxu1 %v13453_v55  ;;  %v3498_v22 = vsub.f32 %v13470_v56, %v17041_v5  ;;  %v17046_v5 = vand.u32 4294901760, %v13396_v23  ;;  %v3513_v40 = vand.u32 4294901760, %v3512_v0  ;;  %v17056_v0 = vand.u32 4294901760, %v13413_v36 }
 0x155   :  { %9849 = vmatprep.subr.bf16.mxu1 %v13484_v32 }
 0x156   :  { %9279 = vmatpush1.bf16.msra.mxu0 %v17044_v60  ;;  %v13538_v19 = vsub.f32 %v13396_v23, %v17046_v5  ;;  %v13547_v60 = vpack.c.bf16 %v3485_v41, %v3478_v18  ;;  %v3499_v9 = vand.u32 4294901760, %v3498_v22  ;;  %v17051_v5 = vld [vmem:[#allocation84_spill] sm:$0xff]  ;;  %v13577_v41 = vpack.c.bf16 %v3513_v40, %v3506_v1 }
 0x157   :  { %9281 = vmatprep.subr.bf16.mxu0 %v17048_v46  ;;  %v3526_v46 = vsub.f32 %v13511_v29, %v17052_v63  ;;  %v17057_v18 = vld [vmem:[#allocation92_spill] sm:$0xff]  ;;  %v17062_v1 = vand.u32 4294901760, %v13421_v24  ;;  %v17063_v40 = vand.u32 4294901760, %v13436_v47 }
 0x158   :  { %9851 = vmatpush3.bf16.msra.mxu1 %v13484_v32  ;;  %17049 = vst [vmem:[#allocation170_spill] sm:$0xff] %v13547_v60  ;;  %v17050_v32 = vand.u32 4294901760, %v13505_v62  ;;  %v13562_v22 = vpack.c.bf16 %v3499_v9, %v3492_v53  ;;  %17058 = vst [vmem:[#allocation103_spill] sm:$0xff] %v13577_v41  ;;  %v17059_v9 = vand.u32 4294901760, %v13538_v19 }
 0x159   :  { %9853 = vmatprep.subr.bf16.mxu1 %v13515_v31  ;;  %v3527_v53 = vand.u32 4294901760, %v3526_v46  ;;  %v13592_v46 = vsub.f32 %v13421_v24, %v17062_v1 }
 0x15a   :  { %v3519_v23 = vsub.f32 %v13505_v62, %v17050_v32  ;;  %9283 = vmatpush1.bf16.msra.mxu0 %v17051_v5  ;;  %17054 = vst [vmem:[#allocation176_spill] sm:$0xff] %v13562_v22  ;;  %v17055_v32 = vand.u32 4294901760, %v13411_v17 }
 0x15b   :  { %8665 = vmatmul.mubr.f32.vlgmr.msra.gmra.mrb[24].mxu1 %v13523_v49  ;;  %9285 = vmatprep.subr.bf16.mxu0 %v17053_v48 }
 0x15c   :  { %9855 = vmatpush3.bf16.msra.mxu1 %v13515_v31  ;;  %v13567_v37 = vsub.f32 %v13411_v17, %v17055_v32  ;;  %v13572_v31 = vsub.f32 %v13413_v36, %v17056_v0  ;;  %8699 = vmatprep.mubr.f32.mxu1 %v13309_v61  ;;  %v3520_v63 = vand.u32 4294901760, %v3519_v23  ;;  %v3533_v17 = vsub.f32 %v13538_v19, %v17059_v9  ;;  %v17061_v36 = vld [vmem:[#allocation97_spill] sm:$0xff] }
 0x15d   :  { %9857 = vmatprep.subr.bf16.mxu1 %v13547_v60  ;;  %v17060_v32 = vand.u32 4294901760, %v13543_v4  ;;  %v13597_v9 = vsub.f32 %v13436_v47, %v17063_v40  ;;  %v16063_v40 = vand.u32 4294901760, %v13592_v46 }
 0x15e   :  { %9287 = vmatpush1.bf16.msra.mxu0 %v17057_v18  ;;  %v16060_v0 = vand.u32 4294901760, %v13572_v31  ;;  %v17066_v18 = vld [vmem:[#allocation106_spill] sm:$0xff]  ;;  %v17067_v24 = vand.u32 4294901760, %v13567_v37 }
 0x15f   :  { %v3540_v49 = vsub.f32 %v13543_v4, %v17060_v32  ;;  %9289 = vmatprep.subr.bf16.mxu0 %v17061_v36  ;;  %v13601_v32 = vpack.c.bf16 %v3527_v53, %v3520_v63  ;;  %v3534_v36 = vand.u32 4294901760, %v3533_v17  ;;  %v17068_v63 = vld [vmem:[#allocation110_spill] sm:$0xff]  ;;  %v17070_v53 = vld [vmem:[#allocation117_spill] sm:$0xff] }
 0x160   :  { %9859 = vmatpush3.bf16.msra.mxu1 %v13547_v60  ;;  %v17064_v60 = vld [vmem:[#allocation98_spill] sm:$0xff]  ;;  %v3547_v1 = vsub.f32 %v13567_v37, %v17067_v24  ;;  %v3554_v47 = vsub.f32 %v13572_v31, %v16060_v0  ;;  %v3561_v0 = vsub.f32 %v13592_v46, %v16063_v40  ;;  %v17075_v40 = vld [vmem:[#allocation140_spill] sm:$0xff] }
 0x161   :  { %9861 = vmatprep.subr.bf16.mxu1 %v13562_v22  ;;  %17065 = vst [vmem:[#allocation246_spill] sm:$0xff] %v13601_v32  ;;  %v3541_v23 = vand.u32 4294901760, %v3540_v49 }
 0x162   :  { %9291 = vmatpush1.bf16.msra.mxu0 %v17064_v60  ;;  %v3548_v17 = vand.u32 4294901760, %v3547_v1  ;;  %v3555_v24 = vand.u32 4294901760, %v3554_v47  ;;  %v17071_v60 = vld [vmem:[#allocation120_spill] sm:$0xff]  ;;  %v3562_v1 = vand.u32 4294901760, %v3561_v0  ;;  %v17082_v0 = vand.u32 4294901760, %v16847_v52 }
 0x163   :  { %9293 = vmatprep.subr.bf16.mxu0 %v17066_v18  ;;  %v13615_v49 = vpack.c.bf16 %v3541_v23, %v3534_v36  ;;  %v17072_v36 = vld [vmem:[#allocation128_spill] sm:$0xff]  ;;  %v17088_v52 = vand.u32 4294901760, %v16863_v59 }
 0x164   :  { %9863 = vmatpush3.bf16.msra.mxu1 %v13562_v22  ;;  %v16064_v22 = vand.u32 4294901760, %v13597_v9  ;;  %v13629_v23 = vpack.c.bf16 %v3555_v24, %v3548_v17  ;;  %v17080_v17 = vld [vmem:[#allocation143_spill] sm:$0xff] }
 0x165   :  { %9865 = vmatprep.subr.bf16.mxu1 %v13577_v41  ;;  %17069 = vst [vmem:[#allocation247_spill] sm:$0xff] %v13615_v49 }
 0x166   :  { %9295 = vmatpush1.bf16.msra.mxu0 %v17068_v63  ;;  %v3568_v18 = vsub.f32 %v13597_v9, %v16064_v22  ;;  %17073 = vst [vmem:[#allocation248_spill] sm:$0xff] %v13629_v23  ;;  %v17076_v22 = vand.u32 4294901760, %v16836_v35  ;;  %v17085_v35 = vand.u32 4294901760, %v16850_v7  ;;  %v17091_v7 = vand.u32 4294901760, %v16876_v8 }
 0x167   :  { %9297 = vmatprep.subr.bf16.mxu0 %v17070_v53  ;;  %v17095_v8 = vand.u32 4294901760, %v16899_v20 }
 0x168   :  { %9867 = vmatpush3.bf16.msra.mxu1 %v13577_v41  ;;  %v3569_v47 = vand.u32 4294901760, %v3568_v18  ;;  %v17074_v41 = vld [vmem:[#allocation132_spill] sm:$0xff]  ;;  %v17081_v18 = vand.u32 4294901760, %v16846_v42  ;;  %v17089_v42 = vand.u32 4294901760, %v16864_v21  ;;  %v17098_v21 = vand.u32 4294901760, %v16908_v15 }
 0x169   :  { %9869 = vmatprep.subr.bf16.mxu1 %v13601_v32 }
 0x16a   :  { %9299 = vmatpush1.bf16.msra.mxu0 %v17071_v60  ;;  %v17077_v60 = vand.u32 4294901760, %v16837_v3  ;;  %v13648_v24 = vpack.c.bf16 %v17082_v0, %v17081_v18  ;;  %v17084_v3 = vand.u32 4294901760, %v16849_v50  ;;  %v17092_v50 = vand.u32 4294901760, %v16877_v34  ;;  %v17105_v18 = vld [vmem:[#allocation25_spill] sm:$0xff] }
 0x16b   :  { %9301 = vmatprep.subr.bf16.mxu0 %v17072_v36  ;;  %v17096_v34 = vand.u32 4294901760, %v16900_v30  ;;  %v17103_v30 = vld [vmem:[#allocation23_spill] sm:$0xff]  ;;  %v17106_v15 = vand.u32 4294901760, %v17105_v18  ;;  %v17121_v18 = vld [vmem:[#allocation36_spill] sm:$0xff] }
 0x16c   :  { %9871 = vmatpush3.bf16.msra.mxu1 %v13601_v32  ;;  %v13638_v53 = vpack.c.bf16 %v17077_v60, %v17076_v22  ;;  %v13641_v32 = vpack.c.bf16 %v3569_v47, %v3562_v1  ;;  %17083 = vst [vmem:[#allocation251_spill] sm:$0xff] %v13648_v24  ;;  %v13656_v60 = vpack.c.bf16 %v17085_v35, %v17084_v3  ;;  %v17104_v20 = vand.u32 4294901760, %v17103_v30  ;;  %v17108_v3 = vld [vmem:[#allocation27_spill] sm:$0xff] }
 0x16d   :  { %9873 = vmatprep.subr.bf16.mxu1 %v13615_v49  ;;  %v13661_v22 = vpack.c.bf16 %v13363_v51, %v13361_v33  ;;  %v13669_v1 = vpack.c.bf16 %v17089_v42, %v17088_v52  ;;  %v13677_v51 = vpack.c.bf16 %v17092_v50, %v17091_v7  ;;  %v13682_v33 = vpack.c.bf16 %v13441_v57, %v13426_v16  ;;  %v17110_v52 = vld [vmem:[#allocation30_spill] sm:$0xff]  ;;  %v17119_v30 = vld [vmem:[#allocation35_spill] sm:$0xff] }
 0x16e   :  { %9303 = vmatpush1.bf16.msra.mxu0 %v17074_v41  ;;  %17078 = vst [vmem:[#allocation249_spill] sm:$0xff] %v13638_v53  ;;  %17079 = vst [vmem:[#allocation250_spill] sm:$0xff] %v13641_v32  ;;  %v13692_v59 = vpack.c.bf16 %v17096_v34, %v17095_v8  ;;  %v13714_v0 = vpack.c.bf16 %v17106_v15, %v17104_v20  ;;  %v17109_v35 = vand.u32 4294901760, %v17108_v3  ;;  %v17111_v42 = vand.u32 4294901760, %v17110_v52  ;;  %v17114_v8 = vld [vmem:[#allocation31_spill] sm:$0xff] }
 0x16f   :  { %9305 = vmatprep.subr.bf16.mxu0 %v17075_v40  ;;  %17086 = vst [vmem:[#allocation252_spill] sm:$0xff] %v13656_v60  ;;  %17087 = vst [vmem:[#allocation253_spill] sm:$0xff] %v13661_v22  ;;  %v13727_v50 = vpack.c.bf16 %v13493_v28, %v13476_v45  ;;  %v17115_v34 = vand.u32 4294901760, %v17114_v8  ;;  %v17120_v20 = vand.u32 4294901760, %v17119_v30  ;;  %v17122_v15 = vand.u32 4294901760, %v17121_v18  ;;  %v17125_v52 = vld [vmem:[#allocation39_spill] sm:$0xff] }
 0x170   :  { %9875 = vmatpush3.bf16.msra.mxu1 %v13615_v49  ;;  %17090 = vst [vmem:[#allocation254_spill] sm:$0xff] %v13669_v1  ;;  %17093 = vst [vmem:[#allocation255_spill] sm:$0xff] %v13677_v51  ;;  %v13722_v7 = vpack.c.bf16 %v17111_v42, %v17109_v35  ;;  %v13747_v35 = vpack.c.bf16 %v13511_v29, %v13505_v62  ;;  %v17126_v42 = vand.u32 4294901760, %v17125_v52  ;;  %v17127_v8 = vld [vmem:[#allocation40_spill] sm:$0xff]  ;;  %v17136_v52 = vld [vmem:[#allocation45_spill] sm:$0xff] }
 0x171   :  { %9877 = vmatprep.subr.bf16.mxu1 %v13629_v23  ;;  %17094 = vst [vmem:[#allocation256_spill] sm:$0xff] %v13682_v33  ;;  %17097 = vst [vmem:[#allocation257_spill] sm:$0xff] %v13692_v59  ;;  %v13742_v3 = vpack.c.bf16 %v17122_v15, %v17120_v20  ;;  %v17132_v20 = vld [vmem:[#allocation44_spill] sm:$0xff]  ;;  %v14063_v49 = vld [vmem:[#allocation5 + $0x348] sm:$0xff] }
 0x172   :  { %9307 = vmatpush1.bf16.msra.mxu0 %v17080_v17  ;;  %17107 = vst [vmem:[#allocation23_spill] sm:$0xff] %v13714_v0  ;;  %17112 = vst [vmem:[#allocation25_spill] sm:$0xff] %v13722_v7  ;;  %v17133_v18 = vand.u32 4294901760, %v17132_v20  ;;  %v17143_v20 = vld [vmem:[#allocation52_spill] sm:$0xff] }
 0x173   :  { %9309 = vmatprep.subr.bf16.mxu0 %v13638_v53  ;;  %17113 = vst [vmem:[#allocation27_spill] sm:$0xff] %v13727_v50  ;;  %17123 = vst [vmem:[#allocation31_spill] sm:$0xff] %v13742_v3  ;;  %v14077_v53 = vld [vmem:[#allocation5 + $0x380] sm:$0xff] }
 0x174   :  { %9879 = vmatpush3.bf16.msra.mxu1 %v13629_v23  ;;  %v17170_v23 = vld [vmem:[#allocation70_spill] sm:$0xff] }
 0x175   :  { %9881 = vmatprep.subr.bf16.mxu1 %v13641_v32  ;;  %1100 = vmatmul.mubr.f32.vlgmr.msra.gmra.mrb[0].mxu0 %v16889_v43  ;;  %v17099_v43 = vld [vmem:[#allocation22_spill] sm:$0xff] }
 0x176   :  { %9311 = vmatpush1.bf16.msra.mxu0 %v13648_v24  ;;  %1108 = vmatprep.mubr.f32.mxu0 %v16916_v58  ;;  %v17100_v58 = vand.u32 4294901760, %v17099_v43 }
 0x177   :  { %9313 = vmatprep.subr.bf16.mxu0 %v13656_v60 }
 0x178   :  { %9883 = vmatpush3.bf16.msra.mxu1 %v13641_v32  ;;  %v13700_v47 = vpack.c.bf16 %v17100_v58, %v17098_v21  ;;  %v17116_v21 = vld [vmem:[#allocation32_spill] sm:$0xff] }
 0x179   :  { %9885 = vmatprep.subr.bf16.mxu1 %v13661_v22  ;;  %1112 = vmatmul.mubr.f32.gmra.mrb[2].mxu0 %v16918_v54  ;;  %v13705_v54 = vpack.c.bf16 %v13470_v56, %v13460_v12  ;;  %v17117_v43 = vand.u32 4294901760, %v17116_v21  ;;  %17124 = vst [vmem:[#allocation32_spill] sm:$0xff] %v13747_v35 }
 0x17a   :  { %9315 = vmatpush1.bf16.msra.mxu0 %v13669_v1  ;;  %17101 = vst [vmem:[#allocation22_spill] sm:$0xff] %v13700_v47  ;;  %1375 = vmatprep.mubr.f32.mxu0 %v16930_v26 }
 0x17b   :  { %8700 = vmatmul.mubr.f32.vlgmr.msra.gmra.mrb[24].mxu1 %v13415_v13  ;;  %9317 = vmatprep.subr.bf16.mxu0 %v13677_v51  ;;  %17102 = vst [vmem:[#allocation258_spill] sm:$0xff] %v13705_v54  ;;  %v13734_v58 = vpack.c.bf16 %v17117_v43, %v17115_v34  ;;  %v17128_v34 = vand.u32 4294901760, %v17127_v8  ;;  %v17130_v43 = vld [vmem:[#allocation43_spill] sm:$0xff]  ;;  %v17138_v8 = vld [vmem:[#allocation48_spill] sm:$0xff] }
 0x17c   :  { %9887 = vmatpush3.bf16.msra.mxu1 %v13661_v22  ;;  %8734 = vmatprep.mubr.f32.mxu1 %v13320_v6  ;;  %v17131_v30 = vand.u32 4294901760, %v17130_v43  ;;  %v17141_v43 = vld [vmem:[#allocation50_spill] sm:$0xff]  ;;  %v13787_v22 = vpack.c.bf16 %v13572_v31, %v13567_v37  ;;  %v14142_v6 = vld [vmem:[#allocation5 + $0x3d8] sm:$0xff] }
 0x17d   :  { %9889 = vmatprep.subr.bf16.mxu1 %v13682_v33  ;;  %17118 = vst [vmem:[#allocation30_spill] sm:$0xff] %v13734_v58  ;;  %v13754_v21 = vpack.c.bf16 %v17128_v34, %v17126_v42  ;;  %v17137_v42 = vand.u32 4294901760, %v17136_v52  ;;  %v17139_v34 = vand.u32 4294901760, %v17138_v8  ;;  %v17147_v52 = vld [vmem:[#allocation53_spill] sm:$0xff]  ;;  %v17149_v8 = vld [vmem:[#allocation54_spill] sm:$0xff] }
 0x17e   :  { %9319 = vmatpush1.bf16.msra.mxu0 %v13692_v59  ;;  %v13762_v15 = vpack.c.bf16 %v17133_v18, %v17131_v30  ;;  %v17142_v30 = vand.u32 4294901760, %v17141_v43  ;;  %v17144_v18 = vand.u32 4294901760, %v17143_v20  ;;  %17146 = vst [vmem:[#allocation44_spill] sm:$0xff] %v13787_v22  ;;  %v17152_v43 = vld [vmem:[#allocation58_spill] sm:$0xff]  ;;  %v17154_v20 = vld [vmem:[#allocation59_spill] sm:$0xff] }
 0x17f   :  { %9321 = vmatprep.subr.bf16.mxu0 %v13700_v47  ;;  %17129 = vst [vmem:[#allocation35_spill] sm:$0xff] %v13754_v21  ;;  %v14075_v59 = vld [vmem:[#allocation5 + $0x368] sm:$0xff]  ;;  %v14089_v47 = vld [vmem:[#allocation5 + $0x360] sm:$0xff] }
 0x180   :  { %9891 = vmatpush3.bf16.msra.mxu1 %v13682_v33  ;;  %17134 = vst [vmem:[#allocation36_spill] sm:$0xff] %v13762_v15  ;;  %v13782_v33 = vpack.c.bf16 %v17144_v18, %v17142_v30  ;;  %v17153_v30 = vand.u32 4294901760, %v17152_v43  ;;  %v17155_v18 = vand.u32 4294901760, %v17154_v20  ;;  %v17163_v43 = vld [vmem:[#allocation66_spill] sm:$0xff]  ;;  %v17165_v20 = vld [vmem:[#allocation67_spill] sm:$0xff] }
 0x181   :  { %9893 = vmatprep.subr.bf16.mxu1 %v13705_v54 }
 0x182   :  { %9323 = vmatpush1.bf16.msra.mxu0 %v13714_v0  ;;  %17145 = vst [vmem:[#allocation43_spill] sm:$0xff] %v13782_v33  ;;  %v13802_v32 = vpack.c.bf16 %v17155_v18, %v17153_v30  ;;  %v17164_v30 = vand.u32 4294901760, %v17163_v43  ;;  %v17166_v18 = vand.u32 4294901760, %v17165_v20  ;;  %v14055_v0 = vld [vmem:[#allocation5 + $0x350] sm:$0xff] }
 0x183   :  { %9325 = vmatprep.subr.bf16.mxu0 %v13722_v7  ;;  %v14053_v7 = vld [vmem:[#allocation5 + $0x338] sm:$0xff] }
 0x184   :  { %9895 = vmatpush3.bf16.msra.mxu1 %v13705_v54  ;;  %v13767_v54 = vpack.c.bf16 %v13543_v4, %v13538_v19  ;;  %17156 = vst [vmem:[#allocation48_spill] sm:$0xff] %v13802_v32  ;;  %v16150_v24 = vand.u32 4294901760, %v14053_v7 }
 0x185   :  { %9897 = vmatprep.subr.bf16.mxu1 %v13727_v50 }
 0x186   :  { %9327 = vmatpush1.bf16.msra.mxu0 %v13734_v58  ;;  %17135 = vst [vmem:[#allocation39_spill] sm:$0xff] %v13767_v54  ;;  %v14050_v58 = vld [vmem:[#allocation5 + $0x318] sm:$0xff] }
 0x187   :  { %9329 = vmatprep.subr.bf16.mxu0 %v13742_v3  ;;  %v14048_v3 = vld [vmem:[#allocation5 + $0x300] sm:$0xff] }
 0x188   :  { %9899 = vmatpush3.bf16.msra.mxu1 %v13727_v50  ;;  %v13774_v50 = vpack.c.bf16 %v17139_v34, %v17137_v42  ;;  %v17148_v42 = vand.u32 4294901760, %v17147_v52  ;;  %v17150_v34 = vand.u32 4294901760, %v17149_v8  ;;  %v17158_v52 = vld [vmem:[#allocation61_spill] sm:$0xff]  ;;  %v17160_v8 = vld [vmem:[#allocation62_spill] sm:$0xff] }
 0x189   :  { %9901 = vmatprep.subr.bf16.mxu1 %v13747_v35 }
 0x18a   :  { %9331 = vmatpush1.bf16.msra.mxu0 %v13754_v21  ;;  %17140 = vst [vmem:[#allocation40_spill] sm:$0xff] %v13774_v50  ;;  %v14061_v21 = vld [vmem:[#allocation5 + $0x330] sm:$0xff] }
 0x18b   :  { %9333 = vmatprep.subr.bf16.mxu0 %v13762_v15  ;;  %v17259_v15 = vld [vmem:[#allocation41_spill] sm:$0xff] }
 0x18c   :  { %9903 = vmatpush3.bf16.msra.mxu1 %v13747_v35  ;;  %v13794_v35 = vpack.c.bf16 %v17150_v34, %v17148_v42  ;;  %v17159_v42 = vand.u32 4294901760, %v17158_v52  ;;  %v17161_v34 = vand.u32 4294901760, %v17160_v8  ;;  %v17171_v8 = vand.u32 4294901760, %v17170_v23 }
 0x18d   :  { %9905 = vmatprep.subr.bf16.mxu1 %v13767_v54 }
 0x18e   :  { %9335 = vmatpush1.bf16.msra.mxu0 %v13774_v50  ;;  %17151 = vst [vmem:[#allocation45_spill] sm:$0xff] %v13794_v35  ;;  %v13807_v50 = vpack.c.bf16 %v13597_v9, %v13592_v46 }
 0x18f   :  { %9337 = vmatprep.subr.bf16.mxu0 %v13782_v33  ;;  %v13822_v33 = vpack.c.bf16 %v17166_v18, %v17164_v30  ;;  %v17180_v18 = vld [vmem:[#allocation81_spill] sm:$0xff] }
 0x190   :  { %9907 = vmatpush3.bf16.msra.mxu1 %v13767_v54  ;;  %17157 = vst [vmem:[#allocation50_spill] sm:$0xff] %v13807_v50  ;;  %v13814_v54 = vpack.c.bf16 %v17161_v34, %v17159_v42  ;;  %v17173_v34 = vld [vmem:[#allocation77_spill] sm:$0xff] }
 0x191   :  { %9909 = vmatprep.subr.bf16.mxu1 %v13787_v22  ;;  %17167 = vst [vmem:[#allocation53_spill] sm:$0xff] %v13822_v33  ;;  %v17174_v43 = vand.u32 4294901760, %v17173_v34  ;;  %v17183_v34 = vld [vmem:[#allocation85_spill] sm:$0xff] }
 0x192   :  { %9339 = vmatpush1.bf16.msra.mxu0 %v13794_v35  ;;  %17162 = vst [vmem:[#allocation52_spill] sm:$0xff] %v13814_v54  ;;  %v17168_v35 = vld [vmem:[#allocation69_spill] sm:$0xff] }
 0x193   :  { %9341 = vmatprep.subr.bf16.mxu0 %v13802_v32  ;;  %v17169_v52 = vand.u32 4294901760, %v17168_v35  ;;  %v17178_v35 = vld [vmem:[#allocation80_spill] sm:$0xff] }
 0x194   :  { %9911 = vmatpush3.bf16.msra.mxu1 %v13787_v22  ;;  %v17175_v22 = vld [vmem:[#allocation78_spill] sm:$0xff]  ;;  %v17179_v23 = vand.u32 4294901760, %v17178_v35  ;;  %v17188_v35 = vld [vmem:[#allocation88_spill] sm:$0xff] }
 0x195   :  { %9913 = vmatprep.subr.bf16.mxu1 %v13807_v50  ;;  %v13830_v42 = vpack.c.bf16 %v17171_v8, %v17169_v52  ;;  %v17176_v20 = vand.u32 4294901760, %v17175_v22  ;;  %v17181_v52 = vand.u32 4294901760, %v17180_v18  ;;  %v17184_v22 = vand.u32 4294901760, %v17183_v34  ;;  %v17193_v34 = vld [vmem:[#allocation95_spill] sm:$0xff] }
 0x196   :  { %9343 = vmatpush1.bf16.msra.mxu0 %v13814_v54  ;;  %v17189_v18 = vand.u32 4294901760, %v17188_v35  ;;  %v17250_v54 = vld [vmem:[#allocation29_spill] sm:$0xff] }
 0x197   :  { %17172 = vst [vmem:[#allocation54_spill] sm:$0xff] %v13830_v42  ;;  %9345 = vmatprep.subr.bf16.mxu0 %v13822_v33  ;;  %v13838_v30 = vpack.c.bf16 %v17176_v20, %v17174_v43  ;;  %v13847_v8 = vpack.c.bf16 %v17181_v52, %v17179_v23  ;;  %v17185_v43 = vld [vmem:[#allocation86_spill] sm:$0xff]  ;;  %v17190_v23 = vld [vmem:[#allocation89_spill] sm:$0xff]  ;;  %v17200_v33 = vld [vmem:[#allocation216_spill] sm:$0xff] }
 0x198   :  { %9915 = vmatpush3.bf16.msra.mxu1 %v13807_v50  ;;  %v17186_v20 = vand.u32 4294901760, %v17185_v43  ;;  %v17191_v52 = vand.u32 4294901760, %v17190_v23  ;;  %v17194_v43 = vand.u32 4294901760, %v17193_v34  ;;  %v17201_v23 = vand.u32 4294901760, %v17200_v33 }
 0x199   :  { %17177 = vst [vmem:[#allocation58_spill] sm:$0xff] %v13838_v30  ;;  %9917 = vmatprep.subr.bf16.mxu1 %v13326_v39  ;;  %17182 = vst [vmem:[#allocation59_spill] sm:$0xff] %v13847_v8 }
 0x19a   :  { %9347 = vmatpush1.bf16.msra.mxu0 %v13830_v42  ;;  %v13855_v50 = vpack.c.bf16 %v17186_v20, %v17184_v22  ;;  %v13864_v42 = vpack.c.bf16 %v17191_v52, %v17189_v18  ;;  %v17195_v22 = vld [vmem:[#allocation214_spill] sm:$0xff]  ;;  %v17203_v52 = vld [vmem:[#allocation217_spill] sm:$0xff] }
 0x19b   :  { %8735 = vmatmul.mubr.f32.vlgmr.msra.gmra.mrb[24].mxu1 %v13445_v38  ;;  %9349 = vmatprep.subr.bf16.mxu0 %v13838_v30  ;;  %v17196_v20 = vand.u32 4294901760, %v17195_v22  ;;  %v17204_v34 = vand.u32 4294901760, %v17203_v52  ;;  %v14138_v38 = vld [vmem:[#allocation5 + $0x3c0] sm:$0xff] }
 0x19c   :  { %9919 = vmatpush3.bf16.msra.mxu1 %v13326_v39  ;;  %17187 = vst [vmem:[#allocation61_spill] sm:$0xff] %v13855_v50  ;;  %8769 = vmatprep.mubr.f32.mxu1 %v13335_v44  ;;  %17192 = vst [vmem:[#allocation62_spill] sm:$0xff] %v13864_v42  ;;  %v14134_v44 = vld [vmem:[#allocation5 + $0x3c8] sm:$0xff] }
 0x19d   :  { %9921 = vmatprep.subr.bf16.mxu1 %v13346_v10  ;;  %v13872_v30 = vpack.c.bf16 %v17196_v20, %v17194_v43  ;;  %v17208_v20 = vld [vmem:[#allocation112_spill] sm:$0xff] }
 0x19e   :  { %9351 = vmatpush1.bf16.msra.mxu0 %v13847_v8  ;;  %v17198_v8 = vld [vmem:[#allocation215_spill] sm:$0xff] }
 0x19f   :  { %9353 = vmatprep.subr.bf16.mxu0 %v13855_v50  ;;  %17197 = vst [vmem:[#allocation66_spill] sm:$0xff] %v13872_v30  ;;  %v17199_v35 = vand.u32 4294901760, %v17198_v8  ;;  %v17205_v50 = vld [vmem:[#allocation108_spill] sm:$0xff]  ;;  %v17209_v8 = vand.u32 4294901760, %v17208_v20 }
 0x1a0   :  { %9923 = vmatpush3.bf16.msra.mxu1 %v13346_v10  ;;  %v17206_v22 = vand.u32 4294901760, %v17205_v50 }
 0x1a1   :  { %9925 = vmatprep.subr.bf16.mxu1 %v13371_v2  ;;  %v13880_v18 = vpack.c.bf16 %v17201_v23, %v17199_v35  ;;  %v17213_v23 = vld [vmem:[#allocation220_spill] sm:$0xff] }
 0x1a2   :  { %9355 = vmatpush1.bf16.msra.mxu0 %v13864_v42  ;;  %v13888_v43 = vpack.c.bf16 %v17206_v22, %v17204_v34  ;;  %v17210_v42 = vld [vmem:[#allocation115_spill] sm:$0xff]  ;;  %v17214_v52 = vand.u32 4294901760, %v17213_v23  ;;  %v17218_v22 = vld [vmem:[#allocation124_spill] sm:$0xff] }
 0x1a3   :  { %17202 = vst [vmem:[#allocation67_spill] sm:$0xff] %v13880_v18  ;;  %9357 = vmatprep.subr.bf16.mxu0 %v13872_v30  ;;  %v17211_v33 = vand.u32 4294901760, %v17210_v42  ;;  %v17215_v30 = vld [vmem:[#allocation122_spill] sm:$0xff]  ;;  %v17219_v20 = vand.u32 4294901760, %v17218_v22 }
 0x1a4   :  { %9927 = vmatpush3.bf16.msra.mxu1 %v13371_v2  ;;  %17207 = vst [vmem:[#allocation69_spill] sm:$0xff] %v13888_v43  ;;  %v17216_v50 = vand.u32 4294901760, %v17215_v30 }
 0x1a5   :  { %9929 = vmatprep.subr.bf16.mxu1 %v13392_v11  ;;  %v13896_v35 = vpack.c.bf16 %v17211_v33, %v17209_v8  ;;  %v17223_v33 = vld [vmem:[#allocation130_spill] sm:$0xff] }
 0x1a6   :  { %9359 = vmatpush1.bf16.msra.mxu0 %v13880_v18  ;;  %v13904_v34 = vpack.c.bf16 %v17216_v50, %v17214_v52  ;;  %v17220_v18 = vld [vmem:[#allocation125_spill] sm:$0xff]  ;;  %v17224_v23 = vand.u32 4294901760, %v17223_v33  ;;  %v17228_v50 = vld [vmem:[#allocation135_spill] sm:$0xff] }
 0x1a7   :  { %17212 = vst [vmem:[#allocation70_spill] sm:$0xff] %v13896_v35  ;;  %9361 = vmatprep.subr.bf16.mxu0 %v13888_v43  ;;  %v17221_v42 = vand.u32 4294901760, %v17220_v18  ;;  %v17225_v43 = vld [vmem:[#allocation131_spill] sm:$0xff]  ;;  %v17229_v22 = vand.u32 4294901760, %v17228_v50  ;;  %v17239_v50 = vand.u32 4294901760, %v13441_v57  ;;  %v17247_v57 = vand.u32 4294901760, %v13470_v56 }
 0x1a8   :  { %9931 = vmatpush3.bf16.msra.mxu1 %v13392_v11  ;;  %17217 = vst [vmem:[#allocation77_spill] sm:$0xff] %v13904_v34  ;;  %v17226_v30 = vand.u32 4294901760, %v17225_v43  ;;  %v17233_v43 = vld [vmem:[#allocation175_spill] sm:$0xff]  ;;  %v17254_v56 = vld [vmem:[#allocation33_spill] sm:$0xff] }
 0x1a9   :  { %9933 = vmatprep.subr.bf16.mxu1 %v13407_v25  ;;  %v13912_v8 = vpack.c.bf16 %v17221_v42, %v17219_v20  ;;  %v17234_v42 = vld [vmem:[#allocation100_spill] sm:$0xff]  ;;  %v17235_v33 = vld [vmem:[#allocation19_spill] sm:$0xff] }
 0x1aa   :  { %9363 = vmatpush1.bf16.msra.mxu0 %v13896_v35  ;;  %v13920_v52 = vpack.c.bf16 %v17226_v30, %v17224_v23  ;;  %v17230_v35 = vld [vmem:[#allocation138_spill] sm:$0xff]  ;;  %v17238_v30 = vand.u32 4294901760, %v13426_v16  ;;  %v17246_v16 = vand.u32 4294901760, %v13460_v12  ;;  %v17252_v12 = vand.u32 4294901760, %v13493_v28 }
 0x1ab   :  { %17222 = vst [vmem:[#allocation78_spill] sm:$0xff] %v13912_v8  ;;  %9365 = vmatprep.subr.bf16.mxu0 %v13904_v34  ;;  %v17231_v18 = vand.u32 4294901760, %v17230_v35  ;;  %v17236_v35 = vld [vmem:[#allocation20_spill] sm:$0xff]  ;;  %v17237_v23 = vld [vmem:[#allocation158_spill] sm:$0xff]  ;;  %v17261_v28 = vand.u32 4294901760, %v13538_v19 }
 0x1ac   :  { %9935 = vmatpush3.bf16.msra.mxu1 %v13407_v25  ;;  %17227 = vst [vmem:[#allocation80_spill] sm:$0xff] %v13920_v52  ;;  %v17245_v34 = vld [vmem:[#allocation26_spill] sm:$0xff]  ;;  %v17270_v19 = vld [vmem:[#allocation64_spill] sm:$0xff] }
 0x1ad   :  { %9937 = vmatprep.subr.bf16.mxu1 %v13434_v27  ;;  %v13928_v20 = vpack.c.bf16 %v17231_v18, %v17229_v22  ;;  %v13946_v22 = vpack.c.bf16 %v17239_v50, %v17238_v30  ;;  %v17241_v18 = vld [vmem:[#allocation167_spill] sm:$0xff]  ;;  %v13959_v30 = vpack.c.bf16 %v17247_v57, %v17246_v16  ;;  %v17249_v50 = vld [vmem:[#allocation28_spill] sm:$0xff]  ;;  %v17255_v16 = vld [vmem:[#allocation38_spill] sm:$0xff]  ;;  %v17257_v57 = vand.u32 4294901760, %v13511_v29 }
 0x1ae   :  { %9367 = vmatpush1.bf16.msra.mxu0 %v13912_v8  ;;  %v17244_v8 = vld [vmem:[#allocation24_spill] sm:$0xff] }
 0x1af   :  { %17232 = vst [vmem:[#allocation81_spill] sm:$0xff] %v13928_v20  ;;  %9369 = vmatprep.subr.bf16.mxu0 %v13920_v52  ;;  %17240 = vst [vmem:[#allocation85_spill] sm:$0xff] %v13946_v22  ;;  %v17243_v52 = vld [vmem:[#allocation173_spill] sm:$0xff]  ;;  %v17265_v29 = vld [vmem:[#allocation56_spill] sm:$0xff] }
 0x1b0   :  { %9939 = vmatpush3.bf16.msra.mxu1 %v13434_v27  ;;  %17248 = vst [vmem:[#allocation86_spill] sm:$0xff] %v13959_v30 }
 0x1b1   :  { %9941 = vmatprep.subr.bf16.mxu1 %v13453_v55 }
 0x1b2   :  { %9371 = vmatpush1.bf16.msra.mxu0 %v13928_v20  ;;  %v17242_v20 = vld [vmem:[#allocation171_spill] sm:$0xff] }
 0x1b3   :  { %9373 = vmatprep.subr.bf16.mxu0 %v16989_v14 }
 0x1b4   :  { %9943 = vmatpush3.bf16.msra.mxu1 %v13453_v55 }
 0x1b5   :  { %9945 = vmatprep.subr.bf16.mxu1 %v17233_v43  ;;  %1377 = vmatmul.mubr.f32.vlgmr.msra.gmra.mrb[0].mxu0 %v17234_v42 }
 0x1b6   :  { %9375 = vmatpush1.bf16.msra.mxu0 %v17235_v33  ;;  %1383 = vmatprep.mubr.f32.mxu0 %v17241_v18 }
 0x1b7   :  { %9377 = vmatprep.subr.bf16.mxu0 %v17236_v35 }
 0x1b8   :  { %9947 = vmatpush3.bf16.msra.mxu1 %v17233_v43 }
 0x1b9   :  { %9949 = vmatprep.subr.bf16.mxu1 %v17237_v23  ;;  %1385 = vmatmul.mubr.f32.gmra.mrb[2].mxu0 %v17243_v52 }
 0x1ba   :  { %9379 = vmatpush1.bf16.msra.mxu0 %v17244_v8  ;;  %1520 = vmatprep.mubr.f32.mxu0 %v16930_v26  ;;  %v17256_v26 = vand.u32 4294901760, %v13505_v62  ;;  %v17266_v62 = vand.u32 4294901760, %v13567_v37  ;;  %v17276_v37 = vld [vmem:[#allocation76_spill] sm:$0xff] }
 0x1bb   :  { %8770 = vmatmul.mubr.f32.vlgmr.msra.gmra.mrb[24].mxu1 %v17242_v20  ;;  %9381 = vmatprep.subr.bf16.mxu0 %v17245_v34  ;;  %v14109_v20 = vld [vmem:[#allocation5 + $0x3a8] sm:$0xff] }
 0x1bc   :  { %9951 = vmatpush3.bf16.msra.mxu1 %v17237_v23  ;;  %8804 = vmatprep.mubr.f32.mxu1 %v13309_v61  ;;  %v17251_v23 = vand.u32 4294901760, %v13476_v45  ;;  %v17260_v45 = vld [vmem:[#allocation47_spill] sm:$0xff] }
 0x1bd   :  { %9953 = vmatprep.subr.bf16.mxu1 %v13946_v22 }
 0x1be   :  { %9383 = vmatpush1.bf16.msra.mxu0 %v17249_v50  ;;  %v13971_v32 = vpack.c.bf16 %v17252_v12, %v17251_v23  ;;  %v17262_v23 = vand.u32 4294901760, %v13543_v4  ;;  %v17271_v4 = vand.u32 4294901760, %v13592_v46  ;;  %v17278_v46 = vld [vmem:[#allocation92_spill] sm:$0xff] }
 0x1bf   :  { %9385 = vmatprep.subr.bf16.mxu0 %v17250_v54 }
 0x1c0   :  { %9955 = vmatpush3.bf16.msra.mxu1 %v13946_v22  ;;  %17253 = vst [vmem:[#allocation88_spill] sm:$0xff] %v13971_v32  ;;  %v13981_v22 = vpack.c.bf16 %v17257_v57, %v17256_v26  ;;  %v13991_v12 = vpack.c.bf16 %v17262_v23, %v17261_v28  ;;  %v17267_v26 = vand.u32 4294901760, %v13572_v31  ;;  %v17272_v28 = vand.u32 4294901760, %v13597_v9  ;;  %v17275_v31 = vld [vmem:[#allocation73_spill] sm:$0xff] }
 0x1c1   :  { %9957 = vmatprep.subr.bf16.mxu1 %v13959_v30  ;;  %v17279_v9 = vld [vmem:[#allocation97_spill] sm:$0xff] }
 0x1c2   :  { %9387 = vmatpush1.bf16.msra.mxu0 %v17254_v56  ;;  %17258 = vst [vmem:[#allocation89_spill] sm:$0xff] %v13981_v22  ;;  %17263 = vst [vmem:[#allocation95_spill] sm:$0xff] %v13991_v12  ;;  %v14001_v57 = vpack.c.bf16 %v17267_v26, %v17266_v62  ;;  %v14011_v23 = vpack.c.bf16 %v17272_v28, %v17271_v4  ;;  %v17277_v62 = vld [vmem:[#allocation83_spill] sm:$0xff]  ;;  %v17280_v26 = vld [vmem:[#allocation98_spill] sm:$0xff] }
 0x1c3   :  { %9389 = vmatprep.subr.bf16.mxu0 %v17255_v16  ;;  %v17281_v4 = vld [vmem:[#allocation106_spill] sm:$0xff]  ;;  %v17282_v28 = vld [vmem:[#allocation117_spill] sm:$0xff] }
 0x1c4   :  { %9959 = vmatpush3.bf16.msra.mxu1 %v13959_v30  ;;  %v17264_v30 = vld [vmem:[#allocation49_spill] sm:$0xff]  ;;  %17268 = vst [vmem:[#allocation214_spill] sm:$0xff] %v14001_v57  ;;  %17273 = vst [vmem:[#allocation215_spill] sm:$0xff] %v14011_v23 }
 0x1c5   :  { %9961 = vmatprep.subr.bf16.mxu1 %v13971_v32 }
 0x1c6   :  { %9391 = vmatpush1.bf16.msra.mxu0 %v17259_v15 }
 0x1c7   :  { %9393 = vmatprep.subr.bf16.mxu0 %v17260_v45 }
 0x1c8   :  { %9963 = vmatpush3.bf16.msra.mxu1 %v13971_v32  ;;  %v17269_v32 = vld [vmem:[#allocation57_spill] sm:$0xff] }
 0x1c9   :  { %9965 = vmatprep.subr.bf16.mxu1 %v13981_v22 }
 0x1ca   :  { %9395 = vmatpush1.bf16.msra.mxu0 %v17264_v30 }
 0x1cb   :  { %9397 = vmatprep.subr.bf16.mxu0 %v17265_v29 }
 0x1cc   :  { %9967 = vmatpush3.bf16.msra.mxu1 %v13981_v22  ;;  %v17274_v22 = vld [vmem:[#allocation65_spill] sm:$0xff] }
 0x1cd   :  { %9969 = vmatprep.subr.bf16.mxu1 %v13991_v12 }
 0x1ce   :  { %9399 = vmatpush1.bf16.msra.mxu0 %v17269_v32 }
 0x1cf   :  { %9401 = vmatprep.subr.bf16.mxu0 %v17270_v19 }
 0x1d0   :  { %9971 = vmatpush3.bf16.msra.mxu1 %v13991_v12  ;;  %v17283_v12 = vld [vmem:[#allocation120_spill] sm:$0xff] }
 0x1d1   :  { %9973 = vmatprep.subr.bf16.mxu1 %v14001_v57 }
 0x1d2   :  { %9403 = vmatpush1.bf16.msra.mxu0 %v17274_v22 }
 0x1d3   :  { %9405 = vmatprep.subr.bf16.mxu0 %v17275_v31 }
 0x1d4   :  { %9975 = vmatpush3.bf16.msra.mxu1 %v14001_v57  ;;  %v14041_v57 = vld [vmem:[#allocation5 + $0x320] sm:$0xff] }
 0x1d5   :  { %9977 = vmatprep.subr.bf16.mxu1 %v14011_v23  ;;  %v17285_v1 = vand.u32 4294901760, %v14041_v57 }
 0x1d6   :  { %9407 = vmatpush1.bf16.msra.mxu0 %v17276_v37 }
 0x1d7   :  { %9409 = vmatprep.subr.bf16.mxu0 %v17277_v62 }
 0x1d8   :  { %9979 = vmatpush3.bf16.msra.mxu1 %v14011_v23  ;;  %v14039_v23 = vld [vmem:[#allocation5 + $0x308] sm:$0xff] }
 0x1d9   :  { %9981 = vmatprep.subr.bf16.mxu1 %v13326_v39  ;;  %v17284_v51 = vand.u32 4294901760, %v14039_v23 }
 0x1da   :  { %9411 = vmatpush1.bf16.msra.mxu0 %v17051_v5 }
 0x1db   :  { %8805 = vmatmul.mubr.f32.vlgmr.msra.gmra.mrb[24].mxu1 %v13415_v13  ;;  %9413 = vmatprep.subr.bf16.mxu0 %v17053_v48  ;;  %v14070_v60 = vpack.c.bf16 %v17285_v1, %v17284_v51  ;;  %v17288_v1 = vand.u32 4294901760, %v14050_v58 }
 0x1dc   :  { %9983 = vmatpush3.bf16.msra.mxu1 %v13326_v39  ;;  %8839 = vmatprep.mubr.f32.mxu1 %v13309_v61  ;;  %v14100_v39 = vld [vmem:[#allocation5 + $0x378] sm:$0xff]  ;;  %v14175_v61 = vld [vmem:[#allocation5 + $0x408] sm:$0xff] }
 0x1dd   :  { %9985 = vmatprep.subr.bf16.mxu1 %v13346_v10  ;;  %17286 = vst [vmem:[#allocation216_spill] sm:$0xff] %v14070_v60 }
 0x1de   :  { %9415 = vmatpush1.bf16.msra.mxu0 %v17278_v46 }
 0x1df   :  { %9417 = vmatprep.subr.bf16.mxu0 %v17279_v9 }
 0x1e0   :  { %9987 = vmatpush3.bf16.msra.mxu1 %v13346_v10 }
 0x1e1   :  { %9989 = vmatprep.subr.bf16.mxu1 %v13371_v2 }
 0x1e2   :  { %9419 = vmatpush1.bf16.msra.mxu0 %v17280_v26 }
 0x1e3   :  { %9421 = vmatprep.subr.bf16.mxu0 %v17281_v4 }
 0x1e4   :  { %9991 = vmatpush3.bf16.msra.mxu1 %v13371_v2 }
 0x1e5   :  { %9993 = vmatprep.subr.bf16.mxu1 %v13392_v11 }
 0x1e6   :  { %9423 = vmatpush1.bf16.msra.mxu0 %v17068_v63 }
 0x1e7   :  { %9425 = vmatprep.subr.bf16.mxu0 %v17282_v28 }
 0x1e8   :  { %9995 = vmatpush3.bf16.msra.mxu1 %v13392_v11  ;;  %v17287_v11 = vand.u32 4294901760, %v14048_v3 }
 0x1e9   :  { %9997 = vmatprep.subr.bf16.mxu1 %v13407_v25 }
 0x1ea   :  { %9427 = vmatpush1.bf16.msra.mxu0 %v17283_v12  ;;  %v14086_v51 = vpack.c.bf16 %v17288_v1, %v17287_v11  ;;  %v14103_v11 = vld [vmem:[#allocation5 + $0x398] sm:$0xff]  ;;  %v14105_v1 = vld [vmem:[#allocation5 + $0x3b0] sm:$0xff] }
 0x1eb   :  { %9429 = vmatprep.subr.bf16.mxu0 %v17072_v36  ;;  %v17301_v10 = vand.u32 4294901760, %v14103_v11 }
 0x1ec   :  { %9999 = vmatpush3.bf16.msra.mxu1 %v13407_v25  ;;  %17289 = vst [vmem:[#allocation217_spill] sm:$0xff] %v14086_v51 }
 0x1ed   :  { %10001 = vmatprep.subr.bf16.mxu1 %v13434_v27 }
 0x1ee   :  { %9431 = vmatpush1.bf16.msra.mxu0 %v17074_v41  ;;  %v14179_v41 = vld [vmem:[#allocation5 + $0x440] sm:$0xff] }
 0x1ef   :  { %9433 = vmatprep.subr.bf16.mxu0 %v17075_v40  ;;  %v14177_v40 = vld [vmem:[#allocation5 + $0x428] sm:$0xff] }
 0x1f0   :  { %10003 = vmatpush3.bf16.msra.mxu1 %v13434_v27  ;;  %v17290_v27 = vand.u32 4294901760, %v14055_v0 }
 0x1f1   :  { %10005 = vmatprep.subr.bf16.mxu1 %v13453_v55 }
 0x1f2   :  { %9435 = vmatpush1.bf16.msra.mxu0 %v17080_v17  ;;  %v14096_v2 = vpack.c.bf16 %v17290_v27, %v16150_v24  ;;  %v17292_v27 = vand.u32 4294901760, %v14061_v21  ;;  %v17293_v24 = vand.u32 4294901760, %v14063_v49  ;;  %v17311_v17 = vand.u32 4294901760, %v14048_v3 }
 0x1f3   :  { %9437 = vmatprep.subr.bf16.mxu0 %v14070_v60  ;;  %v17296_v60 = vand.u32 4294901760, %v14077_v53 }
 0x1f4   :  { %10007 = vmatpush3.bf16.msra.mxu1 %v13453_v55  ;;  %17291 = vst [vmem:[#allocation108_spill] sm:$0xff] %v14096_v2  ;;  %v14107_v55 = vld [vmem:[#allocation5 + $0x390] sm:$0xff]  ;;  %v14116_v25 = vpack.c.bf16 %v17293_v24, %v17292_v27  ;;  %v17302_v27 = vand.u32 4294901760, %v14105_v1 }
 0x1f5   :  { %10009 = vmatprep.subr.bf16.mxu1 %v17233_v43  ;;  %1522 = vmatmul.mubr.f32.vlgmr.msra.gmra.mrb[0].mxu0 %v17234_v42  ;;  %v17295_v42 = vand.u32 4294901760, %v14075_v59 }
 0x1f6   :  { %17294 = vst [vmem:[#allocation112_spill] sm:$0xff] %v14116_v25  ;;  %9439 = vmatpush1.bf16.msra.mxu0 %v14086_v51  ;;  %1528 = vmatprep.mubr.f32.mxu0 %v17241_v18  ;;  %v17299_v18 = vand.u32 4294901760, %v14100_v39  ;;  %v14160_v51 = vld [vmem:[#allocation5 + $0x410] sm:$0xff] }
 0x1f7   :  { %9441 = vmatprep.subr.bf16.mxu0 %v14096_v2  ;;  %v14129_v24 = vpack.c.bf16 %v17296_v60, %v17295_v42  ;;  %v17298_v60 = vand.u32 4294901760, %v14089_v47  ;;  %v14156_v2 = vpack.c.bf16 %v17302_v27, %v17301_v10  ;;  %v14195_v27 = vsub.f32 %v14048_v3, %v17311_v17  ;;  %v14235_v3 = vld [vmem:[#allocation5 + $0x470] sm:$0xff] }
 0x1f8   :  { %10011 = vmatpush3.bf16.msra.mxu1 %v17233_v43  ;;  %v14136_v43 = vld [vmem:[#allocation5 + $0x3e0] sm:$0xff]  ;;  %v17313_v10 = vand.u32 4294901760, %v14050_v58  ;;  %v17320_v17 = vand.u32 4294901760, %v14055_v0  ;;  %v17325_v12 = vand.u32 4294901760, %v14160_v51 }
 0x1f9   :  { %17297 = vst [vmem:[#allocation115_spill] sm:$0xff] %v14129_v24  ;;  %10013 = vmatprep.subr.bf16.mxu1 %v16989_v14  ;;  %1530 = vmatmul.mubr.f32.gmra.mrb[2].mxu0 %v17243_v52  ;;  %v14150_v42 = vpack.c.bf16 %v17299_v18, %v17298_v60  ;;  %17303 = vst [vmem:[#allocation122_spill] sm:$0xff] %v14156_v2  ;;  %v14158_v14 = vld [vmem:[#allocation5 + $0x3f8] sm:$0xff]  ;;  %v16171_v52 = vmov 0.0   ;;  %v17304_v60 = vand.u32 4294901760, %v14107_v55  ;;  %v17305_v18 = vand.u32 4294901760, %v14109_v20 }
 0x1fa   :  { %9443 = vmatpush1.bf16.msra.mxu0 %v14116_v25  ;;  %1632 = vmatprep.mubr.f32.mxu0 %v16171_v52  ;;  %v17307_v52 = vand.u32 4294901760, %v14039_v23  ;;  %17312 = vst [vmem:[#allocation131_spill] sm:$0xff] %v14195_v27  ;;  %v14200_v36 = vsub.f32 %v14050_v58, %v17313_v10  ;;  %v14230_v58 = vsub.f32 %v14055_v0, %v17320_v17  ;;  %v14233_v10 = vld [vmem:[#allocation5 + $0x458] sm:$0xff]  ;;  %v17322_v0 = vand.u32 4294901760, %v14142_v6 }
 0x1fb   :  { %8840 = vmatmul.mubr.f32.vlgmr.msra.gmra.mrb[24].mxu1 %v13415_v13  ;;  %17300 = vst [vmem:[#allocation220_spill] sm:$0xff] %v14150_v42  ;;  %v14162_v13 = vld [vmem:[#allocation5 + $0x3f0] sm:$0xff]  ;;  %9445 = vmatprep.subr.bf16.mxu0 %v14129_v24  ;;  %v14170_v25 = vpack.c.bf16 %v17305_v18, %v17304_v60  ;;  %v17309_v60 = vand.u32 4294901760, %v14041_v57 }
 0x1fc   :  { %10015 = vmatpush1.bf16.msra.mxu1 %v17235_v33  ;;  %v14185_v24 = vsub.f32 %v14039_v23, %v17307_v52  ;;  %17314 = vst [vmem:[#allocation135_spill] sm:$0xff] %v14200_v36  ;;  %v17317_v52 = vand.u32 4294901760, %v14134_v44  ;;  %v17318_v33 = vand.u32 4294901760, %v14136_v43 }
 0x1fd   :  { %17306 = vst [vmem:[#allocation124_spill] sm:$0xff] %v14170_v25  ;;  %v14190_v18 = vsub.f32 %v14041_v57, %v17309_v60  ;;  %10017 = vmatprep.subr.bf16.mxu1 %v17236_v35  ;;  %v17315_v57 = vand.u32 4294901760, %v14053_v7  ;;  %v17328_v35 = vand.u32 4294901760, %v14162_v13 }
 0x1fe   :  { %17308 = vst [vmem:[#allocation125_spill] sm:$0xff] %v14185_v24  ;;  %9447 = vmatpush1.bf16.msra.mxu0 %v14150_v42  ;;  %v14221_v23 = vpack.c.bf16 %v17318_v33, %v17317_v52  ;;  %v17321_v42 = vand.u32 4294901760, %v14138_v38  ;;  %v17327_v52 = vand.u32 4294901760, %v14061_v21  ;;  %v17337_v33 = vand.u32 4294901760, %v14195_v27 }
 0x1ff   :  { %17310 = vst [vmem:[#allocation130_spill] sm:$0xff] %v14190_v18  ;;  %v14209_v60 = vsub.f32 %v14053_v7, %v17315_v57  ;;  %9449 = vmatprep.subr.bf16.mxu0 %v14156_v2  ;;  %v14223_v7 = vld [vmem:[#allocation5 + $0x420] sm:$0xff]  ;;  %v14225_v57 = vld [vmem:[#allocation5 + $0x438] sm:$0xff] }
 0x200   :  { %17319 = vst [vmem:[#allocation100_spill] sm:$0xff] %v14221_v23  ;;  %10019 = vmatpush1.bf16.msra.mxu1 %v17244_v8  ;;  %v14246_v17 = vpack.c.bf16 %v17322_v0, %v17321_v42  ;;  %v17324_v8 = vand.u32 4294901760, %v14158_v14  ;;  %v14258_v2 = vsub.f32 %v14061_v21, %v17327_v52  ;;  %v17329_v42 = vand.u32 4294901760, %v14175_v61 }
 0x201   :  { %17316 = vst [vmem:[#allocation138_spill] sm:$0xff] %v14209_v60  ;;  %10021 = vmatprep.subr.bf16.mxu1 %v17245_v34  ;;  %v17331_v34 = vand.u32 4294901760, %v14177_v40  ;;  %v17336_v21 = vand.u32 4294901760, %v14190_v18 }
 0x202   :  { %17323 = vst [vmem:[#allocation167_spill] sm:$0xff] %v14246_v17  ;;  %v14252_v28 = vpack.c.bf16 %v17325_v12, %v17324_v8  ;;  %9451 = vmatpush1.bf16.msra.mxu0 %v14170_v25  ;;  %v14265_v0 = vpack.c.bf16 %v17329_v42, %v17328_v35  ;;  %v17332_v8 = vand.u32 4294901760, %v14179_v41  ;;  %v14278_v25 = vld [vmem:[#allocation5 + $0x450] sm:$0xff]  ;;  %v17334_v42 = vand.u32 4294901760, %v14063_v49 }
 0x203   :  { %9453 = vmatprep.subr.bf16.mxu0 %v14221_v23  ;;  %v1670_v52 = vsub.f32 %v14190_v18, %v17336_v21  ;;  %v1664_v35 = vsub.f32 %v14195_v27, %v17337_v33  ;;  %v17338_v23 = vand.u32 4294901760, %v14200_v36  ;;  %v17341_v18 = vand.u32 4294901760, %v14077_v53 }
 0x204   :  { %17326 = vst [vmem:[#allocation173_spill] sm:$0xff] %v14252_v28  ;;  %17330 = vst [vmem:[#allocation65_spill] sm:$0xff] %v14265_v0  ;;  %v14271_v12 = vpack.c.bf16 %v17332_v8, %v17331_v34  ;;  %v14284_v4 = vsub.f32 %v14063_v49, %v17334_v42  ;;  %10023 = vmatpush1.bf16.msra.mxu1 %v17249_v50  ;;  %v14287_v34 = vld [vmem:[#allocation5 + $0x468] sm:$0xff]  ;;  %v17335_v8 = vand.u32 4294901760, %v14185_v24  ;;  %v17339_v42 = vand.u32 4294901760, %v14209_v60 }
 0x205   :  { %v1676_v49 = vsub.f32 %v14200_v36, %v17338_v23  ;;  %10025 = vmatprep.subr.bf16.mxu1 %v17250_v54  ;;  %v14314_v33 = vsub.f32 %v14077_v53, %v17341_v18  ;;  %v17342_v23 = vand.u32 4294901760, %v14223_v7  ;;  %v17343_v54 = vand.u32 4294901760, %v14225_v57 }
 0x206   :  { %17333 = vst [vmem:[#allocation73_spill] sm:$0xff] %v14271_v12  ;;  %v1658_v63 = vsub.f32 %v14185_v24, %v17335_v8  ;;  %v1682_v50 = vsub.f32 %v14209_v60, %v17339_v42  ;;  %v17340_v24 = vand.u32 4294901760, %v14075_v59  ;;  %9455 = vmatpush1.bf16.msra.mxu0 %v14246_v17  ;;  %v17345_v8 = vand.u32 4294901760, %v14089_v47 }
 0x207   :  { %v14321_v36 = vpack.c.bf16 %v17343_v54, %v17342_v23  ;;  %9457 = vmatprep.subr.bf16.mxu0 %v14252_v28  ;;  %v17347_v18 = vand.u32 4294901760, %v14233_v10  ;;  %v17348_v17 = vand.u32 4294901760, %v14235_v3  ;;  %v17350_v42 = vand.u32 4294901760, %v14230_v58 }
 0x208   :  { %v14309_v21 = vsub.f32 %v14075_v59, %v17340_v24  ;;  %v14327_v59 = vsub.f32 %v14089_v47, %v17345_v8  ;;  %v17346_v24 = vand.u32 4294901760, %v14100_v39  ;;  %v16205_v8 = vand.u32 4294901760, %v14284_v4  ;;  %10027 = vmatpush1.bf16.msra.mxu1 %v17254_v56 }
 0x209   :  { %17344 = vst [vmem:[#allocation259_spill] sm:$0xff] %v14321_v36  ;;  %v14339_v54 = vpack.c.bf16 %v17348_v17, %v17347_v18  ;;  %v1694_v47 = vsub.f32 %v14230_v58, %v17350_v42  ;;  %v1665_v60 = vand.u32 4294901760, %v1664_v35  ;;  %v1677_v28 = vand.u32 4294901760, %v1676_v49  ;;  %10029 = vmatprep.subr.bf16.mxu1 %v17255_v16 }
 0x20a   :  { %v14332_v53 = vsub.f32 %v14100_v39, %v17346_v24  ;;  %v1659_v39 = vand.u32 4294901760, %v1658_v63  ;;  %v1671_v24 = vand.u32 4294901760, %v1670_v52  ;;  %v1683_v27 = vand.u32 4294901760, %v1682_v50  ;;  %9459 = vmatpush1.bf16.msra.mxu0 %v14265_v0 }
 0x20b   :  { %17349 = vst [vmem:[#allocation260_spill] sm:$0xff] %v14339_v54  ;;  %v17351_v17 = vand.u32 4294901760, %v14258_v2  ;;  %v17352_v52 = vand.u32 4294901760, %v14103_v11  ;;  %v17353_v50 = vand.u32 4294901760, %v14105_v1  ;;  %9461 = vmatprep.subr.bf16.mxu0 %v14271_v12  ;;  %v1700_v26 = vsub.f32 %v14284_v4, %v16205_v8 }
 0x20c   :  { %v17354_v42 = vand.u32 4294901760, %v14107_v55  ;;  %10031 = vmatpush1.bf16.msra.mxu1 %v17259_v15  ;;  %v14387_v23 = vpack.c.bf16 %v1671_v24, %v1659_v39  ;;  %v17360_v8 = vand.u32 4294901760, %v14134_v44  ;;  %v17364_v24 = vand.u32 4294901760, %v14314_v33 }
 0x20d   :  { %v1688_v18 = vsub.f32 %v14258_v2, %v17351_v17  ;;  %v14359_v35 = vsub.f32 %v14103_v11, %v17352_v52  ;;  %v14364_v49 = vsub.f32 %v14105_v1, %v17353_v50  ;;  %v1695_v17 = vand.u32 4294901760, %v1694_v47  ;;  %10033 = vmatprep.subr.bf16.mxu1 %v17260_v45 }
 0x20e   :  { %v14373_v63 = vsub.f32 %v14107_v55, %v17354_v42  ;;  %v17355_v11 = vand.u32 4294901760, %v14109_v20  ;;  %v17356_v1 = vand.u32 4294901760, %v14278_v25  ;;  %v17357_v47 = vand.u32 4294901760, %v14287_v34  ;;  %17359 = vst [vmem:[#allocation262_spill] sm:$0xff] %v14387_v23  ;;  %9463 = vmatpush1.bf16.msra.mxu0 %v14321_v36 }
 0x20f   :  { %v14392_v55 = vsub.f32 %v14134_v44, %v17360_v8  ;;  %v17361_v42 = vand.u32 4294901760, %v14136_v43  ;;  %v1689_v15 = vand.u32 4294901760, %v1688_v18  ;;  %v17365_v44 = vand.u32 4294901760, %v14327_v59  ;;  %9465 = vmatprep.subr.bf16.mxu0 %v14339_v54 }
 0x210   :  { %v14378_v52 = vsub.f32 %v14109_v20, %v17355_v11  ;;  %v14385_v50 = vpack.c.bf16 %v17357_v47, %v17356_v1  ;;  %v14400_v11 = vpack.c.bf16 %v1677_v28, %v1665_v60  ;;  %v17363_v1 = vand.u32 4294901760, %v14309_v21  ;;  %10035 = vmatpush1.bf16.msra.mxu1 %v17264_v30 }
 0x211   :  { %v14397_v20 = vsub.f32 %v14136_v43, %v17361_v42  ;;  %v1718_v47 = vsub.f32 %v14314_v33, %v17364_v24  ;;  %v1712_v43 = vsub.f32 %v14327_v59, %v17365_v44  ;;  %v17366_v8 = vand.u32 4294901760, %v14332_v53  ;;  %10037 = vmatprep.subr.bf16.mxu1 %v17265_v29 }
 0x212   :  { %17358 = vst [vmem:[#allocation261_spill] sm:$0xff] %v14385_v50  ;;  %17362 = vst [vmem:[#allocation263_spill] sm:$0xff] %v14400_v11  ;;  %v1706_v39 = vsub.f32 %v14309_v21, %v17363_v1  ;;  %v14418_v42 = vpack.c.bf16 %v1695_v17, %v1683_v27  ;;  %v1701_v1 = vand.u32 4294901760, %v1700_v26  ;;  %v17369_v18 = vand.u32 4294901760, %v14142_v6  ;;  %9467 = vmatpush1.bf16.msra.mxu0 %v14385_v50 }
 0x213   :  { %v1724_v28 = vsub.f32 %v14332_v53, %v17366_v8  ;;  %v17368_v8 = vand.u32 4294901760, %v14138_v38  ;;  %v1719_v17 = vand.u32 4294901760, %v1718_v47  ;;  %v17370_v45 = vand.u32 4294901760, %v14158_v14  ;;  %9469 = vmatprep.subr.bf16.mxu0 %v14387_v23 }
 0x214   :  { %17367 = vst [vmem:[#allocation264_spill] sm:$0xff] %v14418_v42  ;;  %v14433_v27 = vsub.f32 %v14142_v6, %v17369_v18  ;;  %v1707_v26 = vand.u32 4294901760, %v1706_v39  ;;  %v17371_v16 = vand.u32 4294901760, %v14160_v51  ;;  %v17372_v6 = vand.u32 4294901760, %v14359_v35  ;;  %10039 = vmatpush1.bf16.msra.mxu1 %v17269_v32 }
 0x215   :  { %v14428_v60 = vsub.f32 %v14138_v38, %v17368_v8  ;;  %v14439_v44 = vsub.f32 %v14158_v14, %v17370_v45  ;;  %v1713_v38 = vand.u32 4294901760, %v1712_v43  ;;  %v1725_v8 = vand.u32 4294901760, %v1724_v28  ;;  %10041 = vmatprep.subr.bf16.mxu1 %v17270_v19 }
 0x216   :  { %v14444_v24 = vsub.f32 %v14160_v51, %v17371_v16  ;;  %v1730_v18 = vsub.f32 %v14359_v35, %v17372_v6  ;;  %v17373_v39 = vand.u32 4294901760, %v14364_v49  ;;  %v14454_v14 = vpack.c.bf16 %v1701_v1, %v1689_v15 }
 0x217   :  { %v17375_v45 = vand.u32 4294901760, %v14373_v63  ;;  %v17376_v51 = vand.u32 4294901760, %v14378_v52  ;;  %v17377_v28 = vand.u32 4294901760, %v14392_v55  ;;  %v17380_v29 = vand.u32 4294901760, %v14162_v13 }
 0x218   :  { %v1742_v47 = vsub.f32 %v14364_v49, %v17373_v39  ;;  %17374 = vst [vmem:[#allocation265_spill] sm:$0xff] %v14454_v14  ;;  %v17378_v39 = vand.u32 4294901760, %v14397_v20  ;;  %v17381_v30 = vand.u32 4294901760, %v14175_v61  ;;  %v14486_v1 = vpack.c.bf16 %v1719_v17, %v1707_v26  ;;  %10043 = vmatpush1.bf16.msra.mxu1 %v17274_v22 }
 0x219   :  { %v1736_v16 = vsub.f32 %v14373_v63, %v17375_v45  ;;  %v1748_v43 = vsub.f32 %v14378_v52, %v17376_v51  ;;  %v1754_v6 = vsub.f32 %v14392_v55, %v17377_v28  ;;  %v17379_v45 = vld [vmem:[#allocation154_spill] sm:$0xff]  ;;  %v14478_v28 = vsub.f32 %v14162_v13, %v17380_v29  ;;  %10045 = vmatprep.subr.bf16.mxu1 %v17275_v31 }
 0x21a   :  { %v1766_v23 = vsub.f32 %v14397_v20, %v17378_v39  ;;  %1638 = vmatmul.mubr.f32.vlgmr.msra.gmra.mrb[0].mxu0 %v17379_v45  ;;  %v14483_v39 = vsub.f32 %v14175_v61, %v17381_v30  ;;  %17382 = vst [vmem:[#allocation154_spill] sm:$0xff] %v14486_v1  ;;  %v14488_v15 = vpack.c.bf16 %v1725_v8, %v1713_v38  ;;  %v1731_v45 = vand.u32 4294901760, %v1730_v18 }
 0x21b   :  { %9471 = vmatpush1.bf16.msra.mxu0 %v14400_v11  ;;  %v1743_v51 = vand.u32 4294901760, %v1742_v47  ;;  %v17384_v19 = vmov 0.0   ;;  %v1737_v32 = vand.u32 4294901760, %v1736_v16  ;;  %v1749_v13 = vand.u32 4294901760, %v1748_v43 }
 0x21c   :  { %17383 = vst [vmem:[#allocation266_spill] sm:$0xff] %v14488_v15  ;;  %1643 = vmatprep.mubr.f32.mxu0 %v17384_v19  ;;  %9473 = vmatprep.subr.bf16.mxu0 %v14418_v42  ;;  %v17385_v29 = vand.u32 4294901760, %v14177_v40  ;;  %v17386_v61 = vand.u32 4294901760, %v14179_v41  ;;  %v1755_v26 = vand.u32 4294901760, %v1754_v6  ;;  %v1767_v17 = vand.u32 4294901760, %v1766_v23 }
 0x21d   :  { %v17387_v38 = vand.u32 4294901760, %v14428_v60  ;;  %v17388_v18 = vand.u32 4294901760, %v14433_v27  ;;  %10047 = vmatpush1.bf16.msra.mxu1 %v17276_v37  ;;  %v14672_v11 = vpack.c.bf16 %v14364_v49, %v14359_v35 }
 0x21e   :  { %v14495_v56 = vsub.f32 %v14177_v40, %v17385_v29  ;;  %v14500_v30 = vsub.f32 %v14179_v41, %v17386_v61  ;;  %v17389_v40 = vand.u32 4294901760, %v14439_v44  ;;  %v17390_v41 = vand.u32 4294901760, %v14444_v24  ;;  %v17391_v29 = vld [vmem:[#allocation104_spill] sm:$0xff]  ;;  %10049 = vmatprep.subr.bf16.mxu1 %v17277_v62 }
 0x21f   :  { %v1760_v8 = vsub.f32 %v14428_v60, %v17387_v38  ;;  %v1772_v47 = vsub.f32 %v14433_v27, %v17388_v18  ;;  %1649 = vmatmul.mubr.f32.gmra.mrb[2].mxu0 %v17391_v29  ;;  %v14520_v61 = vpack.c.bf16 %v1743_v51, %v1731_v45  ;;  %v17393_v38 = vand.u32 4294901760, %v14223_v7 }
 0x220   :  { %v1778_v16 = vsub.f32 %v14439_v44, %v17389_v40  ;;  %v1790_v43 = vsub.f32 %v14444_v24, %v17390_v41  ;;  %9475 = vmatpush1.bf16.msra.mxu0 %v14454_v14  ;;  %v17394_v40 = vand.u32 4294901760, %v14225_v57  ;;  %1879 = vmatprep.mubr.f32.mxu0 %v17384_v19  ;;  %v17395_v51 = vand.u32 4294901760, %v14233_v10  ;;  %v7992_v14 = vpop.f32.mrb[0].mxu1 }
 0x221   :  { %17392 = vst [vmem:[#allocation104_spill] sm:$0xff] %v14520_v61  ;;  %v14525_v18 = vsub.f32 %v14223_v7, %v17393_v38  ;;  %9477 = vmatprep.subr.bf16.mxu0 %v14486_v1  ;;  %v17396_v7 = vand.u32 4294901760, %v14235_v3  ;;  %v1761_v6 = vand.u32 4294901760, %v1760_v8  ;;  %v1773_v41 = vand.u32 4294901760, %v1772_v47  ;;  %10051 = vmatpush1.bf16.msra.mxu1 %v17051_v5 }
 0x222   :  { %v14530_v42 = vsub.f32 %v14225_v57, %v17394_v40  ;;  %v14539_v45 = vsub.f32 %v14233_v10, %v17395_v51  ;;  %v14547_v57 = vpack.c.bf16 %v1749_v13, %v1737_v32  ;;  %v14549_v40 = vpack.c.bf16 %v1767_v17, %v1755_v26  ;;  %10053 = vmatprep.subr.bf16.mxu1 %v17053_v48 }
 0x223   :  { %v14544_v38 = vsub.f32 %v14235_v3, %v17396_v7  ;;  %v1779_v29 = vand.u32 4294901760, %v1778_v16  ;;  %v1791_v23 = vand.u32 4294901760, %v1790_v43  ;;  %v17399_v10 = vand.u32 4294901760, %v14478_v28 }
 0x224   :  { %17397 = vst [vmem:[#allocation267_spill] sm:$0xff] %v14547_v57  ;;  %17398 = vst [vmem:[#allocation268_spill] sm:$0xff] %v14549_v40  ;;  %v17400_v1 = vand.u32 4294901760, %v14483_v39  ;;  %9479 = vmatpush1.bf16.msra.mxu0 %v14488_v15  ;;  %v16218_v32 = vand.u32 4294901760, %v14525_v18  ;;  %v17401_v26 = vand.u32 4294901760, %v14278_v25  ;;  %v17402_v8 = vand.u32 4294901760, %v14287_v34 }
 0x225   :  { %v1784_v51 = vsub.f32 %v14478_v28, %v17399_v10  ;;  %9481 = vmatprep.subr.bf16.mxu0 %v14520_v61  ;;  %v17404_v43 = vand.u32 4294901760, %v14500_v30  ;;  %10055 = vmatpush1.bf16.msra.mxu1 %v17278_v46  ;;  %v17437_v15 = vld [vmem:[#allocation74_spill] sm:$0xff]  ;;  %v17469_v62 = vand.u32 4294901760, %v14230_v58 }
 0x226   :  { %v1796_v3 = vsub.f32 %v14483_v39, %v17400_v1  ;;  %v14564_v17 = vsub.f32 %v14278_v25, %v17401_v26  ;;  %v14569_v47 = vsub.f32 %v14287_v34, %v17402_v8  ;;  %v17403_v1 = vand.u32 4294901760, %v14495_v56  ;;  %10057 = vmatprep.subr.bf16.mxu1 %v17279_v9 }
 0x227   :  { %v1814_v7 = vsub.f32 %v14500_v30, %v17404_v43  ;;  %v14582_v34 = vpack.c.bf16 %v1773_v41, %v1761_v6  ;;  %v14584_v26 = vpack.c.bf16 %v1791_v23, %v1779_v29  ;;  %v1785_v8 = vand.u32 4294901760, %v1784_v51 }
 0x228   :  { %v1802_v16 = vsub.f32 %v14495_v56, %v17403_v1  ;;  %v1797_v13 = vand.u32 4294901760, %v1796_v3  ;;  %9483 = vmatpush1.bf16.msra.mxu0 %v14547_v57  ;;  %v1808_v1 = vsub.f32 %v14525_v18, %v16218_v32  ;;  %v17407_v43 = vand.u32 4294901760, %v14530_v42 }
 0x229   :  { %17405 = vst [vmem:[#allocation269_spill] sm:$0xff] %v14582_v34  ;;  %17406 = vst [vmem:[#allocation270_spill] sm:$0xff] %v14584_v26  ;;  %v16221_v10 = vand.u32 4294901760, %v14564_v17  ;;  %9485 = vmatprep.subr.bf16.mxu0 %v14549_v40  ;;  %v1815_v6 = vand.u32 4294901760, %v1814_v7  ;;  %v17408_v41 = vand.u32 4294901760, %v14539_v45  ;;  %v17409_v51 = vand.u32 4294901760, %v14544_v38 }
 0x22a   :  { %v1820_v25 = vsub.f32 %v14530_v42, %v17407_v43  ;;  %v1803_v23 = vand.u32 4294901760, %v1802_v16  ;;  %v14604_v43 = vpack.c.bf16 %v1797_v13, %v1785_v8  ;;  %v1809_v32 = vand.u32 4294901760, %v1808_v1  ;;  %v17413_v13 = vld [vmem:[#allocation98_spill] sm:$0xff] }
 0x22b   :  { %v1826_v29 = vsub.f32 %v14539_v45, %v17408_v41  ;;  %v1838_v3 = vsub.f32 %v14544_v38, %v17409_v51  ;;  %v1832_v16 = vsub.f32 %v14564_v17, %v16221_v10  ;;  %v17411_v7 = vand.u32 4294901760, %v14569_v47  ;;  %10059 = vmatpush1.bf16.msra.mxu1 %v17413_v13  ;;  %v17414_v8 = vld [vmem:[#allocation106_spill] sm:$0xff] }
 0x22c   :  { %17410 = vst [vmem:[#allocation271_spill] sm:$0xff] %v14604_v43  ;;  %9487 = vmatpush1.bf16.msra.mxu0 %v14582_v34  ;;  %v1821_v61 = vand.u32 4294901760, %v1820_v25  ;;  %v14614_v51 = vpack.c.bf16 %v1815_v6, %v1803_v23  ;;  %10061 = vmatprep.subr.bf16.mxu1 %v17414_v8  ;;  %v17418_v23 = vld [vmem:[#allocation117_spill] sm:$0xff] }
 0x22d   :  { %v1844_v41 = vsub.f32 %v14569_v47, %v17411_v7  ;;  %9489 = vmatprep.subr.bf16.mxu0 %v14584_v26  ;;  %v1827_v40 = vand.u32 4294901760, %v1826_v29  ;;  %v1839_v57 = vand.u32 4294901760, %v1838_v3  ;;  %v1833_v1 = vand.u32 4294901760, %v1832_v16  ;;  %v17417_v7 = vld [vmem:[#allocation110_spill] sm:$0xff]  ;;  %v17420_v29 = vld [vmem:[#allocation125_spill] sm:$0xff]  ;;  %v17424_v16 = vld [vmem:[#allocation128_spill] sm:$0xff] }
 0x22e   :  { %17412 = vst [vmem:[#allocation272_spill] sm:$0xff] %v14614_v51  ;;  %v14619_v25 = vpack.c.bf16 %v1821_v61, %v1809_v32  ;;  %v17421_v3 = vld [vmem:[#allocation130_spill] sm:$0xff]  ;;  %v17423_v32 = vld [vmem:[#allocation120_spill] sm:$0xff]  ;;  %v17436_v26 = vld [vmem:[#allocation157_spill] sm:$0xff] }
 0x22f   :  { %v1845_v10 = vand.u32 4294901760, %v1844_v41  ;;  %v14622_v34 = vpack.c.bf16 %v1839_v57, %v1827_v40  ;;  %10063 = vmatpush1.bf16.msra.mxu1 %v17417_v7  ;;  %v14632_v61 = vpack.c.bf16 %v17421_v3, %v17420_v29  ;;  %v17425_v57 = vld [vmem:[#allocation131_spill] sm:$0xff]  ;;  %17439 = vst [vmem:[#allocation157_spill] sm:$0xff] %v14672_v11 }
 0x230   :  { %9491 = vmatpush1.bf16.msra.mxu0 %v14604_v43  ;;  %17415 = vst [vmem:[#allocation273_spill] sm:$0xff] %v14619_v25  ;;  %10065 = vmatprep.subr.bf16.mxu1 %v17418_v23  ;;  %v17426_v40 = vld [vmem:[#allocation135_spill] sm:$0xff] }
 0x231   :  { %9493 = vmatprep.subr.bf16.mxu0 %v14614_v51  ;;  %17416 = vst [vmem:[#allocation274_spill] sm:$0xff] %v14622_v34  ;;  %v14627_v6 = vpack.c.bf16 %v1845_v10, %v1833_v1  ;;  %17422 = vst [vmem:[#allocation125_spill] sm:$0xff] %v14632_v61  ;;  %v14639_v41 = vpack.c.bf16 %v17426_v40, %v17425_v57  ;;  %v17428_v10 = vld [vmem:[#allocation138_spill] sm:$0xff]  ;;  %v17432_v51 = vld [vmem:[#allocation137_spill] sm:$0xff] }
 0x232   :  { %v14644_v1 = vpack.c.bf16 %v14230_v58, %v17428_v10  ;;  %v17435_v43 = vld [vmem:[#allocation143_spill] sm:$0xff]  ;;  %v17476_v58 = vand.u32 4294901760, %v14314_v33 }
 0x233   :  { %17419 = vst [vmem:[#allocation275_spill] sm:$0xff] %v14627_v6  ;;  %10067 = vmatpush1.bf16.msra.mxu1 %v17423_v32  ;;  %17427 = vst [vmem:[#allocation130_spill] sm:$0xff] %v14639_v41 }
 0x234   :  { %9495 = vmatpush1.bf16.msra.mxu0 %v14619_v25  ;;  %10069 = vmatprep.subr.bf16.mxu1 %v17424_v16  ;;  %17429 = vst [vmem:[#allocation131_spill] sm:$0xff] %v14644_v1  ;;  %v17431_v25 = vld [vmem:[#allocation140_spill] sm:$0xff] }
 0x235   :  { %9497 = vmatprep.subr.bf16.mxu0 %v14622_v34  ;;  %v17430_v34 = vld [vmem:[#allocation132_spill] sm:$0xff] }
 0x237   :  { %10071 = vmatpush1.bf16.msra.mxu1 %v17430_v34 }
 0x238   :  { %9499 = vmatpush1.bf16.msra.mxu0 %v14627_v6  ;;  %10073 = vmatprep.subr.bf16.mxu1 %v17431_v25  ;;  %v14652_v6 = vpack.c.bf16 %v14284_v4, %v14258_v2 }
 0x239   :  { %9501 = vmatprep.subr.bf16.mxu0 %v14632_v61  ;;  %v14658_v61 = vpack.c.bf16 %v14314_v33, %v14309_v21  ;;  %v17483_v33 = vand.u32 4294901760, %v14364_v49  ;;  %v17492_v49 = vand.u32 4294901760, %v14433_v27 }
 0x23a   :  { %17433 = vst [vmem:[#allocation135_spill] sm:$0xff] %v14652_v6 }
 0x23b   :  { %1881 = vmatmul.mubr.f32.vlgmr.msra.gmra.mrb[0].mxu0 %v17432_v51  ;;  %17434 = vst [vmem:[#allocation138_spill] sm:$0xff] %v14658_v61  ;;  %10075 = vmatpush1.bf16.msra.mxu1 %v17435_v43 }
 0x23c   :  { %9503 = vmatpush1.bf16.msra.mxu0 %v14639_v41  ;;  %1886 = vmatprep.mubr.f32.mxu0 %v17384_v19  ;;  %v14666_v41 = vpack.c.bf16 %v14332_v53, %v14327_v59 }
 0x23d   :  { %9505 = vmatprep.subr.bf16.mxu0 %v14644_v1  ;;  %10077 = vmatprep.subr.bf16.mxu1 %v17436_v26  ;;  %v7993_v1 = vpop.f32.mrb[1].mxu1 }
 0x23e   :  { %17438 = vst [vmem:[#allocation137_spill] sm:$0xff] %v14666_v41  ;;  %v7994_v43 = vadd.f32 %v7993_v1, %v7992_v14  ;;  %v7995_v26 = vpop.f32.mrb[2].mxu1 }
 0x23f   :  { %1888 = vmatmul.mubr.f32.gmra.mrb[2].mxu0 %v17437_v15  ;;  %v7996_v25 = vpop.f32.mrb[3].mxu1 }
 0x240   :  { %9507 = vmatpush1.bf16.msra.mxu0 %v14652_v6  ;;  %2022 = vmatprep.mubr.f32.mxu0 %v17384_v19  ;;  %v7997_v34 = vadd.f32 %v7996_v25, %v7995_v26  ;;  %v8030_v16 = vpop.f32.mrb[4].mxu1  ;;  %v14677_v6 = vpack.c.bf16 %v14378_v52, %v14373_v63  ;;  %v14687_v26 = vpack.c.bf16 %v14433_v27, %v14428_v60  ;;  %v17501_v27 = vand.u32 4294901760, %v14500_v30 }
 0x241   :  { %9509 = vmatprep.subr.bf16.mxu0 %v14658_v61  ;;  %v8031_v32 = vpop.f32.mrb[5].mxu1  ;;  %v14682_v61 = vpack.c.bf16 %v14397_v20, %v14392_v55 }
 0x242   :  { %17440 = vst [vmem:[#allocation74_spill] sm:$0xff] %v14677_v6  ;;  %v8032_v23 = vadd.f32 %v8031_v32, %v8030_v16  ;;  %v8033_v7 = vpop.f32.mrb[6].mxu1  ;;  %17442 = vst [vmem:[#allocation277_spill] sm:$0xff] %v14687_v26 }
 0x243   :  { %17441 = vst [vmem:[#allocation276_spill] sm:$0xff] %v14682_v61  ;;  %v8034_v14 = vpop.f32.mrb[7].mxu1 }
 0x244   :  { %9511 = vmatpush1.bf16.msra.mxu0 %v14666_v41  ;;  %v2796_v1 = vadd.f32 %v8032_v23, %v7994_v43  ;;  %v8035_v8 = vadd.f32 %v8034_v14, %v8033_v7  ;;  %v8068_v25 = vpop.f32.mrb[8].mxu1  ;;  %v14697_v14 = vpack.c.bf16 %v14483_v39, %v14478_v28 }
 0x245   :  { %9513 = vmatprep.subr.bf16.mxu0 %v14672_v11  ;;  %v8069_v41 = vpop.f32.mrb[9].mxu1  ;;  %v14692_v11 = vpack.c.bf16 %v14444_v24, %v14439_v44 }
 0x246   :  { %v2803_v13 = vadd.f32 %v8035_v8, %v7997_v34  ;;  %v8070_v32 = vadd.f32 %v8069_v41, %v8068_v25  ;;  %v8071_v16 = vpop.f32.mrb[10].mxu1  ;;  %17444 = vst [vmem:[#allocation279_spill] sm:$0xff] %v14697_v14 }
 0x247   :  { %17443 = vst [vmem:[#allocation278_spill] sm:$0xff] %v14692_v11  ;;  %v8072_v9 = vpop.f32.mrb[11].mxu1 }
 0x248   :  { %9515 = vmatpush1.bf16.msra.mxu0 %v14677_v6  ;;  %v2941_v43 = vadd.f32 %v8070_v32, %v2796_v1  ;;  %v8073_v7 = vadd.f32 %v8072_v9, %v8071_v16  ;;  %v8106_v23 = vpop.f32.mrb[12].mxu1  ;;  %v14707_v16 = vpack.c.bf16 %v14530_v42, %v14525_v18 }
 0x249   :  { %9517 = vmatprep.subr.bf16.mxu0 %v14682_v61  ;;  %v8107_v6 = vpop.f32.mrb[13].mxu1  ;;  %v14702_v61 = vpack.c.bf16 %v14500_v30, %v14495_v56  ;;  %v17510_v30 = vand.u32 4294901760, %v14569_v47 }
 0x24a   :  { %v2950_v34 = vadd.f32 %v8073_v7, %v2803_v13  ;;  %v8108_v8 = vadd.f32 %v8107_v6, %v8106_v23  ;;  %v8109_v41 = vpop.f32.mrb[14].mxu1  ;;  %17446 = vst [vmem:[#allocation281_spill] sm:$0xff] %v14707_v16 }
 0x24b   :  { %17445 = vst [vmem:[#allocation280_spill] sm:$0xff] %v14702_v61  ;;  %v8110_v25 = vpop.f32.mrb[15].mxu1 }
 0x24c   :  { %9519 = vmatpush1.bf16.msra.mxu0 %v14687_v26  ;;  %v3058_v1 = vadd.f32 %v8108_v8, %v2941_v43  ;;  %v8111_v9 = vadd.f32 %v8110_v25, %v8109_v41  ;;  %v8144_v32 = vpop.f32.mrb[16].mxu1  ;;  %v14717_v25 = vpack.c.bf16 %v14569_v47, %v14564_v17  ;;  %v17517_v47 = vld [vmem:[#allocation55_spill] sm:$0xff] }
 0x24d   :  { %9521 = vmatprep.subr.bf16.mxu0 %v14692_v11  ;;  %v8145_v26 = vpop.f32.mrb[17].mxu1  ;;  %v14712_v11 = vpack.c.bf16 %v14544_v38, %v14539_v45 }
 0x24e   :  { %v3069_v13 = vadd.f32 %v8111_v9, %v2950_v34  ;;  %v8146_v6 = vadd.f32 %v8145_v26, %v8144_v32  ;;  %v8147_v7 = vpop.f32.mrb[18].mxu1  ;;  %17448 = vst [vmem:[#allocation283_spill] sm:$0xff] %v14717_v25  ;;  %v17449_v26 = vld [vmem:[#allocation216_spill] sm:$0xff]  ;;  %v17450_v9 = vld [vmem:[#allocation141_spill] sm:$0xff] }
 0x24f   :  { %17447 = vst [vmem:[#allocation282_spill] sm:$0xff] %v14712_v11  ;;  %v8148_v23 = vpop.f32.mrb[19].mxu1 }
 0x250   :  { %9523 = vmatpush1.bf16.msra.mxu0 %v14697_v14  ;;  %v3237_v43 = vadd.f32 %v8146_v6, %v3058_v1  ;;  %v8149_v8 = vadd.f32 %v8148_v23, %v8147_v7  ;;  %v8182_v41 = vpop.f32.mrb[20].mxu1  ;;  %v17451_v6 = vld [vmem:[#allocation217_spill] sm:$0xff]  ;;  %v17452_v7 = vld [vmem:[#allocation108_spill] sm:$0xff] }
 0x251   :  { %9525 = vmatprep.subr.bf16.mxu0 %v14702_v61  ;;  %v8183_v14 = vpop.f32.mrb[21].mxu1  ;;  %v17459_v23 = vld [vmem:[#allocation100_spill] sm:$0xff] }
 0x252   :  { %v3244_v61 = vadd.f32 %v8149_v8, %v3069_v13  ;;  %v8184_v46 = vadd.f32 %v8183_v14, %v8182_v41  ;;  %v8185_v48 = vpop.f32.mrb[22].mxu1  ;;  %v17453_v14 = vld [vmem:[#allocation163_spill] sm:$0xff]  ;;  %v17454_v13 = vld [vmem:[#allocation112_spill] sm:$0xff]  ;;  %v17461_v8 = vld [vmem:[#allocation173_spill] sm:$0xff]  ;;  %v17462_v41 = vand.u32 4294901760, %v17420_v29 }
 0x253   :  { %v8186_v5 = vpop.f32.mrb[23].mxu1  ;;  %v17471_v29 = vld [vmem:[#allocation144_spill] sm:$0xff] }
 0x254   :  { %9527 = vmatpush1.bf16.msra.mxu0 %v14707_v16  ;;  %v8187_v34 = vadd.f32 %v8186_v5, %v8185_v48  ;;  %v14725_v32 = vadd.f32 %v8184_v46, %v3237_v43  ;;  %v17455_v5 = vld [vmem:[#allocation115_spill] sm:$0xff]  ;;  %v17456_v48 = vld [vmem:[#allocation220_spill] sm:$0xff]  ;;  %v17468_v16 = vand.u32 4294901760, %v17428_v10 }
 0x255   :  { %9529 = vmatprep.subr.bf16.mxu0 %v14712_v11  ;;  %v17458_v46 = vld [vmem:[#allocation124_spill] sm:$0xff]  ;;  %v17460_v43 = vld [vmem:[#allocation167_spill] sm:$0xff] }
 0x256   :  { %v14722_v1 = vadd.f32 %v8187_v34, %v3244_v61  ;;  %v17457_v61 = vld [vmem:[#allocation122_spill] sm:$0xff]  ;;  %v17463_v34 = vand.u32 4294901760, %v17421_v3  ;;  %v14762_v37 = vpack.c.bf16 %v17469_v62, %v17468_v16  ;;  %v17472_v3 = vand.u32 4294901760, %v14258_v2  ;;  %v17478_v10 = vld [vmem:[#allocation171_spill] sm:$0xff] }
 0x257   :  { %v17479_v2 = vand.u32 4294901760, %v14327_v59  ;;  %v17486_v59 = vand.u32 4294901760, %v14378_v52  ;;  %v17495_v52 = vand.u32 4294901760, %v14444_v24  ;;  %v17503_v24 = vand.u32 4294901760, %v14525_v18  ;;  %v17513_v18 = vld [vmem:[#allocation37_spill] sm:$0xff] }
 0x258   :  { %9531 = vmatpush1.bf16.msra.mxu0 %v14717_v25  ;;  %v17466_v25 = vand.u32 4294901760, %v17426_v40  ;;  %17470 = vst [vmem:[#allocation284_spill] sm:$0xff] %v14762_v37  ;;  %v17475_v40 = vand.u32 4294901760, %v14309_v21  ;;  %v17482_v21 = vand.u32 4294901760, %v14359_v35  ;;  %v17491_v35 = vand.u32 4294901760, %v14428_v60 }
 0x259   :  { %9533 = vmatprep.subr.bf16.mxu0 %v17449_v26  ;;  %v17500_v60 = vand.u32 4294901760, %v14495_v56  ;;  %v17509_v56 = vand.u32 4294901760, %v14564_v17  ;;  %v17516_v17 = vld [vmem:[#allocation51_spill] sm:$0xff] }
 0x25a   :  { %v14778_v62 = vpack.c.bf16 %v17476_v58, %v17475_v40 }
 0x25b   :  { %2025 = vmatmul.mubr.f32.vlgmr.msra.gmra.mrb[0].mxu0 %v17450_v9  ;;  %v14748_v9 = vpack.c.bf16 %v17463_v34, %v17462_v41  ;;  %v17485_v34 = vand.u32 4294901760, %v14373_v63  ;;  %v17494_v63 = vand.u32 4294901760, %v14439_v44  ;;  %v17504_v44 = vand.u32 4294901760, %v14530_v42  ;;  %v17512_v42 = vld [vmem:[#allocation34_spill] sm:$0xff] }
 0x25c   :  { %9535 = vmatpush1.bf16.msra.mxu0 %v17451_v6  ;;  %2030 = vmatprep.mubr.f32.mxu0 %v17384_v19  ;;  %17477 = vst [vmem:[#allocation285_spill] sm:$0xff] %v14778_v62 }
 0x25d   :  { %9537 = vmatprep.subr.bf16.mxu0 %v17452_v7  ;;  %17464 = vst [vmem:[#allocation141_spill] sm:$0xff] %v14748_v9  ;;  %v14822_v40 = vpack.c.bf16 %v17495_v52, %v17494_v63 }
 0x25f   :  { %2033 = vmatmul.mubr.f32.gmra.mrb[2].mxu0 %v17453_v14  ;;  %v17465_v14 = vand.u32 4294901760, %v17425_v57  ;;  %v17473_v57 = vand.u32 4294901760, %v14284_v4  ;;  %v17480_v4 = vand.u32 4294901760, %v14332_v53  ;;  %v17488_v53 = vand.u32 4294901760, %v14392_v55  ;;  %17496 = vst [vmem:[#allocation290_spill] sm:$0xff] %v14822_v40 }
 0x260   :  { %9539 = vmatpush1.bf16.msra.mxu0 %v17454_v13  ;;  %2135 = vmatprep.mubr.f32.mxu0 %v17384_v19  ;;  %v17497_v55 = vand.u32 4294901760, %v14478_v28  ;;  %v17506_v28 = vand.u32 4294901760, %v14539_v45  ;;  %v17514_v45 = vld [vmem:[#allocation42_spill] sm:$0xff] }
 0x261   :  { %9541 = vmatprep.subr.bf16.mxu0 %v17455_v5  ;;  %v14755_v11 = vpack.c.bf16 %v17466_v25, %v17465_v14  ;;  %v14770_v41 = vpack.c.bf16 %v17473_v57, %v17472_v3  ;;  %v14786_v16 = vpack.c.bf16 %v17480_v4, %v17479_v2  ;;  %v14794_v25 = vpack.c.bf16 %v17483_v33, %v17482_v21  ;;  %v17518_v33 = vld [vmem:[#allocation60_spill] sm:$0xff] }
 0x262   :  { %v14801_v14 = vpack.c.bf16 %v17486_v59, %v17485_v34  ;;  %v14815_v57 = vpack.c.bf16 %v17492_v49, %v17491_v35  ;;  %v14843_v2 = vpack.c.bf16 %v17504_v44, %v17503_v24  ;;  %v14857_v21 = vpack.c.bf16 %v17510_v30, %v17509_v56  ;;  %v17519_v34 = vld [vmem:[#allocation63_spill] sm:$0xff]  ;;  %v17520_v59 = vld [vmem:[#allocation68_spill] sm:$0xff] }
 0x263   :  { %17467 = vst [vmem:[#allocation163_spill] sm:$0xff] %v14755_v11  ;;  %17474 = vst [vmem:[#allocation144_spill] sm:$0xff] %v14770_v41  ;;  %v17524_v35 = vld [vmem:[#allocation87_spill] sm:$0xff] }
 0x264   :  { %9543 = vmatpush1.bf16.msra.mxu0 %v17456_v48  ;;  %17481 = vst [vmem:[#allocation171_spill] sm:$0xff] %v14786_v16  ;;  %17484 = vst [vmem:[#allocation286_spill] sm:$0xff] %v14794_v25  ;;  %v11133_v56 = vld [vmem:[#allocation2] sm:$0xff] }
 0x265   :  { %9545 = vmatprep.subr.bf16.mxu0 %v17457_v61  ;;  %17487 = vst [vmem:[#allocation287_spill] sm:$0xff] %v14801_v14  ;;  %17493 = vst [vmem:[#allocation289_spill] sm:$0xff] %v14815_v57 }
 0x266   :  { %17505 = vst [vmem:[#allocation293_spill] sm:$0xff] %v14843_v2  ;;  %17511 = vst [vmem:[#allocation295_spill] sm:$0xff] %v14857_v21 }
 0x268   :  { %9547 = vmatpush1.bf16.msra.mxu0 %v17458_v46 }
 0x269   :  { %9549 = vmatprep.subr.bf16.mxu0 %v17459_v23 }
 0x26c   :  { %9551 = vmatpush1.bf16.msra.mxu0 %v17460_v43 }
 0x26d   :  { %9553 = vmatprep.subr.bf16.mxu0 %v17461_v8 }
 0x270   :  { %9555 = vmatpush1.bf16.msra.mxu0 %v14265_v0 }
 0x271   :  { %9557 = vmatprep.subr.bf16.mxu0 %v14271_v12 }
 0x274   :  { %9559 = vmatpush1.bf16.msra.mxu0 %v14321_v36 }
 0x275   :  { %9561 = vmatprep.subr.bf16.mxu0 %v14339_v54 }
 0x278   :  { %9563 = vmatpush1.bf16.msra.mxu0 %v14385_v50 }
 0x279   :  { %9565 = vmatprep.subr.bf16.mxu0 %v14748_v9  ;;  %v17674_v9 = vld [vmem:[#allocation75_spill] sm:$0xff] }
 0x27b   :  { %2139 = vmatmul.mubr.f32.vlgmr.msra.gmra.mrb[0].mxu0 %v17471_v29  ;;  %v17489_v29 = vand.u32 4294901760, %v14397_v20  ;;  %v17498_v20 = vand.u32 4294901760, %v14483_v39  ;;  %v17507_v39 = vand.u32 4294901760, %v14544_v38  ;;  %v17515_v38 = vld [vmem:[#allocation46_spill] sm:$0xff] }
 0x27c   :  { %9567 = vmatpush1.bf16.msra.mxu0 %v14755_v11  ;;  %2144 = vmatprep.mubr.f32.mxu0 %v17384_v19  ;;  %v17673_v11 = vld [vmem:[#allocation117_spill] sm:$0xff] }
 0x27d   :  { %9569 = vmatprep.subr.bf16.mxu0 %v14762_v37  ;;  %v14808_v3 = vpack.c.bf16 %v17489_v29, %v17488_v53  ;;  %v14829_v58 = vpack.c.bf16 %v17498_v20, %v17497_v55  ;;  %v14850_v4 = vpack.c.bf16 %v17507_v39, %v17506_v28  ;;  %v17522_v53 = vld [vmem:[#allocation79_spill] sm:$0xff]  ;;  %v17523_v29 = vld [vmem:[#allocation82_spill] sm:$0xff]  ;;  %v17526_v20 = vld [vmem:[#allocation93_spill] sm:$0xff] }
 0x27e   :  { %v17525_v55 = vld [vmem:[#allocation90_spill] sm:$0xff] }
 0x27f   :  { %2148 = vmatmul.mubr.f32.gmra.mrb[2].mxu0 %v17478_v10  ;;  %17490 = vst [vmem:[#allocation288_spill] sm:$0xff] %v14808_v3  ;;  %17499 = vst [vmem:[#allocation291_spill] sm:$0xff] %v14829_v58  ;;  %v14836_v10 = vpack.c.bf16 %v17501_v27, %v17500_v60  ;;  %v17527_v60 = vld [vmem:[#allocation96_spill] sm:$0xff]  ;;  %v17528_v27 = vld [vmem:[#allocation109_spill] sm:$0xff] }
 0x280   :  { %9571 = vmatpush1.bf16.msra.mxu0 %v14770_v41  ;;  %2314 = vmatprep.mubr.f32.mxu0 %v17384_v19  ;;  %17508 = vst [vmem:[#allocation294_spill] sm:$0xff] %v14850_v4  ;;  %v17669_v41 = vld [vmem:[#allocation106_spill] sm:$0xff] }
 0x281   :  { %9573 = vmatprep.subr.bf16.mxu0 %v14778_v62  ;;  %17502 = vst [vmem:[#allocation292_spill] sm:$0xff] %v14836_v10  ;;  %v17534_v62 = vld [vmem:[#allocation127_spill] sm:$0xff]  ;;  %v17672_v37 = vld [vmem:[#allocation110_spill] sm:$0xff] }
 0x284   :  { %9575 = vmatpush1.bf16.msra.mxu0 %v14786_v16  ;;  %v17532_v16 = vld [vmem:[#allocation126_spill] sm:$0xff] }
 0x285   :  { %9577 = vmatprep.subr.bf16.mxu0 %v14794_v25 }
 0x288   :  { %9579 = vmatpush1.bf16.msra.mxu0 %v14801_v14  ;;  %v17530_v14 = vld [vmem:[#allocation116_spill] sm:$0xff] }
 0x289   :  { %9581 = vmatprep.subr.bf16.mxu0 %v14808_v3 }
 0x28c   :  { %9583 = vmatpush1.bf16.msra.mxu0 %v14815_v57 }
 0x28d   :  { %9585 = vmatprep.subr.bf16.mxu0 %v14822_v40  ;;  %v11135_v40 = vld [vmem:[#allocation2 + $0x18] sm:$0xff] }
 0x290   :  { %9587 = vmatpush1.bf16.msra.mxu0 %v14829_v58 }
 0x291   :  { %9589 = vmatprep.subr.bf16.mxu0 %v14836_v10 }
 0x294   :  { %9591 = vmatpush1.bf16.msra.mxu0 %v14843_v2 }
 0x295   :  { %9593 = vmatprep.subr.bf16.mxu0 %v14850_v4 }
 0x298   :  { %9595 = vmatpush1.bf16.msra.mxu0 %v14857_v21 }
 0x299   :  { %9597 = vmatprep.subr.bf16.mxu0 %v17449_v26  ;;  %v17726_v26 = vld [vmem:[#allocation44_spill] sm:$0xff] }
 0x29b   :  { %2316 = vmatmul.mubr.f32.vlgmr.msra.gmra.mrb[0].mxu0 %v17432_v51 }
 0x29c   :  { %9599 = vmatpush1.bf16.msra.mxu0 %v17451_v6  ;;  %2321 = vmatprep.mubr.f32.mxu0 %v17384_v19 }
 0x29d   :  { %9601 = vmatprep.subr.bf16.mxu0 %v17452_v7  ;;  %v17700_v7 = vld [vmem:[#allocation35_spill] sm:$0xff] }
 0x29f   :  { %2323 = vmatmul.mubr.f32.gmra.mrb[2].mxu0 %v17437_v15 }
 0x2a0   :  { %9603 = vmatpush1.bf16.msra.mxu0 %v17454_v13  ;;  %2425 = vmatprep.mubr.f32.mxu0 %v17384_v19  ;;  %v17698_v13 = vld [vmem:[#allocation31_spill] sm:$0xff] }
 0x2a1   :  { %9605 = vmatprep.subr.bf16.mxu0 %v17455_v5  ;;  %v17686_v5 = vld [vmem:[#allocation252_spill] sm:$0xff] }
 0x2a4   :  { %9607 = vmatpush1.bf16.msra.mxu0 %v17456_v48  ;;  %v17685_v48 = vld [vmem:[#allocation251_spill] sm:$0xff] }
 0x2a5   :  { %9609 = vmatprep.subr.bf16.mxu0 %v17457_v61  ;;  %v17684_v61 = vld [vmem:[#allocation177_spill] sm:$0xff] }
 0x2a8   :  { %9611 = vmatpush1.bf16.msra.mxu0 %v17458_v46 }
 0x2a9   :  { %9613 = vmatprep.subr.bf16.mxu0 %v17459_v23  ;;  %v17682_v23 = vld [vmem:[#allocation249_spill] sm:$0xff] }
 0x2ac   :  { %9615 = vmatpush1.bf16.msra.mxu0 %v17460_v43  ;;  %v17681_v43 = vld [vmem:[#allocation143_spill] sm:$0xff] }
 0x2ad   :  { %9617 = vmatprep.subr.bf16.mxu0 %v17461_v8 }
 0x2b0   :  { %9619 = vmatpush1.bf16.msra.mxu0 %v14265_v0  ;;  %v17679_v0 = vld [vmem:[#allocation140_spill] sm:$0xff] }
 0x2b1   :  { %9621 = vmatprep.subr.bf16.mxu0 %v14271_v12  ;;  %v17678_v12 = vld [vmem:[#allocation132_spill] sm:$0xff] }
 0x2b4   :  { %9623 = vmatpush1.bf16.msra.mxu0 %v14321_v36  ;;  %v17677_v36 = vld [vmem:[#allocation168_spill] sm:$0xff] }
 0x2b5   :  { %9625 = vmatprep.subr.bf16.mxu0 %v14339_v54 }
 0x2b8   :  { %9627 = vmatpush1.bf16.msra.mxu0 %v14385_v50  ;;  %v17676_v50 = vld [vmem:[#allocation128_spill] sm:$0xff] }
 0x2b9   :  { %10589 = vmatprep.subr.bf16.mxu0 %v17512_v42 }
 0x2bb   :  { %2427 = vmatmul.mubr.f32.vlgmr.msra.gmra.mrb[0].mxu0 %v17432_v51  ;;  %v17521_v51 = vld [vmem:[#allocation72_spill] sm:$0xff] }
 0x2bc   :  { %2432 = vmatprep.mubr.f32.mxu0 %v17384_v19  ;;  %10591 = vmatpush3.bf16.msra.mxu0 %v17513_v18 }
 0x2bd   :  { %10593 = vmatprep.subr.bf16.mxu0 %v17514_v45 }
 0x2bf   :  { %2434 = vmatmul.mubr.f32.gmra.mrb[2].mxu0 %v17437_v15 }
 0x2c0   :  { %10595 = vmatpush3.bf16.msra.mxu0 %v17515_v38 }
 0x2c1   :  { %10597 = vmatprep.subr.bf16.mxu0 %v17516_v17 }
 0x2c4   :  { %10599 = vmatpush3.bf16.msra.mxu0 %v17517_v47 }
 0x2c5   :  { %10601 = vmatprep.subr.bf16.mxu0 %v17518_v33 }
 0x2c8   :  { %10603 = vmatpush3.bf16.msra.mxu0 %v17519_v34 }
 0x2c9   :  { %10605 = vmatprep.subr.bf16.mxu0 %v17520_v59 }
 0x2cc   :  { %10607 = vmatpush3.bf16.msra.mxu0 %v17521_v51 }
 0x2cd   :  { %10609 = vmatprep.subr.bf16.mxu0 %v17522_v53 }
 0x2ce   :  { %v8841_v15 = vpop.f32.mrb[24].mxu1 }
 0x2cf   :  { %v14898_v49 = vadd.f32 %v8841_v15, %v14722_v1  ;;  %v4032_v63 = vpop.f32.mrb[25].mxu1  ;;  %v11134_v1 = vld [vmem:[#allocation2 + $0x8] sm:$0xff] }
 0x2d0   :  { %10611 = vmatpush3.bf16.msra.mxu0 %v17523_v29  ;;  %v14901_v52 = vadd.f32 %v4032_v63, %v14725_v32 }
 0x2d1   :  { %10613 = vmatprep.subr.bf16.mxu0 %v17524_v35 }
 0x2d4   :  { %10615 = vmatpush3.bf16.msra.mxu0 %v17525_v55 }
 0x2d5   :  { %10617 = vmatprep.subr.bf16.mxu0 %v17526_v20 }
 0x2d8   :  { %10619 = vmatpush3.bf16.msra.mxu0 %v17527_v60 }
 0x2d9   :  { %10621 = vmatprep.subr.bf16.mxu0 %v17528_v27  ;;  %v11136_v27 = vld [vmem:[#allocation2 + $0x20] sm:$0xff] }
 0x38e   :  { %v2428_v24 = vpop.f32.mrb[0].mxu0 }
 0x38f   :  { %v4042_v44 = vmul.f32 0.020833334, %v2428_v24  ;;  %v2430_v28 = vpop.f32.mrb[1].mxu0 }
 0x390   :  { %v4043_v39 = vmul.f32 0.020833334, %v2430_v28 }
 0x391   :  { %v4048_v30 = vsub.f32 %v11133_v56, %v4042_v44 }
 0x392   :  { %v4049_v15 = vsub.f32 %v11134_v1, %v4043_v39  ;;  %v2435_v21 = vpop.f32.mrb[2].mxu0 }
 0x393   :  { %v4054_v4 = vmul.f32 %v4048_v30, %v4048_v30  ;;  %v4045_v32 = vmul.f32 0.020833334, %v2435_v21  ;;  %v2437_v63 = vpop.f32.mrb[3].mxu0 }
 0x394   :  { %v4055_v2 = vmul.f32 %v4049_v15, %v4049_v15  ;;  %v4046_v10 = vmul.f32 0.020833334, %v2437_v63 }
 0x395   :  { %v14907_v58 = vand.u32 4294901760, %v4054_v4  ;;  %v4051_v57 = vsub.f32 %v11135_v40, %v4045_v32 }
 0x396   :  { %v14909_v3 = vand.u32 4294901760, %v4055_v2  ;;  %v4052_v24 = vsub.f32 %v11136_v27, %v4046_v10 }
 0x397   :  { %v14912_v28 = vsub.f32 %v4054_v4, %v14907_v58  ;;  %v4057_v44 = vmul.f32 %v4051_v57, %v4051_v57 }
 0x398   :  { %v14915_v39 = vsub.f32 %v4055_v2, %v14909_v3  ;;  %v4058_v56 = vmul.f32 %v4052_v24, %v4052_v24 }
 0x399   :  { %v14917_v21 = vand.u32 4294901760, %v4057_v44  ;;  %v14920_v30 = vand.u32 4294901760, %v14912_v28 }
 0x39a   :  { %v14922_v1 = vand.u32 4294901760, %v4058_v56  ;;  %v14925_v40 = vand.u32 4294901760, %v14915_v39 }
 0x39b   :  { %v14928_v10 = vsub.f32 %v4057_v44, %v14917_v21  ;;  %v4197_v57 = vsub.f32 %v14912_v28, %v14920_v30 }
 0x39c   :  { %v14933_v2 = vsub.f32 %v4058_v56, %v14922_v1  ;;  %v4191_v4 = vsub.f32 %v14915_v39, %v14925_v40  ;;  %v17529_v56 = vld [vmem:[#allocation160_spill] sm:$0xff] }
 0x39d   :  { %v14938_v15 = vand.u32 4294901760, %v14928_v10  ;;  %v4198_v27 = vand.u32 4294901760, %v4197_v57 }
 0x39e   :  { %v4192_v32 = vand.u32 4294901760, %v4191_v4  ;;  %v14941_v63 = vand.u32 4294901760, %v14933_v2  ;;  %v17531_v4 = vld [vmem:[#allocation164_spill] sm:$0xff] }
 0x39f   :  { %v4213_v24 = vsub.f32 %v14928_v10, %v14938_v15 }
 0x3a0   :  { %4193 = vmatprep.mubr.f32.mxu1 %v4192_v32  ;;  %6411 = vmatprep.mubr.f32.mxu0 %v4192_v32  ;;  %v4207_v44 = vsub.f32 %v14933_v2, %v14941_v63  ;;  %v17533_v32 = vld [vmem:[#allocation165_spill] sm:$0xff] }
 0x3a1   :  { %4199 = vmatmul.mubr.f32.vlgmr.msra.gmra.mrb[26].mxu1 %v4198_v27  ;;  %6417 = vmatmul.mubr.f32.vlgmr.msra.gmra.mrb[4].mxu0 %v4198_v27  ;;  %v4214_v57 = vand.u32 4294901760, %v4213_v24  ;;  %v17535_v27 = vld [vmem:[#allocation172_spill] sm:$0xff]  ;;  %v17539_v24 = vld [vmem:[#allocation185_spill] sm:$0xff] }
 0x3a2   :  { %10079 = vmatpush1.bf16.msra.mxu1 %v17529_v56  ;;  %10623 = vmatpush3.bf16.msra.mxu0 %v17530_v14  ;;  %v4208_v25 = vand.u32 4294901760, %v4207_v44  ;;  %v17536_v14 = vld [vmem:[#allocation136_spill] sm:$0xff]  ;;  %v17537_v44 = vld [vmem:[#allocation178_spill] sm:$0xff]  ;;  %v17541_v56 = vld [vmem:[#allocation187_spill] sm:$0xff] }
 0x3a3   :  { %10081 = vmatprep.subr.bf16.mxu1 %v17531_v4  ;;  %10625 = vmatprep.subr.bf16.mxu0 %v17532_v16  ;;  %v17538_v16 = vld [vmem:[#allocation139_spill] sm:$0xff]  ;;  %v17542_v4 = vld [vmem:[#allocation149_spill] sm:$0xff] }
 0x3a4   :  { %4209 = vmatprep.mubr.f32.mxu1 %v4208_v25  ;;  %6426 = vmatprep.mubr.f32.mxu0 %v4208_v25  ;;  %v17540_v25 = vld [vmem:[#allocation146_spill] sm:$0xff] }
 0x3a5   :  { %4215 = vmatmul.mubr.f32.gmra.mrb[28].mxu1 %v4214_v57  ;;  %6432 = vmatmul.mubr.f32.gmra.mrb[6].mxu0 %v4214_v57  ;;  %v17544_v57 = vld [vmem:[#allocation152_spill] sm:$0xff] }
 0x3a6   :  { %10083 = vmatpush1.bf16.msra.mxu1 %v17533_v32  ;;  %10627 = vmatpush3.bf16.msra.mxu0 %v17534_v62  ;;  %v17543_v62 = vld [vmem:[#allocation188_spill] sm:$0xff]  ;;  %v17545_v32 = vld [vmem:[#allocation190_spill] sm:$0xff] }
 0x3a7   :  { %4606 = vmatprep.mubr.f32.mxu1 %v14909_v3  ;;  %6662 = vmatprep.mubr.f32.mxu0 %v14909_v3 }
 0x3a8   :  { %10085 = vmatprep.subr.bf16.mxu1 %v17535_v27  ;;  %10629 = vmatprep.subr.bf16.mxu0 %v17536_v14  ;;  %v17546_v27 = vld [vmem:[#allocation155_spill] sm:$0xff]  ;;  %v17547_v14 = vld [vmem:[#allocation193_spill] sm:$0xff] }
 0x3aa   :  { %10087 = vmatpush1.bf16.msra.mxu1 %v17537_v44  ;;  %10631 = vmatpush3.bf16.msra.mxu0 %v17538_v16  ;;  %v17548_v44 = vld [vmem:[#allocation161_spill] sm:$0xff]  ;;  %v17549_v16 = vld [vmem:[#allocation194_spill] sm:$0xff] }
 0x3ab   :  { %10089 = vmatprep.subr.bf16.mxu1 %v17539_v24  ;;  %10633 = vmatprep.subr.bf16.mxu0 %v17540_v25  ;;  %v17550_v24 = vld [vmem:[#allocation162_spill] sm:$0xff]  ;;  %v17551_v25 = vld [vmem:[#allocation196_spill] sm:$0xff] }
 0x3ae   :  { %10091 = vmatpush1.bf16.msra.mxu1 %v17541_v56  ;;  %10635 = vmatpush3.bf16.msra.mxu0 %v17542_v4  ;;  %v17552_v56 = vld [vmem:[#allocation166_spill] sm:$0xff]  ;;  %v17553_v4 = vld [vmem:[#allocation199_spill] sm:$0xff] }
 0x3af   :  { %10093 = vmatprep.subr.bf16.mxu1 %v17543_v62  ;;  %10637 = vmatprep.subr.bf16.mxu0 %v17544_v57  ;;  %v17554_v62 = vld [vmem:[#allocation169_spill] sm:$0xff] }
 0x3b0   :  { %v17555_v57 = vld [vmem:[#allocation201_spill] sm:$0xff] }
 0x3b2   :  { %10095 = vmatpush1.bf16.msra.mxu1 %v17545_v32  ;;  %10639 = vmatpush3.bf16.msra.mxu0 %v17546_v27  ;;  %v17556_v32 = vld [vmem:[#allocation180_spill] sm:$0xff]  ;;  %v17557_v27 = vld [vmem:[#allocation202_spill] sm:$0xff] }
 0x3b3   :  { %10097 = vmatprep.subr.bf16.mxu1 %v17547_v14  ;;  %10641 = vmatprep.subr.bf16.mxu0 %v17548_v44  ;;  %v17558_v14 = vld [vmem:[#allocation183_spill] sm:$0xff]  ;;  %v17559_v44 = vld [vmem:[#allocation205_spill] sm:$0xff] }
 0x3b6   :  { %10099 = vmatpush1.bf16.msra.mxu1 %v17549_v16  ;;  %10643 = vmatpush3.bf16.msra.mxu0 %v17550_v24  ;;  %v17560_v16 = vld [vmem:[#allocation181_spill] sm:$0xff]  ;;  %v17561_v24 = vld [vmem:[#allocation206_spill] sm:$0xff] }
 0x3b7   :  { %10101 = vmatprep.subr.bf16.mxu1 %v17551_v25  ;;  %10645 = vmatprep.subr.bf16.mxu0 %v17552_v56  ;;  %v17562_v25 = vld [vmem:[#allocation182_spill] sm:$0xff]  ;;  %v17563_v56 = vld [vmem:[#allocation209_spill] sm:$0xff] }
 0x3ba   :  { %10103 = vmatpush1.bf16.msra.mxu1 %v17553_v4  ;;  %10647 = vmatpush3.bf16.msra.mxu0 %v17554_v62  ;;  %v17564_v4 = vld [vmem:[#allocation184_spill] sm:$0xff]  ;;  %v17565_v62 = vld [vmem:[#allocation210_spill] sm:$0xff] }
 0x3bb   :  { %10105 = vmatprep.subr.bf16.mxu1 %v17555_v57  ;;  %10649 = vmatprep.subr.bf16.mxu0 %v17556_v32  ;;  %v17566_v57 = vld [vmem:[#allocation186_spill] sm:$0xff]  ;;  %v17567_v32 = vld [vmem:[#allocation212_spill] sm:$0xff] }
 0x3be   :  { %10107 = vmatpush1.bf16.msra.mxu1 %v17557_v27  ;;  %10651 = vmatpush3.bf16.msra.mxu0 %v17558_v14  ;;  %v17568_v27 = vld [vmem:[#allocation189_spill] sm:$0xff] }
 0x3bf   :  { %10109 = vmatprep.subr.bf16.mxu1 %v17559_v44  ;;  %10653 = vmatprep.subr.bf16.mxu0 %v17560_v16  ;;  %v17569_v14 = vld [vmem:[#allocation213_spill] sm:$0xff]  ;;  %v17570_v44 = vld [vmem:[#allocation191_spill] sm:$0xff]  ;;  %v17571_v16 = vld [vmem:[#allocation218_spill] sm:$0xff] }
 0x3c1   :  { %6664 = vmatmul.mubr.f32.vlgmr.msra.gmra.mrb[8].mxu0 %v14907_v58 }
 0x3c2   :  { %10111 = vmatpush1.bf16.msra.mxu1 %v17561_v24  ;;  %6669 = vmatprep.mubr.f32.mxu0 %v14922_v1  ;;  %v17572_v24 = vld [vmem:[#allocation192_spill] sm:$0xff] }
 0x3c3   :  { %10655 = vmatpush3.bf16.msra.mxu0 %v17562_v25  ;;  %10113 = vmatprep.subr.bf16.mxu1 %v17563_v56  ;;  %v17573_v25 = vld [vmem:[#allocation219_spill] sm:$0xff] }
 0x3c4   :  { %10657 = vmatprep.subr.bf16.mxu0 %v17564_v4  ;;  %v17574_v56 = vld [vmem:[#allocation195_spill] sm:$0xff]  ;;  %v17575_v4 = vld [vmem:[#allocation221_spill] sm:$0xff] }
 0x3c5   :  { %6671 = vmatmul.mubr.f32.gmra.mrb[10].mxu0 %v14917_v21 }
 0x3c6   :  { %10115 = vmatpush1.bf16.msra.mxu1 %v17565_v62  ;;  %6806 = vmatprep.mubr.f32.mxu0 %v14915_v39  ;;  %v17576_v62 = vld [vmem:[#allocation197_spill] sm:$0xff] }
 0x3c7   :  { %10659 = vmatpush3.bf16.msra.mxu0 %v17566_v57  ;;  %10117 = vmatprep.subr.bf16.mxu1 %v17567_v32  ;;  %v17577_v57 = vld [vmem:[#allocation222_spill] sm:$0xff] }
 0x3c8   :  { %10661 = vmatprep.subr.bf16.mxu0 %v17568_v27  ;;  %v17578_v32 = vld [vmem:[#allocation198_spill] sm:$0xff]  ;;  %v17579_v27 = vld [vmem:[#allocation223_spill] sm:$0xff] }
 0x3ca   :  { %10119 = vmatpush1.bf16.msra.mxu1 %v17569_v14  ;;  %v17580_v14 = vld [vmem:[#allocation200_spill] sm:$0xff] }
 0x3cb   :  { %10663 = vmatpush3.bf16.msra.mxu0 %v17570_v44  ;;  %10121 = vmatprep.subr.bf16.mxu1 %v17571_v16  ;;  %v17581_v44 = vld [vmem:[#allocation224_spill] sm:$0xff]  ;;  %v17582_v16 = vld [vmem:[#allocation203_spill] sm:$0xff] }
 0x3cc   :  { %10665 = vmatprep.subr.bf16.mxu0 %v17572_v24  ;;  %v17583_v24 = vld [vmem:[#allocation225_spill] sm:$0xff] }
 0x3ce   :  { %10123 = vmatpush1.bf16.msra.mxu1 %v17573_v25  ;;  %v17584_v25 = vld [vmem:[#allocation204_spill] sm:$0xff] }
 0x3cf   :  { %10667 = vmatpush3.bf16.msra.mxu0 %v17574_v56  ;;  %10125 = vmatprep.subr.bf16.mxu1 %v17575_v4  ;;  %v17585_v56 = vld [vmem:[#allocation226_spill] sm:$0xff]  ;;  %v17586_v4 = vld [vmem:[#allocation207_spill] sm:$0xff] }
 0x3d0   :  { %10669 = vmatprep.subr.bf16.mxu0 %v17576_v62  ;;  %v17587_v62 = vld [vmem:[#allocation228_spill] sm:$0xff] }
 0x3d2   :  { %10127 = vmatpush1.bf16.msra.mxu1 %v17577_v57  ;;  %v17588_v57 = vld [vmem:[#allocation208_spill] sm:$0xff] }
 0x3d3   :  { %10671 = vmatpush3.bf16.msra.mxu0 %v17578_v32  ;;  %10129 = vmatprep.subr.bf16.mxu1 %v17579_v27  ;;  %v17589_v32 = vld [vmem:[#allocation230_spill] sm:$0xff]  ;;  %v17590_v27 = vld [vmem:[#allocation211_spill] sm:$0xff] }
 0x3d4   :  { %10673 = vmatprep.subr.bf16.mxu0 %v17580_v14  ;;  %v17591_v14 = vld [vmem:[#allocation147_spill] sm:$0xff] }
 0x3d6   :  { %10131 = vmatpush1.bf16.msra.mxu1 %v17581_v44  ;;  %v17592_v44 = vld [vmem:[#allocation150_spill] sm:$0xff] }
 0x3d7   :  { %10675 = vmatpush3.bf16.msra.mxu0 %v17582_v16  ;;  %10133 = vmatprep.subr.bf16.mxu1 %v17583_v24  ;;  %v17593_v16 = vld [vmem:[#allocation151_spill] sm:$0xff]  ;;  %v17594_v24 = vld [vmem:[#allocation12_spill] sm:$0xff] }
 0x3d8   :  { %10677 = vmatprep.subr.bf16.mxu0 %v17584_v25  ;;  %v17595_v25 = vld [vmem:[#allocation14_spill] sm:$0xff] }
 0x3da   :  { %10135 = vmatpush1.bf16.msra.mxu1 %v17585_v56  ;;  %v17596_v56 = vld [vmem:[#allocation17_spill] sm:$0xff] }
 0x3db   :  { %10679 = vmatpush3.bf16.msra.mxu0 %v17586_v4  ;;  %10137 = vmatprep.subr.bf16.mxu1 %v17587_v62  ;;  %v17597_v4 = vld [vmem:[#allocation114_spill] sm:$0xff]  ;;  %v17598_v62 = vld [vmem:[#allocation227_spill] sm:$0xff] }
 0x3dc   :  { %10681 = vmatprep.subr.bf16.mxu0 %v17588_v57  ;;  %v17600_v57 = vld [vmem:[#allocation229_spill] sm:$0xff] }
 0x3de   :  { %10139 = vmatpush1.bf16.msra.mxu1 %v17589_v32  ;;  %v17601_v32 = vld [vmem:[#allocation231_spill] sm:$0xff] }
 0x3df   :  { %10683 = vmatpush3.bf16.msra.mxu0 %v17590_v27  ;;  %10141 = vmatprep.subr.bf16.mxu1 %v17591_v14  ;;  %v17602_v27 = vld [vmem:[#allocation232_spill] sm:$0xff]  ;;  %v17603_v14 = vld [vmem:[#allocation233_spill] sm:$0xff] }
 0x3e0   :  { %10685 = vmatprep.subr.bf16.mxu0 %v17512_v42 }
 0x3e1   :  { %4608 = vmatmul.mubr.f32.vlgmr.msra.gmra.mrb[26].mxu1 %v14907_v58 }
 0x3e2   :  { %6809 = vmatmul.mubr.f32.vlgmr.msra.gmra.mrb[12].mxu0 %v14912_v28  ;;  %4614 = vmatprep.mubr.f32.mxu1 %v14922_v1 }
 0x3e3   :  { %10143 = vmatpush1.bf16.msra.mxu1 %v17592_v44  ;;  %6815 = vmatprep.mubr.f32.mxu0 %v14933_v2  ;;  %v17604_v44 = vld [vmem:[#allocation159_spill] sm:$0xff] }
 0x3e4   :  { %10687 = vmatpush3.bf16.msra.mxu0 %v17513_v18  ;;  %10145 = vmatprep.subr.bf16.mxu1 %v17593_v16  ;;  %v17605_v16 = vld [vmem:[#allocation234_spill] sm:$0xff] }
 0x3e5   :  { %4616 = vmatmul.mubr.f32.gmra.mrb[28].mxu1 %v14917_v21  ;;  %10689 = vmatprep.subr.bf16.mxu0 %v17514_v45 }
 0x3e6   :  { %6818 = vmatmul.mubr.f32.gmra.mrb[14].mxu0 %v14928_v10  ;;  %4816 = vmatprep.mubr.f32.mxu1 %v14915_v39  ;;  %v17599_v39 = vld [vmem:[#allocation148_spill] sm:$0xff] }
 0x3e7   :  { %10147 = vmatpush1.bf16.msra.mxu1 %v17594_v24  ;;  %6922 = vmatprep.mubr.f32.mxu0 %v14925_v40  ;;  %v17606_v24 = vld [vmem:[#allocation235_spill] sm:$0xff] }
 0x3e8   :  { %10691 = vmatpush3.bf16.msra.mxu0 %v17515_v38  ;;  %10149 = vmatprep.subr.bf16.mxu1 %v17595_v25  ;;  %v17607_v25 = vld [vmem:[#allocation236_spill] sm:$0xff] }
 0x3e9   :  { %10693 = vmatprep.subr.bf16.mxu0 %v17516_v17 }
 0x3eb   :  { %10151 = vmatpush1.bf16.msra.mxu1 %v17596_v56  ;;  %v17608_v56 = vld [vmem:[#allocation11_spill] sm:$0xff] }
 0x3ec   :  { %10695 = vmatpush3.bf16.msra.mxu0 %v17517_v47  ;;  %10153 = vmatprep.subr.bf16.mxu1 %v17597_v4  ;;  %v17609_v4 = vld [vmem:[#allocation237_spill] sm:$0xff] }
 0x3ed   :  { %10697 = vmatprep.subr.bf16.mxu0 %v17518_v33 }
 0x3ef   :  { %10155 = vmatpush1.bf16.msra.mxu1 %v17598_v62  ;;  %v17610_v62 = vld [vmem:[#allocation101_spill] sm:$0xff] }
 0x3f0   :  { %10699 = vmatpush3.bf16.msra.mxu0 %v17519_v34  ;;  %10157 = vmatprep.subr.bf16.mxu1 %v17599_v39  ;;  %v17611_v39 = vld [vmem:[#allocation13_spill] sm:$0xff] }
 0x3f1   :  { %10701 = vmatprep.subr.bf16.mxu0 %v17520_v59 }
 0x3f3   :  { %10159 = vmatpush1.bf16.msra.mxu1 %v17600_v57  ;;  %v17612_v57 = vld [vmem:[#allocation16_spill] sm:$0xff] }
 0x3f4   :  { %10703 = vmatpush3.bf16.msra.mxu0 %v17521_v51  ;;  %10161 = vmatprep.subr.bf16.mxu1 %v17601_v32  ;;  %v17613_v32 = vld [vmem:[#allocation238_spill] sm:$0xff] }
 0x3f5   :  { %10705 = vmatprep.subr.bf16.mxu0 %v17522_v53 }
 0x3f7   :  { %10163 = vmatpush1.bf16.msra.mxu1 %v17602_v27  ;;  %v17614_v27 = vld [vmem:[#allocation18_spill] sm:$0xff] }
 0x3f8   :  { %10707 = vmatpush3.bf16.msra.mxu0 %v17523_v29  ;;  %10165 = vmatprep.subr.bf16.mxu1 %v17603_v14  ;;  %v17615_v14 = vld [vmem:[#allocation102_spill] sm:$0xff] }
 0x3f9   :  { %10709 = vmatprep.subr.bf16.mxu0 %v17524_v35 }
 0x3fb   :  { %10167 = vmatpush1.bf16.msra.mxu1 %v17604_v44  ;;  %v17616_v44 = vld [vmem:[#allocation21_spill] sm:$0xff] }
 0x3fc   :  { %10711 = vmatpush3.bf16.msra.mxu0 %v17525_v55  ;;  %10169 = vmatprep.subr.bf16.mxu1 %v17605_v16  ;;  %v17617_v16 = vld [vmem:[#allocation239_spill] sm:$0xff] }
 0x3fd   :  { %10713 = vmatprep.subr.bf16.mxu0 %v17526_v20 }
 0x3ff   :  { %10171 = vmatpush1.bf16.msra.mxu1 %v17606_v24  ;;  %v17618_v24 = vld [vmem:[#allocation118_spill] sm:$0xff] }
 0x400   :  { %10715 = vmatpush3.bf16.msra.mxu0 %v17527_v60  ;;  %10173 = vmatprep.subr.bf16.mxu1 %v17607_v25  ;;  %v17619_v25 = vld [vmem:[#allocation107_spill] sm:$0xff] }
 0x401   :  { %10717 = vmatprep.subr.bf16.mxu0 %v17608_v56  ;;  %v17620_v56 = vld [vmem:[#allocation119_spill] sm:$0xff] }
 0x403   :  { %6926 = vmatmul.mubr.f32.vlgmr.msra.gmra.mrb[16].mxu0 %v14920_v30  ;;  %10175 = vmatpush1.bf16.msra.mxu1 %v17609_v4  ;;  %v17621_v4 = vld [vmem:[#allocation111_spill] sm:$0xff] }
 0x404   :  { %6933 = vmatprep.mubr.f32.mxu0 %v14941_v63  ;;  %10719 = vmatpush3.bf16.msra.mxu0 %v17610_v62  ;;  %v17622_v62 = vld [vmem:[#allocation174_spill] sm:$0xff] }
 0x405   :  { %10177 = vmatprep.subr.bf16.mxu1 %v17611_v39  ;;  %10721 = vmatprep.subr.bf16.mxu0 %v17612_v57  ;;  %v17623_v39 = vld [vmem:[#allocation240_spill] sm:$0xff]  ;;  %v17624_v57 = vld [vmem:[#allocation179_spill] sm:$0xff] }
 0x407   :  { %6937 = vmatmul.mubr.f32.gmra.mrb[18].mxu0 %v14938_v15  ;;  %10179 = vmatpush1.bf16.msra.mxu1 %v17613_v32  ;;  %v17625_v32 = vld [vmem:[#allocation241_spill] sm:$0xff] }
 0x408   :  { %10723 = vmatpush3.bf16.msra.mxu0 %v17614_v27  ;;  %7103 = vmatprep.mubr.f32.mxu0 %v14909_v3  ;;  %v17626_v27 = vld [vmem:[#allocation99_spill] sm:$0xff] }
 0x409   :  { %10181 = vmatprep.subr.bf16.mxu1 %v17615_v14  ;;  %10725 = vmatprep.subr.bf16.mxu0 %v17616_v44  ;;  %v17627_v14 = vld [vmem:[#allocation242_spill] sm:$0xff]  ;;  %v17628_v44 = vld [vmem:[#allocation121_spill] sm:$0xff] }
 0x40b   :  { %10183 = vmatpush1.bf16.msra.mxu1 %v17617_v16  ;;  %v17629_v16 = vld [vmem:[#allocation105_spill] sm:$0xff] }
 0x40c   :  { %10727 = vmatpush3.bf16.msra.mxu0 %v17618_v24  ;;  %10185 = vmatprep.subr.bf16.mxu1 %v17619_v25  ;;  %v17630_v24 = vld [vmem:[#allocation123_spill] sm:$0xff] }
 0x40d   :  { %10729 = vmatprep.subr.bf16.mxu0 %v17620_v56  ;;  %v17631_v25 = vld [vmem:[#allocation243_spill] sm:$0xff]  ;;  %v17632_v56 = vld [vmem:[#allocation129_spill] sm:$0xff] }
 0x40f   :  { %10187 = vmatpush1.bf16.msra.mxu1 %v17621_v4  ;;  %v17633_v4 = vld [vmem:[#allocation244_spill] sm:$0xff] }
 0x410   :  { %10731 = vmatpush3.bf16.msra.mxu0 %v17622_v62  ;;  %10189 = vmatprep.subr.bf16.mxu1 %v17623_v39  ;;  %v17634_v62 = vld [vmem:[#allocation133_spill] sm:$0xff] }
 0x411   :  { %10733 = vmatprep.subr.bf16.mxu0 %v17624_v57  ;;  %v17635_v39 = vld [vmem:[#allocation245_spill] sm:$0xff]  ;;  %v17636_v57 = vld [vmem:[#allocation94_spill] sm:$0xff] }
 0x413   :  { %10191 = vmatpush1.bf16.msra.mxu1 %v17625_v32  ;;  %v17637_v32 = vld [vmem:[#allocation113_spill] sm:$0xff] }
 0x414   :  { %10735 = vmatpush3.bf16.msra.mxu0 %v17626_v27  ;;  %10193 = vmatprep.subr.bf16.mxu1 %v17627_v14  ;;  %v17638_v27 = vld [vmem:[#allocation134_spill] sm:$0xff]  ;;  %v17639_v14 = vld [vmem:[#allocation15_spill] sm:$0xff] }
 0x415   :  { %10737 = vmatprep.subr.bf16.mxu0 %v17628_v44  ;;  %v17640_v44 = vld [vmem:[#allocation19_spill] sm:$0xff] }
 0x417   :  { %10195 = vmatpush1.bf16.msra.mxu1 %v17629_v16  ;;  %v17641_v16 = vld [vmem:[#allocation20_spill] sm:$0xff] }
 0x418   :  { %10739 = vmatpush3.bf16.msra.mxu0 %v17630_v24  ;;  %10197 = vmatprep.subr.bf16.mxu1 %v17631_v25  ;;  %v17647_v24 = vld [vmem:[#allocation33_spill] sm:$0xff] }
 0x419   :  { %10741 = vmatprep.subr.bf16.mxu0 %v17632_v56  ;;  %v17651_v25 = vld [vmem:[#allocation49_spill] sm:$0xff] }
 0x41a   :  { %v17654_v56 = vld [vmem:[#allocation57_spill] sm:$0xff] }
 0x41b   :  { %10199 = vmatpush1.bf16.msra.mxu1 %v17633_v4  ;;  %v17658_v4 = vld [vmem:[#allocation83_spill] sm:$0xff] }
 0x41c   :  { %10743 = vmatpush3.bf16.msra.mxu0 %v17634_v62  ;;  %10201 = vmatprep.subr.bf16.mxu1 %v17635_v39  ;;  %v17661_v39 = vld [vmem:[#allocation84_spill] sm:$0xff] }
 0x41d   :  { %10745 = vmatprep.subr.bf16.mxu0 %v17636_v57  ;;  %v15160_v57 = vld [vmem:[#allocation2 + $0x28] sm:$0xff] }
 0x41e   :  { %17662 = vst [vmem:[#allocation46_spill] sm:$0xff] %v15160_v57 }
 0x41f   :  { %10203 = vmatpush1.bf16.msra.mxu1 %v17637_v32 }
 0x420   :  { %10747 = vmatpush3.bf16.msra.mxu0 %v17638_v27  ;;  %10205 = vmatprep.subr.bf16.mxu1 %v17639_v14  ;;  %v17663_v27 = vld [vmem:[#allocation91_spill] sm:$0xff] }
 0x421   :  { %10749 = vmatprep.subr.bf16.mxu0 %v17512_v42  ;;  %v17642_v42 = vld [vmem:[#allocation24_spill] sm:$0xff] }
 0x422   :  { %4819 = vmatmul.mubr.f32.vlgmr.msra.gmra.mrb[26].mxu1 %v14912_v28  ;;  %v17643_v28 = vld [vmem:[#allocation26_spill] sm:$0xff] }
 0x423   :  { %7105 = vmatmul.mubr.f32.vlgmr.msra.gmra.mrb[20].mxu0 %v14907_v58  ;;  %4826 = vmatprep.mubr.f32.mxu1 %v14933_v2  ;;  %v17644_v2 = vld [vmem:[#allocation28_spill] sm:$0xff] }
 0x424   :  { %10207 = vmatpush1.bf16.msra.mxu1 %v17640_v44  ;;  %7110 = vmatprep.mubr.f32.mxu0 %v14922_v1 }
 0x425   :  { %10751 = vmatpush3.bf16.msra.mxu0 %v17513_v18  ;;  %10209 = vmatprep.subr.bf16.mxu1 %v17641_v16  ;;  %v4044_v18 = vmul.f32 0.020833334, %v14901_v52  ;;  %v17649_v52 = vld [vmem:[#allocation41_spill] sm:$0xff] }
 0x426   :  { %4829 = vmatmul.mubr.f32.gmra.mrb[28].mxu1 %v14928_v10  ;;  %10753 = vmatprep.subr.bf16.mxu0 %v17514_v45  ;;  %v17645_v45 = vld [vmem:[#allocation29_spill] sm:$0xff] }
 0x427   :  { %7112 = vmatmul.mubr.f32.gmra.mrb[22].mxu0 %v14917_v21  ;;  %4966 = vmatprep.mubr.f32.mxu1 %v14925_v40  ;;  %v15114_v40 = vld [vmem:[#allocation2 + $0x10] sm:$0xff] }
 0x428   :  { %10211 = vmatpush1.bf16.msra.mxu1 %v17642_v42  ;;  %7214 = vmatprep.mubr.f32.mxu0 %v14909_v3  ;;  %17646 = vst [vmem:[#allocation34_spill] sm:$0xff] %v15114_v40  ;;  %v4050_v10 = vsub.f32 %v15114_v40, %v4044_v18  ;;  %v17665_v18 = vld [vmem:[#allocation92_spill] sm:$0xff]  ;;  %v17668_v40 = vld [vmem:[#allocation98_spill] sm:$0xff] }
 0x429   :  { %10755 = vmatpush3.bf16.msra.mxu0 %v17515_v38  ;;  %10213 = vmatprep.subr.bf16.mxu1 %v17643_v28  ;;  %v17648_v38 = vld [vmem:[#allocation38_spill] sm:$0xff] }
 0x42a   :  { %10757 = vmatprep.subr.bf16.mxu0 %v17516_v17  ;;  %v4056_v17 = vmul.f32 %v4050_v10, %v4050_v10  ;;  %v17666_v10 = vld [vmem:[#allocation97_spill] sm:$0xff] }
 0x42c   :  { %10215 = vmatpush1.bf16.msra.mxu1 %v17644_v2 }
 0x42d   :  { %10759 = vmatpush3.bf16.msra.mxu0 %v17517_v47  ;;  %10217 = vmatprep.subr.bf16.mxu1 %v17645_v45  ;;  %v17650_v47 = vld [vmem:[#allocation47_spill] sm:$0xff] }
 0x42e   :  { %10761 = vmatprep.subr.bf16.mxu0 %v17518_v33  ;;  %v15125_v33 = vand.u32 4294901760, %v4056_v17 }
 0x430   :  { %10219 = vmatpush1.bf16.msra.mxu1 %v17647_v24 }
 0x431   :  { %10763 = vmatpush3.bf16.msra.mxu0 %v17519_v34  ;;  %10221 = vmatprep.subr.bf16.mxu1 %v17648_v38  ;;  %v17652_v34 = vld [vmem:[#allocation56_spill] sm:$0xff] }
 0x432   :  { %10765 = vmatprep.subr.bf16.mxu0 %v17520_v59  ;;  %v15132_v59 = vsub.f32 %v4056_v17, %v15125_v33 }
 0x434   :  { %10223 = vmatpush1.bf16.msra.mxu1 %v17649_v52  ;;  %17653 = vst [vmem:[#allocation37_spill] sm:$0xff] %v15132_v59 }
 0x435   :  { %10767 = vmatpush3.bf16.msra.mxu0 %v17521_v51  ;;  %10225 = vmatprep.subr.bf16.mxu1 %v17650_v47  ;;  %v17655_v51 = vld [vmem:[#allocation64_spill] sm:$0xff] }
 0x436   :  { %10769 = vmatprep.subr.bf16.mxu0 %v17522_v53  ;;  %v15139_v53 = vand.u32 4294901760, %v15132_v59 }
 0x438   :  { %10227 = vmatpush1.bf16.msra.mxu1 %v17651_v25 }
 0x439   :  { %10771 = vmatpush3.bf16.msra.mxu0 %v17523_v29  ;;  %10229 = vmatprep.subr.bf16.mxu1 %v17652_v34  ;;  %v17656_v29 = vld [vmem:[#allocation142_spill] sm:$0xff] }
 0x43a   :  { %10773 = vmatprep.subr.bf16.mxu0 %v17524_v35  ;;  %v5506_v35 = vsub.f32 %v15132_v59, %v15139_v53 }
 0x43c   :  { %10231 = vmatpush1.bf16.msra.mxu1 %v17654_v56  ;;  %v15154_v62 = vand.u32 4294901760, %v5506_v35  ;;  %v17667_v35 = vld [vmem:[#allocation156_spill] sm:$0xff] }
 0x43d   :  { %10775 = vmatpush3.bf16.msra.mxu0 %v17525_v55  ;;  %10233 = vmatprep.subr.bf16.mxu1 %v17655_v51  ;;  %v17657_v55 = vld [vmem:[#allocation76_spill] sm:$0xff] }
 0x43e   :  { %10777 = vmatprep.subr.bf16.mxu0 %v17526_v20  ;;  %v4047_v20 = vmul.f32 0.020833334, %v14898_v49  ;;  %17660 = vst [vmem:[#allocation42_spill] sm:$0xff] %v15154_v62  ;;  %v17664_v49 = vld [vmem:[#allocation153_spill] sm:$0xff] }
 0x440   :  { %10235 = vmatpush1.bf16.msra.mxu1 %v17274_v22  ;;  %v4053_v32 = vsub.f32 %v15160_v57, %v4047_v20  ;;  %v17671_v57 = vld [vmem:[#allocation71_spill] sm:$0xff] }
 0x441   :  { %10779 = vmatpush3.bf16.msra.mxu0 %v17527_v60  ;;  %10237 = vmatprep.subr.bf16.mxu1 %v17275_v31  ;;  %v17659_v60 = vld [vmem:[#allocation145_spill] sm:$0xff] }
 0x442   :  { %10781 = vmatprep.subr.bf16.mxu0 %v17656_v29  ;;  %v4059_v17 = vmul.f32 %v4053_v32, %v4053_v32 }
 0x444   :  { %7216 = vmatmul.mubr.f32.vlgmr.msra.gmra.mrb[24].mxu0 %v14907_v58  ;;  %10239 = vmatpush1.bf16.msra.mxu1 %v17657_v55  ;;  %v15172_v20 = vand.u32 4294901760, %v4059_v17 }
 0x445   :  { %7221 = vmatprep.mubr.f32.mxu0 %v14922_v1  ;;  %10783 = vmatpush3.bf16.msra.mxu0 %v17656_v29 }
 0x446   :  { %10241 = vmatprep.subr.bf16.mxu1 %v17658_v4  ;;  %10785 = vmatprep.subr.bf16.mxu0 %v17659_v60  ;;  %17670 = vst [vmem:[#allocation51_spill] sm:$0xff] %v15172_v20  ;;  %v15179_v32 = vsub.f32 %v4059_v17, %v15172_v20  ;;  %v17680_v17 = vld [vmem:[#allocation175_spill] sm:$0xff] }
 0x448   :  { %7223 = vmatmul.mubr.f32.gmra.mrb[26].mxu0 %v14917_v21  ;;  %10243 = vmatpush1.bf16.msra.mxu1 %v17661_v39  ;;  %v15186_v54 = vand.u32 4294901760, %v15179_v32 }
 0x449   :  { %10787 = vmatpush3.bf16.msra.mxu0 %v17659_v60  ;;  %8874 = vmatprep.mubr.f32.mxu0 %v15154_v62  ;;  %v17675_v62 = vld [vmem:[#allocation120_spill] sm:$0xff] }
 0x44a   :  { %10245 = vmatprep.subr.bf16.mxu1 %v17663_v27  ;;  %10789 = vmatprep.subr.bf16.mxu0 %v17664_v49  ;;  %v5517_v8 = vsub.f32 %v15179_v32, %v15186_v54 }
 0x44c   :  { %10247 = vmatpush1.bf16.msra.mxu1 %v17665_v18  ;;  %v15198_v46 = vand.u32 4294901760, %v5517_v8  ;;  %v17688_v8 = vld [vmem:[#allocation254_spill] sm:$0xff] }
 0x44d   :  { %10791 = vmatpush3.bf16.msra.mxu0 %v17664_v49  ;;  %10249 = vmatprep.subr.bf16.mxu1 %v17666_v10 }
 0x44e   :  { %10793 = vmatprep.subr.bf16.mxu0 %v17667_v35  ;;  %17683 = vst [vmem:[#allocation55_spill] sm:$0xff] %v15198_v46 }
 0x450   :  { %10251 = vmatpush1.bf16.msra.mxu1 %v17668_v40 }
 0x451   :  { %10795 = vmatpush3.bf16.msra.mxu0 %v17667_v35  ;;  %10253 = vmatprep.subr.bf16.mxu1 %v17669_v41 }
 0x452   :  { %10797 = vmatprep.subr.bf16.mxu0 %v17671_v57 }
 0x454   :  { %10255 = vmatpush1.bf16.msra.mxu1 %v17672_v37 }
 0x455   :  { %10799 = vmatpush3.bf16.msra.mxu0 %v17671_v57  ;;  %10257 = vmatprep.subr.bf16.mxu1 %v17673_v11 }
 0x456   :  { %10801 = vmatprep.subr.bf16.mxu0 %v17674_v9 }
 0x458   :  { %10259 = vmatpush1.bf16.msra.mxu1 %v17675_v62 }
 0x459   :  { %10803 = vmatpush3.bf16.msra.mxu0 %v17674_v9  ;;  %10261 = vmatprep.subr.bf16.mxu1 %v17676_v50 }
 0x45a   :  { %10805 = vmatprep.subr.bf16.mxu0 %v17677_v36 }
 0x45c   :  { %10263 = vmatpush1.bf16.msra.mxu1 %v17678_v12 }
 0x45d   :  { %10807 = vmatpush3.bf16.msra.mxu0 %v17677_v36  ;;  %10265 = vmatprep.subr.bf16.mxu1 %v17679_v0 }
 0x45e   :  { %10809 = vmatprep.subr.bf16.mxu0 %v17680_v17 }
 0x460   :  { %10267 = vmatpush1.bf16.msra.mxu1 %v17681_v43 }
 0x461   :  { %10811 = vmatpush3.bf16.msra.mxu0 %v17680_v17  ;;  %10269 = vmatprep.subr.bf16.mxu1 %v17682_v23  ;;  %v17687_v23 = vld [vmem:[#allocation170_spill] sm:$0xff] }
 0x462   :  { %10813 = vmatprep.subr.bf16.mxu0 %v17684_v61 }
 0x463   :  { %4970 = vmatmul.mubr.f32.vlgmr.msra.gmra.mrb[26].mxu1 %v14920_v30  ;;  %v17689_v30 = vld [vmem:[#allocation255_spill] sm:$0xff] }
 0x464   :  { %8875 = vmatmul.mubr.f32.vlgmr.msra.gmra.mrb[28].mxu0 %v15198_v46  ;;  %4978 = vmatprep.mubr.f32.mxu1 %v14941_v63  ;;  %v17690_v63 = vld [vmem:[#allocation176_spill] sm:$0xff]  ;;  %v17695_v46 = vld [vmem:[#allocation25_spill] sm:$0xff] }
 0x465   :  { %10271 = vmatpush1.bf16.msra.mxu1 %v17685_v48  ;;  %10815 = vmatpush3.bf16.msra.mxu0 %v17684_v61  ;;  %v17691_v48 = vld [vmem:[#allocation257_spill] sm:$0xff]  ;;  %v17692_v61 = vld [vmem:[#allocation22_spill] sm:$0xff] }
 0x466   :  { %8909 = vmatprep.mubr.f32.mxu0 %v15125_v33  ;;  %10273 = vmatprep.subr.bf16.mxu1 %v17686_v5  ;;  %v17693_v5 = vld [vmem:[#allocation103_spill] sm:$0xff] }
 0x467   :  { %4982 = vmatmul.mubr.f32.gmra.mrb[28].mxu1 %v14938_v15  ;;  %10817 = vmatprep.subr.bf16.mxu0 %v17687_v23  ;;  %v17694_v15 = vld [vmem:[#allocation23_spill] sm:$0xff] }
 0x468   :  { %5245 = vmatprep.mubr.f32.mxu1 %v14909_v3 }
 0x469   :  { %10275 = vmatpush1.bf16.msra.mxu1 %v17688_v8  ;;  %10819 = vmatpush3.bf16.msra.mxu0 %v17687_v23  ;;  %v17696_v8 = vld [vmem:[#allocation246_spill] sm:$0xff] }
 0x46a   :  { %10277 = vmatprep.subr.bf16.mxu1 %v17689_v30  ;;  %10821 = vmatprep.subr.bf16.mxu0 %v17690_v63  ;;  %v17697_v30 = vld [vmem:[#allocation30_spill] sm:$0xff] }
 0x46d   :  { %10279 = vmatpush1.bf16.msra.mxu1 %v17691_v48  ;;  %10823 = vmatpush3.bf16.msra.mxu0 %v17690_v63  ;;  %v17699_v63 = vld [vmem:[#allocation247_spill] sm:$0xff] }
 0x46e   :  { %10281 = vmatprep.subr.bf16.mxu1 %v17692_v61  ;;  %10825 = vmatprep.subr.bf16.mxu0 %v17693_v5 }
 0x471   :  { %10283 = vmatpush1.bf16.msra.mxu1 %v17694_v15  ;;  %10827 = vmatpush3.bf16.msra.mxu0 %v17693_v5  ;;  %v17702_v15 = vld [vmem:[#allocation248_spill] sm:$0xff] }
 0x472   :  { %10285 = vmatprep.subr.bf16.mxu1 %v17695_v46  ;;  %10829 = vmatprep.subr.bf16.mxu0 %v17696_v8  ;;  %v17701_v46 = vld [vmem:[#allocation36_spill] sm:$0xff] }
 0x474   :  { %v8328_v23 = vpop.f32.mrb[4].mxu0 }
 0x475   :  { %10287 = vmatpush1.bf16.msra.mxu1 %v17697_v30  ;;  %10831 = vmatpush3.bf16.msra.mxu0 %v17696_v8  ;;  %v8329_v48 = vpop.f32.mrb[5].mxu0  ;;  %v17703_v30 = vld [vmem:[#allocation40_spill] sm:$0xff]  ;;  %v17704_v8 = vld [vmem:[#allocation43_spill] sm:$0xff] }
 0x476   :  { %10289 = vmatprep.subr.bf16.mxu1 %v17698_v13  ;;  %10833 = vmatprep.subr.bf16.mxu0 %v17699_v63  ;;  %v8330_v61 = vadd.f32 %v8329_v48, %v8328_v23  ;;  %v17705_v13 = vld [vmem:[#allocation250_spill] sm:$0xff]  ;;  %v17706_v23 = vld [vmem:[#allocation45_spill] sm:$0xff] }
 0x477   :  { %v17708_v48 = vld [vmem:[#allocation253_spill] sm:$0xff] }
 0x478   :  { %v8331_v19 = vpop.f32.mrb[6].mxu0 }
 0x479   :  { %10291 = vmatpush1.bf16.msra.mxu1 %v17700_v7  ;;  %10835 = vmatpush3.bf16.msra.mxu0 %v17699_v63  ;;  %v8332_v5 = vpop.f32.mrb[7].mxu0  ;;  %v17707_v7 = vld [vmem:[#allocation48_spill] sm:$0xff] }
 0x47a   :  { %10293 = vmatprep.subr.bf16.mxu1 %v17701_v46  ;;  %10837 = vmatprep.subr.bf16.mxu0 %v17702_v15  ;;  %v8333_v6 = vadd.f32 %v8332_v5, %v8331_v19  ;;  %v17709_v63 = vld [vmem:[#allocation52_spill] sm:$0xff]  ;;  %v17710_v19 = vld [vmem:[#allocation53_spill] sm:$0xff]  ;;  %v17712_v46 = vld [vmem:[#allocation54_spill] sm:$0xff] }
 0x47b   :  { %v17711_v5 = vld [vmem:[#allocation256_spill] sm:$0xff] }
 0x47d   :  { %10295 = vmatpush1.bf16.msra.mxu1 %v17703_v30  ;;  %10839 = vmatpush3.bf16.msra.mxu0 %v17702_v15  ;;  %v17713_v15 = vld [vmem:[#allocation58_spill] sm:$0xff] }
 0x47e   :  { %10297 = vmatprep.subr.bf16.mxu1 %v17704_v8  ;;  %10841 = vmatprep.subr.bf16.mxu0 %v17705_v13  ;;  %v17714_v30 = vld [vmem:[#allocation258_spill] sm:$0xff]  ;;  %v17715_v8 = vld [vmem:[#allocation59_spill] sm:$0xff] }
 0x481   :  { %10299 = vmatpush1.bf16.msra.mxu1 %v17706_v23  ;;  %10843 = vmatpush3.bf16.msra.mxu0 %v17705_v13  ;;  %v17716_v13 = vld [vmem:[#allocation61_spill] sm:$0xff]  ;;  %v17717_v23 = vld [vmem:[#allocation27_spill] sm:$0xff] }
 0x482   :  { %10301 = vmatprep.subr.bf16.mxu1 %v17707_v7  ;;  %10845 = vmatprep.subr.bf16.mxu0 %v17708_v48  ;;  %v17718_v7 = vld [vmem:[#allocation62_spill] sm:$0xff] }
 0x484   :  { %8910 = vmatmul.mubr.f32.vlgmr.msra.gmra.mrb[28].mxu0 %v15172_v20 }
 0x485   :  { %10303 = vmatpush1.bf16.msra.mxu1 %v17709_v63  ;;  %10847 = vmatpush3.bf16.msra.mxu0 %v17708_v48  ;;  %v17719_v48 = vld [vmem:[#allocation66_spill] sm:$0xff]  ;;  %v17720_v63 = vld [vmem:[#allocation32_spill] sm:$0xff] }
 0x486   :  { %8944 = vmatprep.mubr.f32.mxu0 %v15132_v59  ;;  %10305 = vmatprep.subr.bf16.mxu1 %v17710_v19 }
 0x487   :  { %10849 = vmatprep.subr.bf16.mxu0 %v17711_v5 }
 0x489   :  { %10307 = vmatpush1.bf16.msra.mxu1 %v17712_v46  ;;  %10851 = vmatpush3.bf16.msra.mxu0 %v17711_v5  ;;  %v17721_v5 = vld [vmem:[#allocation67_spill] sm:$0xff] }
 0x48a   :  { %10309 = vmatprep.subr.bf16.mxu1 %v17713_v15  ;;  %10853 = vmatprep.subr.bf16.mxu0 %v17714_v30  ;;  %v17722_v15 = vld [vmem:[#allocation69_spill] sm:$0xff] }
 0x48d   :  { %10311 = vmatpush1.bf16.msra.mxu1 %v17715_v8  ;;  %10855 = vmatpush3.bf16.msra.mxu0 %v17714_v30  ;;  %v17723_v8 = vld [vmem:[#allocation39_spill] sm:$0xff] }
 0x48e   :  { %10313 = vmatprep.subr.bf16.mxu1 %v17716_v13  ;;  %10857 = vmatprep.subr.bf16.mxu0 %v17717_v23 }
 0x491   :  { %10315 = vmatpush1.bf16.msra.mxu1 %v17718_v7  ;;  %10859 = vmatpush3.bf16.msra.mxu0 %v17717_v23  ;;  %v17724_v7 = vld [vmem:[#allocation70_spill] sm:$0xff] }
 0x492   :  { %10317 = vmatprep.subr.bf16.mxu1 %v17719_v48  ;;  %10861 = vmatprep.subr.bf16.mxu0 %v17720_v63  ;;  %v17725_v48 = vld [vmem:[#allocation77_spill] sm:$0xff] }
 0x494   :  { %v8366_v19 = vpop.f32.mrb[8].mxu0 }
 0x495   :  { %10319 = vmatpush1.bf16.msra.mxu1 %v17721_v5  ;;  %10863 = vmatpush3.bf16.msra.mxu0 %v17720_v63  ;;  %v8367_v46 = vpop.f32.mrb[9].mxu0  ;;  %v17727_v63 = vld [vmem:[#allocation78_spill] sm:$0xff] }
 0x496   :  { %10321 = vmatprep.subr.bf16.mxu1 %v17722_v15  ;;  %v8368_v30 = vadd.f32 %v8367_v46, %v8366_v19  ;;  %10865 = vmatprep.subr.bf16.mxu0 %v17723_v8  ;;  %v17728_v19 = vld [vmem:[#allocation80_spill] sm:$0xff]  ;;  %v17729_v46 = vld [vmem:[#allocation50_spill] sm:$0xff] }
 0x498   :  { %v6666_v13 = vadd.f32 %v8368_v30, %v8330_v61  ;;  %v8369_v59 = vpop.f32.mrb[10].mxu0  ;;  %v17730_v61 = vld [vmem:[#allocation81_spill] sm:$0xff] }
 0x499   :  { %10323 = vmatpush1.bf16.msra.mxu1 %v17724_v7  ;;  %10867 = vmatpush3.bf16.msra.mxu0 %v17723_v8  ;;  %v8370_v23 = vpop.f32.mrb[11].mxu0  ;;  %v17754_v8 = vld [vmem:[#allocation259_spill] sm:$0xff]  ;;  %v17756_v7 = vld [vmem:[#allocation261_spill] sm:$0xff] }
 0x49a   :  { %10325 = vmatprep.subr.bf16.mxu1 %v17725_v48  ;;  %v8371_v20 = vadd.f32 %v8370_v23, %v8369_v59  ;;  %10869 = vmatprep.subr.bf16.mxu0 %v17726_v26  ;;  %v17737_v59 = vld [vmem:[#allocation214_spill] sm:$0xff]  ;;  %v17759_v48 = vld [vmem:[#allocation263_spill] sm:$0xff] }
 0x49b   :  { %v17758_v23 = vld [vmem:[#allocation42_spill] sm:$0xff] }
 0x49c   :  { %v6673_v5 = vadd.f32 %v8371_v20, %v8333_v6  ;;  %v17753_v20 = vld [vmem:[#allocation73_spill] sm:$0xff] }
 0x49d   :  { %10327 = vmatpush1.bf16.msra.mxu1 %v17727_v63  ;;  %10871 = vmatpush3.bf16.msra.mxu0 %v17726_v26  ;;  %v17762_v63 = vld [vmem:[#allocation265_spill] sm:$0xff] }
 0x49e   :  { %10329 = vmatprep.subr.bf16.mxu1 %v17728_v19  ;;  %10873 = vmatprep.subr.bf16.mxu0 %v17729_v46  ;;  %v17763_v19 = vld [vmem:[#allocation154_spill] sm:$0xff] }
 0x4a1   :  { %10331 = vmatpush1.bf16.msra.mxu1 %v17730_v61  ;;  %10875 = vmatpush3.bf16.msra.mxu0 %v17729_v46  ;;  %v17765_v46 = vld [vmem:[#allocation104_spill] sm:$0xff]  ;;  %v17766_v61 = vld [vmem:[#allocation267_spill] sm:$0xff] }
 0x4a2   :  { %10333 = vmatprep.subr.bf16.mxu1 %v17639_v14  ;;  %10877 = vmatprep.subr.bf16.mxu0 %v17656_v29 }
 0x4a4   :  { %5247 = vmatmul.mubr.f32.vlgmr.msra.gmra.mrb[26].mxu1 %v14907_v58  ;;  %8945 = vmatmul.mubr.f32.vlgmr.msra.gmra.mrb[28].mxu0 %v15179_v32 }
 0x4a5   :  { %5253 = vmatprep.mubr.f32.mxu1 %v14922_v1  ;;  %10335 = vmatpush1.bf16.msra.mxu1 %v17640_v44 }
 0x4a6   :  { %10879 = vmatpush3.bf16.msra.mxu0 %v17656_v29  ;;  %8979 = vmatprep.mubr.f32.mxu0 %v15139_v53 }
 0x4a7   :  { %10337 = vmatprep.subr.bf16.mxu1 %v17641_v16  ;;  %10881 = vmatprep.subr.bf16.mxu0 %v17659_v60 }
 0x4a8   :  { %5255 = vmatmul.mubr.f32.gmra.mrb[28].mxu1 %v14917_v21 }
 0x4a9   :  { %10339 = vmatpush1.bf16.msra.mxu1 %v17642_v42  ;;  %5390 = vmatprep.mubr.f32.mxu1 %v14909_v3 }
 0x4aa   :  { %10883 = vmatpush3.bf16.msra.mxu0 %v17659_v60  ;;  %10341 = vmatprep.subr.bf16.mxu1 %v17643_v28 }
 0x4ab   :  { %10885 = vmatprep.subr.bf16.mxu0 %v17664_v49 }
 0x4ad   :  { %10343 = vmatpush1.bf16.msra.mxu1 %v17644_v2  ;;  %v17731_v2 = vld [vmem:[#allocation158_spill] sm:$0xff] }
 0x4ae   :  { %10887 = vmatpush3.bf16.msra.mxu0 %v17664_v49  ;;  %10345 = vmatprep.subr.bf16.mxu1 %v17645_v45  ;;  %v17732_v45 = vld [vmem:[#allocation85_spill] sm:$0xff] }
 0x4af   :  { %10889 = vmatprep.subr.bf16.mxu0 %v17667_v35 }
 0x4b1   :  { %10347 = vmatpush1.bf16.msra.mxu1 %v17647_v24  ;;  %v17735_v24 = vld [vmem:[#allocation89_spill] sm:$0xff] }
 0x4b2   :  { %10891 = vmatpush3.bf16.msra.mxu0 %v17667_v35  ;;  %10349 = vmatprep.subr.bf16.mxu1 %v17648_v38 }
 0x4b3   :  { %10893 = vmatprep.subr.bf16.mxu0 %v17671_v57 }
 0x4b5   :  { %10351 = vmatpush1.bf16.msra.mxu1 %v17649_v52  ;;  %v8404_v26 = vpop.f32.mrb[12].mxu0 }
 0x4b6   :  { %10895 = vmatpush3.bf16.msra.mxu0 %v17671_v57  ;;  %10353 = vmatprep.subr.bf16.mxu1 %v17650_v47  ;;  %v8405_v6 = vpop.f32.mrb[13].mxu0  ;;  %v17736_v47 = vld [vmem:[#allocation95_spill] sm:$0xff] }
 0x4b7   :  { %v8406_v3 = vadd.f32 %v8405_v6, %v8404_v26  ;;  %10897 = vmatprep.subr.bf16.mxu0 %v17674_v9  ;;  %v17767_v26 = vld [vmem:[#allocation268_spill] sm:$0xff]  ;;  %v17768_v6 = vld [vmem:[#allocation269_spill] sm:$0xff] }
 0x4b9   :  { %v6811_v14 = vadd.f32 %v8406_v3, %v6666_v13  ;;  %10355 = vmatpush1.bf16.msra.mxu1 %v17651_v25  ;;  %v8407_v44 = vpop.f32.mrb[14].mxu0  ;;  %v17755_v13 = vld [vmem:[#allocation260_spill] sm:$0xff] }
 0x4ba   :  { %10899 = vmatpush3.bf16.msra.mxu0 %v17674_v9  ;;  %10357 = vmatprep.subr.bf16.mxu1 %v17652_v34  ;;  %v8408_v16 = vpop.f32.mrb[15].mxu0 }
 0x4bb   :  { %v8409_v42 = vadd.f32 %v8408_v16, %v8407_v44  ;;  %10901 = vmatprep.subr.bf16.mxu0 %v17677_v36 }
 0x4bd   :  { %v6820_v28 = vadd.f32 %v8409_v42, %v6673_v5  ;;  %10359 = vmatpush1.bf16.msra.mxu1 %v17654_v56  ;;  %v17760_v5 = vld [vmem:[#allocation264_spill] sm:$0xff]  ;;  %v17770_v42 = vld [vmem:[#allocation271_spill] sm:$0xff] }
 0x4be   :  { %10903 = vmatpush3.bf16.msra.mxu0 %v17677_v36  ;;  %10361 = vmatprep.subr.bf16.mxu1 %v17655_v51  ;;  %v17739_v51 = vld [vmem:[#allocation216_spill] sm:$0xff] }
 0x4bf   :  { %10905 = vmatprep.subr.bf16.mxu0 %v17680_v17 }
 0x4c1   :  { %10363 = vmatpush1.bf16.msra.mxu1 %v17274_v22  ;;  %v17733_v22 = vld [vmem:[#allocation86_spill] sm:$0xff] }
 0x4c2   :  { %10907 = vmatpush3.bf16.msra.mxu0 %v17680_v17  ;;  %10365 = vmatprep.subr.bf16.mxu1 %v17275_v31  ;;  %v17734_v31 = vld [vmem:[#allocation88_spill] sm:$0xff] }
 0x4c3   :  { %10909 = vmatprep.subr.bf16.mxu0 %v17731_v2 }
 0x4c5   :  { %8980 = vmatmul.mubr.f32.vlgmr.msra.gmra.mrb[28].mxu0 %v15186_v54  ;;  %10367 = vmatpush1.bf16.msra.mxu1 %v17657_v55  ;;  %v17744_v55 = vld [vmem:[#allocation112_spill] sm:$0xff] }
 0x4c6   :  { %10911 = vmatpush3.bf16.msra.mxu0 %v17731_v2  ;;  %9014 = vmatprep.mubr.f32.mxu0 %v15125_v33  ;;  %v17771_v2 = vld [vmem:[#allocation272_spill] sm:$0xff] }
 0x4c7   :  { %10369 = vmatprep.subr.bf16.mxu1 %v17658_v4  ;;  %10913 = vmatprep.subr.bf16.mxu0 %v17732_v45  ;;  %v17749_v4 = vld [vmem:[#allocation100_spill] sm:$0xff] }
 0x4c9   :  { %10371 = vmatpush1.bf16.msra.mxu1 %v17661_v39  ;;  %v17751_v39 = vld [vmem:[#allocation173_spill] sm:$0xff] }
 0x4ca   :  { %10915 = vmatpush3.bf16.msra.mxu0 %v17732_v45  ;;  %10373 = vmatprep.subr.bf16.mxu1 %v17663_v27 }
 0x4cb   :  { %10917 = vmatprep.subr.bf16.mxu0 %v17733_v22 }
 0x4cd   :  { %10375 = vmatpush1.bf16.msra.mxu1 %v17665_v18 }
 0x4ce   :  { %10919 = vmatpush3.bf16.msra.mxu0 %v17733_v22  ;;  %10377 = vmatprep.subr.bf16.mxu1 %v17666_v10  ;;  %v17752_v10 = vld [vmem:[#allocation65_spill] sm:$0xff] }
 0x4cf   :  { %10921 = vmatprep.subr.bf16.mxu0 %v17734_v31 }
 0x4d1   :  { %10379 = vmatpush1.bf16.msra.mxu1 %v17668_v40 }
 0x4d2   :  { %10923 = vmatpush3.bf16.msra.mxu0 %v17734_v31  ;;  %10381 = vmatprep.subr.bf16.mxu1 %v17669_v41 }
 0x4d3   :  { %10925 = vmatprep.subr.bf16.mxu0 %v17735_v24 }
 0x4d5   :  { %10383 = vmatpush1.bf16.msra.mxu1 %v17672_v37 }
 0x4d6   :  { %10927 = vmatpush3.bf16.msra.mxu0 %v17735_v24  ;;  %v8442_v38 = vpop.f32.mrb[16].mxu0  ;;  %10385 = vmatprep.subr.bf16.mxu1 %v17673_v11  ;;  %v17738_v11 = vld [vmem:[#allocation215_spill] sm:$0xff]  ;;  %v17772_v24 = vld [vmem:[#allocation273_spill] sm:$0xff] }
 0x4d7   :  { %v8443_v52 = vpop.f32.mrb[17].mxu0  ;;  %10929 = vmatprep.subr.bf16.mxu0 %v17736_v47 }
 0x4d8   :  { %v8444_v25 = vadd.f32 %v8443_v52, %v8442_v38  ;;  %v17773_v38 = vld [vmem:[#allocation274_spill] sm:$0xff] }
 0x4d9   :  { %10387 = vmatpush1.bf16.msra.mxu1 %v17675_v62 }
 0x4da   :  { %v6928_v40 = vadd.f32 %v8444_v25, %v6811_v14  ;;  %10931 = vmatpush3.bf16.msra.mxu0 %v17736_v47  ;;  %v8445_v34 = vpop.f32.mrb[18].mxu0  ;;  %10389 = vmatprep.subr.bf16.mxu1 %v17676_v50  ;;  %v17740_v50 = vld [vmem:[#allocation51_spill] sm:$0xff]  ;;  %v17769_v14 = vld [vmem:[#allocation270_spill] sm:$0xff]  ;;  %v17775_v25 = vld [vmem:[#allocation125_spill] sm:$0xff] }
 0x4db   :  { %v8446_v41 = vpop.f32.mrb[19].mxu0  ;;  %10933 = vmatprep.subr.bf16.mxu0 %v17737_v59  ;;  %v17774_v47 = vld [vmem:[#allocation275_spill] sm:$0xff] }
 0x4dc   :  { %v8447_v37 = vadd.f32 %v8446_v41, %v8445_v34  ;;  %v17777_v34 = vld [vmem:[#allocation131_spill] sm:$0xff] }
 0x4dd   :  { %10391 = vmatpush1.bf16.msra.mxu1 %v17678_v12  ;;  %v17741_v12 = vld [vmem:[#allocation217_spill] sm:$0xff]  ;;  %v17778_v41 = vld [vmem:[#allocation135_spill] sm:$0xff] }
 0x4de   :  { %v6939_v56 = vadd.f32 %v8447_v37, %v6820_v28  ;;  %10935 = vmatpush3.bf16.msra.mxu0 %v17737_v59  ;;  %10393 = vmatprep.subr.bf16.mxu1 %v17679_v0  ;;  %v17742_v0 = vld [vmem:[#allocation108_spill] sm:$0xff]  ;;  %v17779_v59 = vld [vmem:[#allocation138_spill] sm:$0xff]  ;;  %v17780_v37 = vld [vmem:[#allocation137_spill] sm:$0xff] }
 0x4df   :  { %10937 = vmatprep.subr.bf16.mxu0 %v17738_v11 }
 0x4e1   :  { %10395 = vmatpush1.bf16.msra.mxu1 %v17681_v43  ;;  %v17743_v43 = vmov 0.0  }
 0x4e2   :  { %10939 = vmatpush3.bf16.msra.mxu0 %v17738_v11  ;;  %10397 = vmatprep.subr.bf16.mxu1 %v17739_v51  ;;  %v17782_v11 = vld [vmem:[#allocation74_spill] sm:$0xff] }
 0x4e3   :  { %10941 = vmatprep.subr.bf16.mxu0 %v17656_v29 }
 0x4e4   :  { %5392 = vmatmul.mubr.f32.vlgmr.msra.gmra.mrb[26].mxu1 %v14907_v58  ;;  %v17745_v58 = vld [vmem:[#allocation115_spill] sm:$0xff] }
 0x4e5   :  { %9015 = vmatmul.mubr.f32.vlgmr.msra.gmra.mrb[28].mxu0 %v17740_v50  ;;  %5398 = vmatprep.mubr.f32.mxu1 %v14922_v1  ;;  %v17746_v1 = vld [vmem:[#allocation220_spill] sm:$0xff] }
 0x4e6   :  { %10399 = vmatpush1.bf16.msra.mxu1 %v17741_v12  ;;  %10943 = vmatpush3.bf16.msra.mxu0 %v17656_v29  ;;  %v17747_v29 = vld [vmem:[#allocation122_spill] sm:$0xff] }
 0x4e7   :  { %9049 = vmatprep.mubr.f32.mxu0 %v15125_v33  ;;  %10401 = vmatprep.subr.bf16.mxu1 %v17742_v0 }
 0x4e8   :  { %5400 = vmatmul.mubr.f32.gmra.mrb[28].mxu1 %v14917_v21  ;;  %10945 = vmatprep.subr.bf16.mxu0 %v17659_v60  ;;  %v17748_v21 = vld [vmem:[#allocation124_spill] sm:$0xff] }
 0x4e9   :  { %5502 = vmatprep.mubr.f32.mxu1 %v17743_v43 }
 0x4ea   :  { %10403 = vmatpush1.bf16.msra.mxu1 %v17744_v55  ;;  %10947 = vmatpush3.bf16.msra.mxu0 %v17659_v60  ;;  %v17750_v60 = vld [vmem:[#allocation167_spill] sm:$0xff] }
 0x4eb   :  { %10405 = vmatprep.subr.bf16.mxu1 %v17745_v58  ;;  %10949 = vmatprep.subr.bf16.mxu0 %v17664_v49 }
 0x4ee   :  { %10407 = vmatpush1.bf16.msra.mxu1 %v17746_v1  ;;  %10951 = vmatpush3.bf16.msra.mxu0 %v17664_v49 }
 0x4ef   :  { %10409 = vmatprep.subr.bf16.mxu1 %v17747_v29  ;;  %10953 = vmatprep.subr.bf16.mxu0 %v17667_v35 }
 0x4f2   :  { %10411 = vmatpush1.bf16.msra.mxu1 %v17748_v21  ;;  %10955 = vmatpush3.bf16.msra.mxu0 %v17667_v35 }
 0x4f3   :  { %10413 = vmatprep.subr.bf16.mxu1 %v17749_v4  ;;  %10957 = vmatprep.subr.bf16.mxu0 %v17671_v57 }
 0x4f6   :  { %10415 = vmatpush1.bf16.msra.mxu1 %v17750_v60  ;;  %10959 = vmatpush3.bf16.msra.mxu0 %v17671_v57  ;;  %v8480_v62 = vpop.f32.mrb[20].mxu0 }
 0x4f7   :  { %10417 = vmatprep.subr.bf16.mxu1 %v17751_v39  ;;  %v8481_v27 = vpop.f32.mrb[21].mxu0  ;;  %10961 = vmatprep.subr.bf16.mxu0 %v17674_v9 }
 0x4f8   :  { %v8482_v49 = vadd.f32 %v8481_v27, %v8480_v62  ;;  %v17783_v62 = vld [vmem:[#allocation276_spill] sm:$0xff]  ;;  %v17784_v27 = vld [vmem:[#allocation277_spill] sm:$0xff] }
 0x4fa   :  { %v7107_v18 = vadd.f32 %v8482_v49, %v6928_v40  ;;  %10419 = vmatpush1.bf16.msra.mxu1 %v17752_v10  ;;  %10963 = vmatpush3.bf16.msra.mxu0 %v17674_v9  ;;  %v8483_v35 = vpop.f32.mrb[22].mxu0  ;;  %v17757_v9 = vld [vmem:[#allocation262_spill] sm:$0xff] }
 0x4fb   :  { %10421 = vmatprep.subr.bf16.mxu1 %v17753_v20  ;;  %v8484_v15 = vpop.f32.mrb[23].mxu0  ;;  %10965 = vmatprep.subr.bf16.mxu0 %v17677_v36  ;;  %v17776_v40 = vld [vmem:[#allocation130_spill] sm:$0xff] }
 0x4fc   :  { %v8485_v30 = vadd.f32 %v8484_v15, %v8483_v35  ;;  %v17785_v49 = vld [vmem:[#allocation278_spill] sm:$0xff]  ;;  %v17787_v35 = vld [vmem:[#allocation280_spill] sm:$0xff]  ;;  %v17788_v15 = vld [vmem:[#allocation281_spill] sm:$0xff] }
 0x4fe   :  { %v7114_v57 = vadd.f32 %v8485_v30, %v6939_v56  ;;  %10423 = vmatpush1.bf16.msra.mxu1 %v17754_v8  ;;  %10967 = vmatpush3.bf16.msra.mxu0 %v17677_v36  ;;  %v17761_v36 = vld [vmem:[#allocation55_spill] sm:$0xff]  ;;  %v17781_v56 = vld [vmem:[#allocation157_spill] sm:$0xff]  ;;  %v17789_v30 = vld [vmem:[#allocation282_spill] sm:$0xff] }
 0x4ff   :  { %10425 = vmatprep.subr.bf16.mxu1 %v17755_v13  ;;  %10969 = vmatprep.subr.bf16.mxu0 %v17680_v17 }
 0x502   :  { %10427 = vmatpush1.bf16.msra.mxu1 %v17756_v7  ;;  %10971 = vmatpush3.bf16.msra.mxu0 %v17680_v17  ;;  %v17764_v17 = vld [vmem:[#allocation266_spill] sm:$0xff] }
 0x503   :  { %10429 = vmatprep.subr.bf16.mxu1 %v17757_v9  ;;  %v17791_v9 = vld [vmem:[#allocation37_spill] sm:$0xff] }
 0x505   :  { %5508 = vmatmul.mubr.f32.vlgmr.msra.gmra.mrb[26].mxu1 %v17758_v23  ;;  %9050 = vmatmul.mubr.f32.vlgmr.msra.gmra.mrb[28].mxu0 %v17740_v50  ;;  %v17793_v23 = vld [vmem:[#allocation163_spill] sm:$0xff] }
 0x506   :  { %10431 = vmatpush1.bf16.msra.mxu1 %v17759_v48  ;;  %5513 = vmatprep.mubr.f32.mxu1 %v17743_v43  ;;  %v17794_v48 = vld [vmem:[#allocation284_spill] sm:$0xff] }
 0x507   :  { %10433 = vmatprep.subr.bf16.mxu1 %v17760_v5  ;;  %v17795_v5 = vld [vmem:[#allocation144_spill] sm:$0xff] }
 0x509   :  { %5519 = vmatmul.mubr.f32.gmra.mrb[28].mxu1 %v17761_v36  ;;  %v17796_v36 = vld [vmem:[#allocation285_spill] sm:$0xff] }
 0x50a   :  { %10435 = vmatpush1.bf16.msra.mxu1 %v17762_v63  ;;  %5749 = vmatprep.mubr.f32.mxu1 %v17743_v43  ;;  %v17797_v63 = vld [vmem:[#allocation171_spill] sm:$0xff] }
 0x50b   :  { %10437 = vmatprep.subr.bf16.mxu1 %v17763_v19  ;;  %v17798_v19 = vld [vmem:[#allocation286_spill] sm:$0xff] }
 0x50e   :  { %10439 = vmatpush1.bf16.msra.mxu1 %v17764_v17  ;;  %v17799_v17 = vld [vmem:[#allocation287_spill] sm:$0xff] }
 0x50f   :  { %10441 = vmatprep.subr.bf16.mxu1 %v17765_v46  ;;  %v17801_v46 = vld [vmem:[#allocation289_spill] sm:$0xff] }
 0x512   :  { %10443 = vmatpush1.bf16.msra.mxu1 %v17766_v61  ;;  %v17802_v61 = vld [vmem:[#allocation290_spill] sm:$0xff] }
 0x513   :  { %10445 = vmatprep.subr.bf16.mxu1 %v17767_v26  ;;  %v17803_v26 = vld [vmem:[#allocation291_spill] sm:$0xff] }
 0x516   :  { %10447 = vmatpush1.bf16.msra.mxu1 %v17768_v6  ;;  %v17805_v6 = vld [vmem:[#allocation293_spill] sm:$0xff] }
 0x517   :  { %v8518_v3 = vpop.f32.mrb[24].mxu0  ;;  %10449 = vmatprep.subr.bf16.mxu1 %v17769_v14  ;;  %v17807_v14 = vld [vmem:[#allocation295_spill] sm:$0xff] }
 0x518   :  { %v8519_v44 = vpop.f32.mrb[25].mxu0 }
 0x519   :  { %v8520_v16 = vadd.f32 %v8519_v44, %v8518_v3  ;;  %v17806_v3 = vld [vmem:[#allocation294_spill] sm:$0xff] }
 0x51a   :  { %10451 = vmatpush1.bf16.msra.mxu1 %v17770_v42 }
 0x51b   :  { %v8521_v28 = vpop.f32.mrb[26].mxu0  ;;  %10453 = vmatprep.subr.bf16.mxu1 %v17771_v2  ;;  %v15399_v45 = vadd.f32 %v8520_v16, %v7107_v18  ;;  %v17786_v18 = vld [vmem:[#allocation279_spill] sm:$0xff] }
 0x51c   :  { %v8522_v22 = vpop.f32.mrb[27].mxu0 }
 0x51d   :  { %v8523_v31 = vadd.f32 %v8522_v22, %v8521_v28 }
 0x51e   :  { %10455 = vmatpush1.bf16.msra.mxu1 %v17772_v24 }
 0x51f   :  { %10457 = vmatprep.subr.bf16.mxu1 %v17773_v38  ;;  %v15403_v52 = vadd.f32 %v8523_v31, %v7114_v57  ;;  %v17790_v57 = vld [vmem:[#allocation283_spill] sm:$0xff] }
 0x520   :  { %v11139_v38 = vld [vmem:[#allocation2] sm:$0xff] }
 0x522   :  { %10459 = vmatpush1.bf16.msra.mxu1 %v17774_v47  ;;  %v11140_v47 = vld [vmem:[#allocation2 + $0x8] sm:$0xff] }
 0x523   :  { %10461 = vmatprep.subr.bf16.mxu1 %v17775_v25 }
 0x525   :  { %5751 = vmatmul.mubr.f32.vlgmr.msra.gmra.mrb[26].mxu1 %v15125_v33 }
 0x526   :  { %10463 = vmatpush1.bf16.msra.mxu1 %v17776_v40  ;;  %5756 = vmatprep.mubr.f32.mxu1 %v17743_v43 }
 0x527   :  { %10465 = vmatprep.subr.bf16.mxu1 %v17777_v34 }
 0x529   :  { %5758 = vmatmul.mubr.f32.gmra.mrb[28].mxu1 %v17740_v50 }
 0x52a   :  { %10467 = vmatpush1.bf16.msra.mxu1 %v17778_v41  ;;  %5892 = vmatprep.mubr.f32.mxu1 %v17743_v43  ;;  %v11141_v41 = vld [vmem:[#allocation2 + $0x18] sm:$0xff] }
 0x52b   :  { %10469 = vmatprep.subr.bf16.mxu1 %v17779_v59 }
 0x52e   :  { %10471 = vmatpush1.bf16.msra.mxu1 %v17780_v37  ;;  %v11142_v37 = vld [vmem:[#allocation2 + $0x20] sm:$0xff] }
 0x52f   :  { %10473 = vmatprep.subr.bf16.mxu1 %v17781_v56 }
 0x532   :  { %10475 = vmatpush1.bf16.msra.mxu1 %v17782_v11 }
 0x533   :  { %10477 = vmatprep.subr.bf16.mxu1 %v17783_v62 }
 0x536   :  { %10479 = vmatpush1.bf16.msra.mxu1 %v17784_v27 }
 0x537   :  { %10481 = vmatprep.subr.bf16.mxu1 %v17785_v49 }
 0x53a   :  { %10483 = vmatpush1.bf16.msra.mxu1 %v17786_v18 }
 0x53b   :  { %10485 = vmatprep.subr.bf16.mxu1 %v17787_v35 }
 0x53e   :  { %10487 = vmatpush1.bf16.msra.mxu1 %v17788_v15 }
 0x53f   :  { %10489 = vmatprep.subr.bf16.mxu1 %v17789_v30 }
 0x542   :  { %10491 = vmatpush1.bf16.msra.mxu1 %v17790_v57 }
 0x543   :  { %10493 = vmatprep.subr.bf16.mxu1 %v17739_v51 }
 0x545   :  { %5895 = vmatmul.mubr.f32.vlgmr.msra.gmra.mrb[26].mxu1 %v17791_v9 }
 0x546   :  { %10495 = vmatpush1.bf16.msra.mxu1 %v17741_v12  ;;  %5900 = vmatprep.mubr.f32.mxu1 %v17743_v43 }
 0x547   :  { %10497 = vmatprep.subr.bf16.mxu1 %v17742_v0 }
 0x549   :  { %5903 = vmatmul.mubr.f32.gmra.mrb[28].mxu1 %v15179_v32  ;;  %v17792_v32 = vld [vmem:[#allocation141_spill] sm:$0xff] }
 0x54a   :  { %10499 = vmatpush1.bf16.msra.mxu1 %v17744_v55  ;;  %6005 = vmatprep.mubr.f32.mxu1 %v17743_v43 }
 0x54b   :  { %10501 = vmatprep.subr.bf16.mxu1 %v17745_v58 }
 0x54e   :  { %10503 = vmatpush1.bf16.msra.mxu1 %v17746_v1 }
 0x54f   :  { %10505 = vmatprep.subr.bf16.mxu1 %v17747_v29 }
 0x552   :  { %10507 = vmatpush1.bf16.msra.mxu1 %v17748_v21 }
 0x553   :  { %10509 = vmatprep.subr.bf16.mxu1 %v17749_v4 }
 0x556   :  { %10511 = vmatpush1.bf16.msra.mxu1 %v17750_v60 }
 0x557   :  { %10513 = vmatprep.subr.bf16.mxu1 %v17751_v39 }
 0x55a   :  { %10515 = vmatpush1.bf16.msra.mxu1 %v17752_v10 }
 0x55b   :  { %10517 = vmatprep.subr.bf16.mxu1 %v17753_v20 }
 0x55e   :  { %10519 = vmatpush1.bf16.msra.mxu1 %v17754_v8 }
 0x55f   :  { %10521 = vmatprep.subr.bf16.mxu1 %v17755_v13 }
 0x562   :  { %10523 = vmatpush1.bf16.msra.mxu1 %v17756_v7 }
 0x563   :  { %10525 = vmatprep.subr.bf16.mxu1 %v17792_v32 }
 0x565   :  { %6009 = vmatmul.mubr.f32.vlgmr.msra.gmra.mrb[26].mxu1 %v15139_v53  ;;  %v17800_v53 = vld [vmem:[#allocation288_spill] sm:$0xff] }
 0x566   :  { %10527 = vmatpush1.bf16.msra.mxu1 %v17793_v23  ;;  %6014 = vmatprep.mubr.f32.mxu1 %v17743_v43 }
 0x567   :  { %10529 = vmatprep.subr.bf16.mxu1 %v17794_v48 }
 0x569   :  { %6018 = vmatmul.mubr.f32.gmra.mrb[28].mxu1 %v15186_v54  ;;  %v17804_v54 = vld [vmem:[#allocation292_spill] sm:$0xff] }
 0x56a   :  { %10531 = vmatpush1.bf16.msra.mxu1 %v17795_v5  ;;  %6184 = vmatprep.mubr.f32.mxu1 %v17743_v43 }
 0x56b   :  { %10533 = vmatprep.subr.bf16.mxu1 %v17796_v36 }
 0x56e   :  { %10535 = vmatpush1.bf16.msra.mxu1 %v17797_v63 }
 0x56f   :  { %10537 = vmatprep.subr.bf16.mxu1 %v17798_v19 }
 0x572   :  { %10539 = vmatpush1.bf16.msra.mxu1 %v17799_v17 }
 0x573   :  { %10541 = vmatprep.subr.bf16.mxu1 %v17800_v53 }
 0x576   :  { %10543 = vmatpush1.bf16.msra.mxu1 %v17801_v46 }
 0x577   :  { %10545 = vmatprep.subr.bf16.mxu1 %v17802_v61 }
 0x57a   :  { %10547 = vmatpush1.bf16.msra.mxu1 %v17803_v26 }
 0x57b   :  { %10549 = vmatprep.subr.bf16.mxu1 %v17804_v54 }
 0x57e   :  { %10551 = vmatpush1.bf16.msra.mxu1 %v17805_v6 }
 0x57f   :  { %10553 = vmatprep.subr.bf16.mxu1 %v17806_v3 }
 0x582   :  { %10555 = vmatpush1.bf16.msra.mxu1 %v17807_v14 }
 0x583   :  { %10557 = vmatprep.subr.bf16.mxu1 %v17739_v51 }
 0x585   :  { %6186 = vmatmul.mubr.f32.vlgmr.msra.gmra.mrb[26].mxu1 %v15125_v33 }
 0x586   :  { %10559 = vmatpush1.bf16.msra.mxu1 %v17741_v12  ;;  %6191 = vmatprep.mubr.f32.mxu1 %v17743_v43 }
 0x587   :  { %10561 = vmatprep.subr.bf16.mxu1 %v17742_v0 }
 0x589   :  { %6193 = vmatmul.mubr.f32.gmra.mrb[28].mxu1 %v17740_v50 }
 0x58a   :  { %10563 = vmatpush1.bf16.msra.mxu1 %v17744_v55  ;;  %6295 = vmatprep.mubr.f32.mxu1 %v17743_v43 }
 0x58b   :  { %10565 = vmatprep.subr.bf16.mxu1 %v17745_v58 }
 0x58e   :  { %10567 = vmatpush1.bf16.msra.mxu1 %v17746_v1 }
 0x58f   :  { %10569 = vmatprep.subr.bf16.mxu1 %v17747_v29 }
 0x592   :  { %10571 = vmatpush1.bf16.msra.mxu1 %v17748_v21 }
 0x593   :  { %10573 = vmatprep.subr.bf16.mxu1 %v17749_v4 }
 0x596   :  { %10575 = vmatpush1.bf16.msra.mxu1 %v17750_v60 }
 0x597   :  { %10577 = vmatprep.subr.bf16.mxu1 %v17751_v39  ;;  %v17808_v39 = vld [vmem:[#allocation46_spill] sm:$0xff] }
 0x59a   :  { %10579 = vmatpush1.bf16.msra.mxu1 %v17752_v10  ;;  %v17809_v10 = vld [vmem:[#allocation34_spill] sm:$0xff] }
 0x59b   :  { %10581 = vmatprep.subr.bf16.mxu1 %v17753_v20 }
 0x59e   :  { %10583 = vmatpush1.bf16.msra.mxu1 %v17754_v8 }
 0x59f   :  { %10585 = vmatprep.subr.bf16.mxu1 %v17755_v13 }
 0x5a2   :  { %10587 = vmatpush1.bf16.msra.mxu1 %v17756_v7 }
 0x5a5   :  { %6297 = vmatmul.mubr.f32.vlgmr.msra.gmra.mrb[26].mxu1 %v15125_v33 }
 0x5a6   :  { %6302 = vmatprep.mubr.f32.mxu1 %v17743_v43 }
 0x5a9   :  { %6304 = vmatmul.mubr.f32.gmra.mrb[28].mxu1 %v17740_v50 }
 0x5d8   :  { %v9051_v51 = vpop.f32.mrb[28].mxu0 }
 0x5d9   :  { %v10974_v12 = vadd.f32 %v9051_v51, %v15403_v52  ;;  %v7902_v0 = vpop.f32.mrb[29].mxu0 }
 0x5da   :  { %v10975_v55 = vadd.f32 %v7902_v0, %v15399_v45 }
 0x5db   :  { %v7917_v58 = vmul.f32 0.020833334, %v10974_v12 }
 0x5dc   :  { %v7914_v1 = vmul.f32 0.020833334, %v10975_v55 }
 0x5dd   :  { %v7923_v29 = vadd.f32 1e-05, %v7917_v58 }
 0x5de   :  { %v7920_v21 = vadd.f32 1e-05, %v7914_v1 }
 0x5df   :  { %11090 = vrsqrt.f32 %v7923_v29 }
 0x5e0   :  { %11092 = vrsqrt.f32 %v7920_v21 }
 0x5e9   :  { %v11091_v4 = vpop.eup %11090 }
 0x5ea   :  { %v11093_v60 = vpop.eup %11092  ;;  %v7935_v33 = vmul.f32 %v17808_v39, %v11091_v4 }
 0x5eb   :  { %v7932_v43 = vmul.f32 %v17809_v10, %v11093_v60 }
 0x5ec   :  { %7941 = vst [vmem:[#allocation7 + $0x28] sm:$0xff] %v7935_v33 }
 0x5ed   :  { %7938 = vst [vmem:[#allocation7 + $0x10] sm:$0xff] %v7932_v43 }
 0x678   :  { %v6298_v50 = vpop.f32.mrb[26].mxu1 }
 0x679   :  { %v7912_v20 = vmul.f32 0.020833334, %v6298_v50  ;;  %v6300_v8 = vpop.f32.mrb[27].mxu1 }
 0x67a   :  { %v7913_v13 = vmul.f32 0.020833334, %v6300_v8 }
 0x67b   :  { %v7918_v7 = vadd.f32 1e-05, %v7912_v20 }
 0x67c   :  { %v7919_v44 = vadd.f32 1e-05, %v7913_v13  ;;  %v6305_v16 = vpop.f32.mrb[28].mxu1 }
 0x67d   :  { %11094 = vrsqrt.f32 %v7918_v7  ;;  %v7915_v42 = vmul.f32 0.020833334, %v6305_v16  ;;  %v6307_v28 = vpop.f32.mrb[29].mxu1 }
 0x67e   :  { %11096 = vrsqrt.f32 %v7919_v44  ;;  %v7916_v2 = vmul.f32 0.020833334, %v6307_v28 }
 0x67f   :  { %v7921_v45 = vadd.f32 1e-05, %v7915_v42 }
 0x680   :  { %v7922_v22 = vadd.f32 1e-05, %v7916_v2 }
 0x681   :  { %11098 = vrsqrt.f32 %v7921_v45 }
 0x682   :  { %11100 = vrsqrt.f32 %v7922_v22 }
 0x687   :  { %v11095_v31 = vpop.eup %11094 }
 0x688   :  { %v11097_v24 = vpop.eup %11096  ;;  %v7930_v52 = vmul.f32 %v11139_v38, %v11095_v31 }
 0x689   :  { %v7931_v25 = vmul.f32 %v11140_v47, %v11097_v24 }
 0x68a   :  { %7936 = vst [vmem:[#allocation7] sm:$0xff] %v7930_v52 }
 0x68b   :  { %v11099_v40 = vpop.eup %11098  ;;  %7937 = vst [vmem:[#allocation7 + $0x8] sm:$0xff] %v7931_v25 }
 0x68c   :  { %v11101_v34 = vpop.eup %11100  ;;  %v7933_v59 = vmul.f32 %v11141_v41, %v11099_v40 }
 0x68d   :  { %v7934_v56 = vmul.f32 %v11142_v37, %v11101_v34 }
 0x68e   :  { %7939 = vst [vmem:[#allocation7 + $0x18] sm:$0xff] %v7933_v59 }
 0x68f   :  { %7940 = vst [vmem:[#allocation7 + $0x20] sm:$0xff] %v7934_v56 }
 0x690   :  { %11198 = shalt.err (!%p11195_p6)
}
 0x691   :  { %s11199_s10 = scalar_lea.hbm %s15510_s2, 768 }
 0x692   :  { %p11200_p7 = scmp.ne.s32.totalorder %s15510_s2, %s11199_s10  ;;  %p11203_p8 = scmp.lt.u32.totalorder %s11199_s10, %s15510_s2 }
 0x694   :  { %p11205_p9 = pnand %p11203_p8, %p11200_p7 }
 0x696   :  { %11208 = shalt.err (!%p11205_p9)
}
 0x697   :  { %7953 = dma.vmem_to_hbm [thread:$0]  %s7948_s6, 768, %s15510_s2, [#allocation4], %s11216_s19, %s11216_s19, %s11217_s20  }
 0x698   :  { %11213 = dma.done.wait [#allocation4], 768  }
 0x699   :  { %11214 = vsyncadd [#allocation4], 4294966528 }
 0x69a   :  { %7957 = vsyncpa [#allocation3], 1 }
 0x69b   :  { %7958 = vsyncpa [#allocation6], 1 }
 0x69c   :  { %7959 = vsyncpa [#allocation4], 1 }

</bundles_post_ra>
